<compile_context>
chip_gen: v6e
topology: v6e:2x2x1
jax: 0.10.0
libtpu: 0.0.40
codegen_flags: <defaults>
</compile_context>

<pallas_src>
import jax
import jax.numpy as jnp
from jax.experimental import pallas as pl
from jax.experimental.pallas import tpu as pltpu


def _conv_out(hw, k=3, s=1):
    return ((hw[0] - (k - 1) - 1) // s + 1, (hw[1] - (k - 1) - 1) // s + 1)


def _make_fused_kernel(*, H, W, Cin, C1, C2, K, AUG,
                       size_1, size_2, size_3, action_size):
    """Per-sample fused forward kernel (one grid step = one sample)."""
    Ho1, Wo1 = H - K + 1, W - K + 1            # conv1 output spatial
    Hp1, Wp1 = Ho1 // 2, Wo1 // 2              # pool1 output spatial
    H2, W2 = Hp1, Wp1                          # conv2 input spatial
    Ho2, Wo2 = H2 - K + 1, W2 - K + 1          # conv2 output spatial
    Hp2, Wp2 = Ho2 // 2, Wo2 // 2              # pool2 output spatial
    S2 = Hp2 * Wp2

    # Input-indexed im2col row counts covering every valid conv output.
    L1 = H * W - (K - 1) * (W + 1)
    L2 = H2 * W2 - (K - 1) * (W2 + 1)
    Lm1 = L1 - 1                               # w-direction pair-max rows
    Lm2 = L2 - 1

    fc_in = S2 * C2 + AUG
    A = action_size

    # Row offsets of each weight inside the packed bf16 slab.
    n_w1, n_w2 = K * K * Cin, K * K * C1
    off_w1 = 0
    off_w2 = off_w1 + n_w1
    off_f1 = off_w2 + n_w2
    off_f2 = off_f1 + fc_in
    off_f3 = off_f2 + size_1
    off_o = off_f3 + size_2

    def kernel(x_ref, add_ref, w_ref, b_ref, out_ref,
               c1_ref, wm1_ref, p1_ref, c2_ref, wm2_ref):
        def wslab(off, rows, cols):            # packed bf16 weight slice
            return w_ref[pl.ds(off, rows), :][:, :cols]

        def brow(i, cols):                     # packed f32 bias row
            return b_ref[pl.ds(i, 1), :][:, :cols]

        def mxu(a_f32, w_bf16):                # bf16 operands, f32 accumulate
            return jnp.dot(a_f32.astype(jnp.bfloat16), w_bf16,
                           preferred_element_type=jnp.float32)

        # ---------- conv1 + bias + ReLU (in-kernel im2col, one matmul) ------
        patch1 = jnp.concatenate(
            [x_ref[pl.ds(dy * W + dx, L1), :]
             for dy in range(K) for dx in range(K)], axis=-1)   # (L1, K*K*Cin)
        y1 = mxu(patch1, wslab(off_w1, n_w1, C1)) + brow(0, C1)
        c1_ref[...] = jnp.maximum(y1, 0.0)

        # ---------- 2x2 max-pool #1: pair-max along w, then 2 strided loads -
        wm1_ref[...] = jnp.maximum(c1_ref[pl.ds(0, Lm1), :],
                                   c1_ref[pl.ds(1, Lm1), :])
        for io in range(Hp1):
            a = wm1_ref[pl.ds((2 * io) * W, Wp1, stride=2), :]
            b = wm1_ref[pl.ds((2 * io + 1) * W, Wp1, stride=2), :]
            p1_ref[pl.ds(io * Wp1, Wp1), :] = jnp.maximum(a, b)

        # ---------- conv2 + bias + ReLU --------------------------------------
        patch2 = jnp.concatenate(
            [p1_ref[pl.ds(dy * W2 + dx, L2), :]
             for dy in range(K) for dx in range(K)], axis=-1)   # (L2, K*K*C1)
        y2 = mxu(patch2, wslab(off_w2, n_w2, C2)) + brow(1, C2)
        c2_ref[...] = jnp.maximum(y2, 0.0)

        # ---------- 2x2 max-pool #2 + feature row (kept in registers) --------
        wm2_ref[...] = jnp.maximum(c2_ref[pl.ds(0, Lm2), :],
                                   c2_ref[pl.ds(1, Lm2), :])
        pieces = []
        for io in range(Hp2):
            a = wm2_ref[pl.ds((2 * io) * W2, Wp2, stride=2), :]
            b = wm2_ref[pl.ds((2 * io + 1) * W2, Wp2, stride=2), :]
            pr = jnp.maximum(a, b)                               # (Wp2, C2)
            for jo in range(Wp2):
                pieces.append(pr[jo:jo + 1, :])                  # s = io*Wp2+jo
        feat = jnp.concatenate(pieces + [add_ref[...]], axis=-1)  # (1, fc_in)

        # ---------- MLP head --------------------------------------------------
        h = jnp.maximum(mxu(feat, wslab(off_f1, fc_in, size_1)) + brow(2, size_1), 0.0)
        h = jnp.maximum(mxu(h, wslab(off_f2, size_1, size_2)) + brow(3, size_2), 0.0)
        h = jnp.maximum(mxu(h, wslab(off_f3, size_2, size_3)) + brow(4, size_3), 0.0)
        # final_layer and critic fused into one (size_3, A+1) matmul.
        z = mxu(h, wslab(off_o, size_3, A + 1)) + brow(5, A + 1)

        logits = z[:, :A]
        mx = jnp.max(logits, axis=-1, keepdims=True)
        e = jnp.exp(logits - mx)
        inv = pl.reciprocal(jnp.sum(e, axis=-1, keepdims=True), approx=True)
        probs = e * inv
        value = jnp.maximum(z[:, A:A + 1], 0.0)
        out_ref[...] = jnp.concatenate([probs, value], axis=-1)   # (1, A+1)

    scratch_shapes = [
        pltpu.VMEM((L1, C1), jnp.float32),            # conv1 out (input-indexed)
        pltpu.VMEM((Lm1, C1), jnp.float32),           # conv1 w-direction pair max
        pltpu.VMEM((Hp1 * Wp1, C1), jnp.float32),     # pool1 out
        pltpu.VMEM((L2, C2), jnp.float32),            # conv2 out (input-indexed)
        pltpu.VMEM((Lm2, C2), jnp.float32),           # conv2 w-direction pair max
    ]
    return kernel, scratch_shapes


class PolicyPallas:
    """Pallas port of `Policy` with a single fused forward kernel."""

    def __init__(self, state_size, action_size, aditional_aug,
                 conv_channels=6, kernel_size=3,
                 size_1=32, size_2=64, size_3=32, key=None):
        spatial, channels_in = state_size
        if not isinstance(spatial, tuple):
            spatial = (spatial, spatial)
        self.H, self.W = spatial
        self.Cin = channels_in
        self.C1 = conv_channels
        self.C2 = conv_channels * 2
        self.K = kernel_size
        self.action_size = action_size
        self.aditional_aug = aditional_aug
        self.size_1, self.size_2, self.size_3 = size_1, size_2, size_3

        s = _conv_out(spatial, kernel_size)
        s = (s[0] // 2, s[1] // 2)                 # pool1
        s = _conv_out(s, kernel_size)
        hp2, wp2 = s[0] // 2, s[1] // 2            # pool2
        self.S2 = hp2 * wp2
        self.size_now = self.S2 * self.C2
        fc_in = self.size_now + aditional_aug

        key = jax.random.PRNGKey(0) if key is None else key
        ks = jax.random.split(key, 14)

        def w(k, shape, scale=0.1):
            return scale * jax.random.normal(k, shape, jnp.float32)

        # PyTorch-shaped parameters (deterministic synthetic init).
        conv1_w = w(ks[0], (self.C1, channels_in, kernel_size, kernel_size))
        conv1_b = w(ks[1], (self.C1,))
        conv2_w = w(ks[2], (self.C2, self.C1, kernel_size, kernel_size))
        conv2_b = w(ks[3], (self.C2,))
        fc1_w = w(ks[4], (size_1, fc_in));        fc1_b = w(ks[5], (size_1,))
        fc2_w = w(ks[6], (size_2, size_1));       fc2_b = w(ks[7], (size_2,))
        fc3_w = w(ks[8], (size_3, size_2));       fc3_b = w(ks[9], (size_3,))
        fin_w = w(ks[10], (action_size, size_3)); fin_b = w(ks[11], (action_size,))
        cri_w = w(ks[12], (1, size_3));           cri_b = w(ks[13], (1,))

        # --- pack into kernel layout (all one-time, free) -------------------
        # im2col conv weights: rows ordered (dy, dx, cin), columns = cout.
        w1col = jnp.transpose(conv1_w, (2, 3, 1, 0)).reshape(-1, self.C1)
        w2col = jnp.transpose(conv2_w, (2, 3, 1, 0)).reshape(-1, self.C2)

        # fc1 rows permuted so the kernel's spatial-major pooled features
        # (index s*C2 + c) match torch's NCHW flatten (index c*S2 + s).
        fc1_wT = fc1_w.T                                         # (fc_in, size_1)
        g = [(m % self.C2) * self.S2 + (m // self.C2)
             for m in range(self.size_now)]
        perm = jnp.array(g + list(range(self.size_now, fc_in)), jnp.int32)
        wf1 = jnp.take(fc1_wT, perm, axis=0)
        wf2 = fc2_w.T
        wf3 = fc3_w.T
        # final_layer and critic fused into one output matrix (size_3, A+1).
        wout = jnp.concatenate([fin_w.T, cri_w.T], axis=1)
        bout = jnp.concatenate([fin_b, cri_b])

        # One bf16 weight slab (MXU operands) + one f32 bias slab.
        lane_w = max(self.C1, self.C2, size_1, size_2, size_3, action_size + 1)

        def padc(a):
            return jnp.pad(a, ((0, 0), (0, lane_w - a.shape[1])))

        def padb(v):
            return jnp.pad(v.reshape(1, -1), ((0, 0), (0, lane_w - v.shape[0])))

        self.W_all = jnp.concatenate(
            [padc(w1col), padc(w2col), padc(wf1), padc(wf2), padc(wf3), padc(wout)],
            axis=0).astype(jnp.bfloat16)
        self.B_all = jnp.concatenate(
            [padb(conv1_b), padb(conv2_b), padb(fc1_b), padb(fc2_b), padb(fc3_b),
             padb(bout)], axis=0).astype(jnp.float32)

        self._forward = jax.jit(self._forward_impl)

    def _forward_impl(self, x_nchw, aditional):
        N = x_nchw.shape[0]
        H, W, Cin = self.H, self.W, self.Cin
        AUG = 12   # torch hard-codes aditional.reshape(-1, 12); replicated here.

        # NCHW (PyTorch convention) -> spatial-major rows (h,w), lanes = C.
        x = jnp.transpose(x_nchw, (0, 2, 3, 1)).astype(jnp.float32)
        x = x.reshape(N, H * W, Cin)
        add = aditional.astype(jnp.float32).reshape(N, 1, AUG)

        kernel, scratch = _make_fused_kernel(
            H=H, W=W, Cin=Cin, C1=self.C1, C2=self.C2, K=self.K, AUG=AUG,
            size_1=self.size_1, size_2=self.size_2, size_3=self.size_3,
            action_size=self.action_size)

        out_w = self.action_size + 1
        out = pl.pallas_call(
            kernel,
            grid=(N,),
            in_specs=[
                pl.BlockSpec((None, H * W, Cin), lambda i: (i, 0, 0)),   # x (per sample)
                pl.BlockSpec((None, 1, AUG), lambda i: (i, 0, 0)),       # additional
                pl.BlockSpec(self.W_all.shape, lambda i: (0, 0)),        # packed weights
                pl.BlockSpec(self.B_all.shape, lambda i: (0, 0)),        # packed biases
            ],
            out_specs=pl.BlockSpec((None, 1, out_w), lambda i: (i, 0, 0)),
            out_shape=jax.ShapeDtypeStruct((N, 1, out_w), jnp.float32),
            scratch_shapes=scratch,
            compiler_params=pltpu.CompilerParams(
                dimension_semantics=("parallel",)),
        )(x, add, self.W_all, self.B_all)

        out = out.reshape(N, out_w)
        probs = out[:, :self.action_size]
        value = out[:, self.action_size:]
        return probs, value

    def forward(self, inputs):
        x_nchw, aditional = inputs
        # TODO(synk): torch.distributions.Categorical has no Pallas equivalent;
        # we return the softmax probabilities that would parameterize it.
        return self._forward(x_nchw, aditional)


if __name__ == "__main__":
    key = jax.random.PRNGKey(0)
    k_params, k_x, k_aug = jax.random.split(key, 3)

    state_size = (16, 4)        # spatial 16x16, 4 input channels
    action_size = 8
    aditional_aug = 12          # matches torch's hard-coded reshape(-1, 12)
    batch = 2

    policy = PolicyPallas(state_size, action_size, aditional_aug, key=k_params)

    x = jax.random.normal(k_x, (batch, 4, 16, 16), jnp.float32)   # NCHW input
    aditional = jax.random.normal(k_aug, (batch, 12), jnp.float32)

    probs, value = policy.forward((x, aditional))
    jax.block_until_ready((probs, value))

    assert probs.shape == (batch, action_size)
    assert value.shape == (batch, 1)
    assert bool(jnp.all(jnp.isfinite(probs))) and bool(jnp.all(jnp.isfinite(value)))
    # approx reciprocal + bf16 MXU operands -> allow a slightly looser sum check
    assert bool(jnp.allclose(jnp.sum(probs, axis=-1), 1.0, atol=5e-3))
    assert bool(jnp.all(probs >= 0.0))
    assert bool(jnp.all(value >= 0.0))          # critic has ReLU, like the spec

    print("KERNEL_OK")
</pallas_src>

<mosaic_0001>
module attributes {stable_mosaic.version = 11 : i64} {
  func.func @kernel(%arg0: i32, %arg1: memref<1x256x4xf32, #tpu.memory_space<vmem>>, %arg2: memref<1x1x12xf32, #tpu.memory_space<vmem>>, %arg3: memref<278x64xbf16, #tpu.memory_space<vmem>>, %arg4: memref<6x64xf32, #tpu.memory_space<vmem>>, %arg5: memref<1x1x9xf32, #tpu.memory_space<vmem>>, %arg6: memref<222x6xf32, #tpu.memory_space<vmem>>, %arg7: memref<221x6xf32, #tpu.memory_space<vmem>>, %arg8: memref<49x6xf32, #tpu.memory_space<vmem>>, %arg9: memref<33x12xf32, #tpu.memory_space<vmem>>, %arg10: memref<32x12xf32, #tpu.memory_space<vmem>>) attributes {dimension_semantics = [#tpu.dimension_semantics<parallel>], iteration_bounds = array<i64: 2>, scalar_prefetch = 0 : i64, scratch_operands = 5 : i64, tpu.core_type = #tpu.core_type<tc>, window_params = [{transform_indices = @transform_0, window_bounds = array<i64: 1, 256, 4>}, {transform_indices = @transform_1, window_bounds = array<i64: 1, 1, 12>}, {pipeline_mode = #tpu.pipeline_mode<synchronous>, transform_indices = @transform_2, window_bounds = array<i64: 278, 64>}, {pipeline_mode = #tpu.pipeline_mode<synchronous>, transform_indices = @transform_3, window_bounds = array<i64: 6, 64>}, {transform_indices = @transform_4, window_bounds = array<i64: 1, 1, 9>}]} {
    %c0 = arith.constant 0 : index
    %c0_0 = arith.constant 0 : index
    %c0_1 = arith.constant 0 : index
    %0 = vector.load %arg1[%c0, %c0_0, %c0_1] : memref<1x256x4xf32, #tpu.memory_space<vmem>>, vector<1x222x4xf32>
    %1 = vector.shape_cast %0 : vector<1x222x4xf32> to vector<222x4xf32>
    %c0_2 = arith.constant 0 : index
    %c1 = arith.constant 1 : index
    %c0_3 = arith.constant 0 : index
    %2 = vector.load %arg1[%c0_2, %c1, %c0_3] : memref<1x256x4xf32, #tpu.memory_space<vmem>>, vector<1x222x4xf32>
    %3 = vector.shape_cast %2 : vector<1x222x4xf32> to vector<222x4xf32>
    %c0_4 = arith.constant 0 : index
    %c2 = arith.constant 2 : index
    %c0_5 = arith.constant 0 : index
    %4 = vector.load %arg1[%c0_4, %c2, %c0_5] : memref<1x256x4xf32, #tpu.memory_space<vmem>>, vector<1x222x4xf32>
    %5 = vector.shape_cast %4 : vector<1x222x4xf32> to vector<222x4xf32>
    %c0_6 = arith.constant 0 : index
    %c16 = arith.constant 16 : index
    %c0_7 = arith.constant 0 : index
    %6 = vector.load %arg1[%c0_6, %c16, %c0_7] : memref<1x256x4xf32, #tpu.memory_space<vmem>>, vector<1x222x4xf32>
    %7 = vector.shape_cast %6 : vector<1x222x4xf32> to vector<222x4xf32>
    %c0_8 = arith.constant 0 : index
    %c17 = arith.constant 17 : index
    %c0_9 = arith.constant 0 : index
    %8 = vector.load %arg1[%c0_8, %c17, %c0_9] : memref<1x256x4xf32, #tpu.memory_space<vmem>>, vector<1x222x4xf32>
    %9 = vector.shape_cast %8 : vector<1x222x4xf32> to vector<222x4xf32>
    %c0_10 = arith.constant 0 : index
    %c18 = arith.constant 18 : index
    %c0_11 = arith.constant 0 : index
    %10 = vector.load %arg1[%c0_10, %c18, %c0_11] : memref<1x256x4xf32, #tpu.memory_space<vmem>>, vector<1x222x4xf32>
    %11 = vector.shape_cast %10 : vector<1x222x4xf32> to vector<222x4xf32>
    %c0_12 = arith.constant 0 : index
    %c32 = arith.constant 32 : index
    %c0_13 = arith.constant 0 : index
    %12 = vector.load %arg1[%c0_12, %c32, %c0_13] : memref<1x256x4xf32, #tpu.memory_space<vmem>>, vector<1x222x4xf32>
    %13 = vector.shape_cast %12 : vector<1x222x4xf32> to vector<222x4xf32>
    %c0_14 = arith.constant 0 : index
    %c33 = arith.constant 33 : index
    %c0_15 = arith.constant 0 : index
    %14 = vector.load %arg1[%c0_14, %c33, %c0_15] : memref<1x256x4xf32, #tpu.memory_space<vmem>>, vector<1x222x4xf32>
    %15 = vector.shape_cast %14 : vector<1x222x4xf32> to vector<222x4xf32>
    %c0_16 = arith.constant 0 : index
    %c34 = arith.constant 34 : index
    %c0_17 = arith.constant 0 : index
    %16 = vector.load %arg1[%c0_16, %c34, %c0_17] : memref<1x256x4xf32, #tpu.memory_space<vmem>>, vector<1x222x4xf32>
    %17 = vector.shape_cast %16 : vector<1x222x4xf32> to vector<222x4xf32>
    %18 = tpu.concatenate %1, %3, %5, %7, %9, %11, %13, %15, %17 in 1 : vector<222x4xf32>, vector<222x4xf32>, vector<222x4xf32>, vector<222x4xf32>, vector<222x4xf32>, vector<222x4xf32>, vector<222x4xf32>, vector<222x4xf32>, vector<222x4xf32> -> vector<222x36xf32>
    %c0_18 = arith.constant 0 : index
    %c0_19 = arith.constant 0 : index
    %19 = vector.load %arg3[%c0_18, %c0_19] : memref<278x64xbf16, #tpu.memory_space<vmem>>, vector<36x64xbf16>
    %20 = vector.extract_strided_slice %19 {offsets = [0, 0], sizes = [36, 6], strides = [1, 1]} : vector<36x64xbf16> to vector<36x6xbf16>
    %21 = arith.truncf %18 : vector<222x36xf32> to vector<222x36xbf16>
    %cst = arith.constant dense<0.000000e+00> : vector<222x6xf32>
    %22 = tpu.matmul %21, %20, %cst {dimension_numbers = #tpu.dot_dimension_numbers<[1], [0], [0], [1], [0, 0, 1, 1], [], []>} : vector<222x36xbf16>, vector<36x6xbf16>, vector<222x6xf32> -> vector<222x6xf32>
    %c0_20 = arith.constant 0 : index
    %c0_21 = arith.constant 0 : index
    %23 = vector.load %arg4[%c0_20, %c0_21] : memref<6x64xf32, #tpu.memory_space<vmem>>, vector<1x64xf32>
    %24 = vector.extract_strided_slice %23 {offsets = [0, 0], sizes = [1, 6], strides = [1, 1]} : vector<1x64xf32> to vector<1x6xf32>
    %25 = vector.broadcast %24 : vector<1x6xf32> to vector<222x6xf32>
    %26 = arith.addf %22, %25 : vector<222x6xf32>
    %cst_22 = arith.constant 0.000000e+00 : f32
    %27 = vector.broadcast %cst_22 : f32 to vector<222x6xf32>
    %28 = arith.maximumf %26, %27 : vector<222x6xf32>
    %c0_23 = arith.constant 0 : index
    %c0_24 = arith.constant 0 : index
    %29 = vector.load %arg6[%c0_23, %c0_24] : memref<222x6xf32, #tpu.memory_space<vmem>>, vector<222x6xf32>
    tpu.vector_store %arg6[%c0_23, %c0_24], %28 {strides = array<i32>} : memref<222x6xf32, #tpu.memory_space<vmem>>, vector<222x6xf32>,
    %c0_25 = arith.constant 0 : index
    %c0_26 = arith.constant 0 : index
    %30 = vector.load %arg6[%c0_25, %c0_26] : memref<222x6xf32, #tpu.memory_space<vmem>>, vector<221x6xf32>
    %c1_27 = arith.constant 1 : index
    %c0_28 = arith.constant 0 : index
    %31 = vector.load %arg6[%c1_27, %c0_28] : memref<222x6xf32, #tpu.memory_space<vmem>>, vector<221x6xf32>
    %32 = arith.maximumf %30, %31 : vector<221x6xf32>
    %c0_29 = arith.constant 0 : index
    %c0_30 = arith.constant 0 : index
    %33 = vector.load %arg7[%c0_29, %c0_30] : memref<221x6xf32, #tpu.memory_space<vmem>>, vector<221x6xf32>
    tpu.vector_store %arg7[%c0_29, %c0_30], %32 {strides = array<i32>} : memref<221x6xf32, #tpu.memory_space<vmem>>, vector<221x6xf32>,
    %c0_31 = arith.constant 0 : index
    %c0_32 = arith.constant 0 : index
    %34 = tpu.strided_load %arg7[%c0_31, %c0_32] {strides = array<i32: 2, 1>} : memref<221x6xf32, #tpu.memory_space<vmem>>, vector<7x6xf32>
    %c16_33 = arith.constant 16 : index
    %c0_34 = arith.constant 0 : index
    %35 = tpu.strided_load %arg7[%c16_33, %c0_34] {strides = array<i32: 2, 1>} : memref<221x6xf32, #tpu.memory_space<vmem>>, vector<7x6xf32>
    %36 = arith.maximumf %34, %35 : vector<7x6xf32>
    %c0_35 = arith.constant 0 : index
    %c0_36 = arith.constant 0 : index
    %37 = vector.load %arg8[%c0_35, %c0_36] : memref<49x6xf32, #tpu.memory_space<vmem>>, vector<7x6xf32>
    tpu.vector_store %arg8[%c0_35, %c0_36], %36 {strides = array<i32>} : memref<49x6xf32, #tpu.memory_space<vmem>>, vector<7x6xf32>,
    %c32_37 = arith.constant 32 : index
    %c0_38 = arith.constant 0 : index
    %38 = tpu.strided_load %arg7[%c32_37, %c0_38] {strides = array<i32: 2, 1>} : memref<221x6xf32, #tpu.memory_space<vmem>>, vector<7x6xf32>
    %c48 = arith.constant 48 : index
    %c0_39 = arith.constant 0 : index
    %39 = tpu.strided_load %arg7[%c48, %c0_39] {strides = array<i32: 2, 1>} : memref<221x6xf32, #tpu.memory_space<vmem>>, vector<7x6xf32>
    %40 = arith.maximumf %38, %39 : vector<7x6xf32>
    %c7 = arith.constant 7 : index
    %c0_40 = arith.constant 0 : index
    %41 = vector.load %arg8[%c7, %c0_40] : memref<49x6xf32, #tpu.memory_space<vmem>>, vector<7x6xf32>
    tpu.vector_store %arg8[%c7, %c0_40], %40 {strides = array<i32>} : memref<49x6xf32, #tpu.memory_space<vmem>>, vector<7x6xf32>,
    %c64 = arith.constant 64 : index
    %c0_41 = arith.constant 0 : index
    %42 = tpu.strided_load %arg7[%c64, %c0_41] {strides = array<i32: 2, 1>} : memref<221x6xf32, #tpu.memory_space<vmem>>, vector<7x6xf32>
    %c80 = arith.constant 80 : index
    %c0_42 = arith.constant 0 : index
    %43 = tpu.strided_load %arg7[%c80, %c0_42] {strides = array<i32: 2, 1>} : memref<221x6xf32, #tpu.memory_space<vmem>>, vector<7x6xf32>
    %44 = arith.maximumf %42, %43 : vector<7x6xf32>
    %c14 = arith.constant 14 : index
    %c0_43 = arith.constant 0 : index
    %45 = vector.load %arg8[%c14, %c0_43] : memref<49x6xf32, #tpu.memory_space<vmem>>, vector<7x6xf32>
    tpu.vector_store %arg8[%c14, %c0_43], %44 {strides = array<i32>} : memref<49x6xf32, #tpu.memory_space<vmem>>, vector<7x6xf32>,
    %c96 = arith.constant 96 : index
    %c0_44 = arith.constant 0 : index
    %46 = tpu.strided_load %arg7[%c96, %c0_44] {strides = array<i32: 2, 1>} : memref<221x6xf32, #tpu.memory_space<vmem>>, vector<7x6xf32>
    %c112 = arith.constant 112 : index
    %c0_45 = arith.constant 0 : index
    %47 = tpu.strided_load %arg7[%c112, %c0_45] {strides = array<i32: 2, 1>} : memref<221x6xf32, #tpu.memory_space<vmem>>, vector<7x6xf32>
    %48 = arith.maximumf %46, %47 : vector<7x6xf32>
    %c21 = arith.constant 21 : index
    %c0_46 = arith.constant 0 : index
    %49 = vector.load %arg8[%c21, %c0_46] : memref<49x6xf32, #tpu.memory_space<vmem>>, vector<7x6xf32>
    tpu.vector_store %arg8[%c21, %c0_46], %48 {strides = array<i32>} : memref<49x6xf32, #tpu.memory_space<vmem>>, vector<7x6xf32>,
    %c128 = arith.constant 128 : index
    %c0_47 = arith.constant 0 : index
    %50 = tpu.strided_load %arg7[%c128, %c0_47] {strides = array<i32: 2, 1>} : memref<221x6xf32, #tpu.memory_space<vmem>>, vector<7x6xf32>
    %c144 = arith.constant 144 : index
    %c0_48 = arith.constant 0 : index
    %51 = tpu.strided_load %arg7[%c144, %c0_48] {strides = array<i32: 2, 1>} : memref<221x6xf32, #tpu.memory_space<vmem>>, vector<7x6xf32>
    %52 = arith.maximumf %50, %51 : vector<7x6xf32>
    %c28 = arith.constant 28 : index
    %c0_49 = arith.constant 0 : index
    %53 = vector.load %arg8[%c28, %c0_49] : memref<49x6xf32, #tpu.memory_space<vmem>>, vector<7x6xf32>
    tpu.vector_store %arg8[%c28, %c0_49], %52 {strides = array<i32>} : memref<49x6xf32, #tpu.memory_space<vmem>>, vector<7x6xf32>,
    %c160 = arith.constant 160 : index
    %c0_50 = arith.constant 0 : index
    %54 = tpu.strided_load %arg7[%c160, %c0_50] {strides = array<i32: 2, 1>} : memref<221x6xf32, #tpu.memory_space<vmem>>, vector<7x6xf32>
    %c176 = arith.constant 176 : index
    %c0_51 = arith.constant 0 : index
    %55 = tpu.strided_load %arg7[%c176, %c0_51] {strides = array<i32: 2, 1>} : memref<221x6xf32, #tpu.memory_space<vmem>>, vector<7x6xf32>
    %56 = arith.maximumf %54, %55 : vector<7x6xf32>
    %c35 = arith.constant 35 : index
    %c0_52 = arith.constant 0 : index
    %57 = vector.load %arg8[%c35, %c0_52] : memref<49x6xf32, #tpu.memory_space<vmem>>, vector<7x6xf32>
    tpu.vector_store %arg8[%c35, %c0_52], %56 {strides = array<i32>} : memref<49x6xf32, #tpu.memory_space<vmem>>, vector<7x6xf32>,
    %c192 = arith.constant 192 : index
    %c0_53 = arith.constant 0 : index
    %58 = tpu.strided_load %arg7[%c192, %c0_53] {strides = array<i32: 2, 1>} : memref<221x6xf32, #tpu.memory_space<vmem>>, vector<7x6xf32>
    %c208 = arith.constant 208 : index
    %c0_54 = arith.constant 0 : index
    %59 = tpu.strided_load %arg7[%c208, %c0_54] {strides = array<i32: 2, 1>} : memref<221x6xf32, #tpu.memory_space<vmem>>, vector<7x6xf32>
    %60 = arith.maximumf %58, %59 : vector<7x6xf32>
    %c42 = arith.constant 42 : index
    %c0_55 = arith.constant 0 : index
    %61 = vector.load %arg8[%c42, %c0_55] : memref<49x6xf32, #tpu.memory_space<vmem>>, vector<7x6xf32>
    tpu.vector_store %arg8[%c42, %c0_55], %60 {strides = array<i32>} : memref<49x6xf32, #tpu.memory_space<vmem>>, vector<7x6xf32>,
    %c0_56 = arith.constant 0 : index
    %c0_57 = arith.constant 0 : index
    %62 = vector.load %arg8[%c0_56, %c0_57] : memref<49x6xf32, #tpu.memory_space<vmem>>, vector<33x6xf32>
    %c1_58 = arith.constant 1 : index
    %c0_59 = arith.constant 0 : index
    %63 = vector.load %arg8[%c1_58, %c0_59] : memref<49x6xf32, #tpu.memory_space<vmem>>, vector<33x6xf32>
    %c2_60 = arith.constant 2 : index
    %c0_61 = arith.constant 0 : index
    %64 = vector.load %arg8[%c2_60, %c0_61] : memref<49x6xf32, #tpu.memory_space<vmem>>, vector<33x6xf32>
    %c7_62 = arith.constant 7 : index
    %c0_63 = arith.constant 0 : index
    %65 = vector.load %arg8[%c7_62, %c0_63] : memref<49x6xf32, #tpu.memory_space<vmem>>, vector<33x6xf32>
    %c8 = arith.constant 8 : index
    %c0_64 = arith.constant 0 : index
    %66 = vector.load %arg8[%c8, %c0_64] : memref<49x6xf32, #tpu.memory_space<vmem>>, vector<33x6xf32>
    %c9 = arith.constant 9 : index
    %c0_65 = arith.constant 0 : index
    %67 = vector.load %arg8[%c9, %c0_65] : memref<49x6xf32, #tpu.memory_space<vmem>>, vector<33x6xf32>
    %c14_66 = arith.constant 14 : index
    %c0_67 = arith.constant 0 : index
    %68 = vector.load %arg8[%c14_66, %c0_67] : memref<49x6xf32, #tpu.memory_space<vmem>>, vector<33x6xf32>
    %c15 = arith.constant 15 : index
    %c0_68 = arith.constant 0 : index
    %69 = vector.load %arg8[%c15, %c0_68] : memref<49x6xf32, #tpu.memory_space<vmem>>, vector<33x6xf32>
    %c16_69 = arith.constant 16 : index
    %c0_70 = arith.constant 0 : index
    %70 = vector.load %arg8[%c16_69, %c0_70] : memref<49x6xf32, #tpu.memory_space<vmem>>, vector<33x6xf32>
    %71 = tpu.concatenate %62, %63, %64, %65, %66, %67, %68, %69, %70 in 1 : vector<33x6xf32>, vector<33x6xf32>, vector<33x6xf32>, vector<33x6xf32>, vector<33x6xf32>, vector<33x6xf32>, vector<33x6xf32>, vector<33x6xf32>, vector<33x6xf32> -> vector<33x54xf32>
    %c36 = arith.constant 36 : index
    %c0_71 = arith.constant 0 : index
    %72 = vector.load %arg3[%c36, %c0_71] : memref<278x64xbf16, #tpu.memory_space<vmem>>, vector<54x64xbf16>
    %73 = vector.extract_strided_slice %72 {offsets = [0, 0], sizes = [54, 12], strides = [1, 1]} : vector<54x64xbf16> to vector<54x12xbf16>
    %74 = arith.truncf %71 : vector<33x54xf32> to vector<33x54xbf16>
    %cst_72 = arith.constant dense<0.000000e+00> : vector<33x12xf32>
    %75 = tpu.matmul %74, %73, %cst_72 {dimension_numbers = #tpu.dot_dimension_numbers<[1], [0], [0], [1], [0, 0, 1, 1], [], []>} : vector<33x54xbf16>, vector<54x12xbf16>, vector<33x12xf32> -> vector<33x12xf32>
    %c1_73 = arith.constant 1 : index
    %c0_74 = arith.constant 0 : index
    %76 = vector.load %arg4[%c1_73, %c0_74] : memref<6x64xf32, #tpu.memory_space<vmem>>, vector<1x64xf32>
    %77 = vector.extract_strided_slice %76 {offsets = [0, 0], sizes = [1, 12], strides = [1, 1]} : vector<1x64xf32> to vector<1x12xf32>
    %78 = vector.broadcast %77 : vector<1x12xf32> to vector<33x12xf32>
    %79 = arith.addf %75, %78 : vector<33x12xf32>
    %cst_75 = arith.constant 0.000000e+00 : f32
    %80 = vector.broadcast %cst_75 : f32 to vector<33x12xf32>
    %81 = arith.maximumf %79, %80 : vector<33x12xf32>
    %c0_76 = arith.constant 0 : index
    %c0_77 = arith.constant 0 : index
    %82 = vector.load %arg9[%c0_76, %c0_77] : memref<33x12xf32, #tpu.memory_space<vmem>>, vector<33x12xf32>
    tpu.vector_store %arg9[%c0_76, %c0_77], %81 {strides = array<i32>} : memref<33x12xf32, #tpu.memory_space<vmem>>, vector<33x12xf32>,
    %c0_78 = arith.constant 0 : index
    %c0_79 = arith.constant 0 : index
    %83 = vector.load %arg9[%c0_78, %c0_79] : memref<33x12xf32, #tpu.memory_space<vmem>>, vector<32x12xf32>
    %c1_80 = arith.constant 1 : index
    %c0_81 = arith.constant 0 : index
    %84 = vector.load %arg9[%c1_80, %c0_81] : memref<33x12xf32, #tpu.memory_space<vmem>>, vector<32x12xf32>
    %85 = arith.maximumf %83, %84 : vector<32x12xf32>
    %c0_82 = arith.constant 0 : index
    %c0_83 = arith.constant 0 : index
    %86 = vector.load %arg10[%c0_82, %c0_83] : memref<32x12xf32, #tpu.memory_space<vmem>>, vector<32x12xf32>
    tpu.vector_store %arg10[%c0_82, %c0_83], %85 {strides = array<i32>} : memref<32x12xf32, #tpu.memory_space<vmem>>, vector<32x12xf32>,
    %c0_84 = arith.constant 0 : index
    %c0_85 = arith.constant 0 : index
    %87 = tpu.strided_load %arg10[%c0_84, %c0_85] {strides = array<i32: 2, 1>} : memref<32x12xf32, #tpu.memory_space<vmem>>, vector<2x12xf32>
    %c7_86 = arith.constant 7 : index
    %c0_87 = arith.constant 0 : index
    %88 = tpu.strided_load %arg10[%c7_86, %c0_87] {strides = array<i32: 2, 1>} : memref<32x12xf32, #tpu.memory_space<vmem>>, vector<2x12xf32>
    %89 = arith.maximumf %87, %88 : vector<2x12xf32>
    %90 = vector.extract_strided_slice %89 {offsets = [0, 0], sizes = [1, 12], strides = [1, 1]} : vector<2x12xf32> to vector<1x12xf32>
    %91 = vector.extract_strided_slice %89 {offsets = [1, 0], sizes = [1, 12], strides = [1, 1]} : vector<2x12xf32> to vector<1x12xf32>
    %c14_88 = arith.constant 14 : index
    %c0_89 = arith.constant 0 : index
    %92 = tpu.strided_load %arg10[%c14_88, %c0_89] {strides = array<i32: 2, 1>} : memref<32x12xf32, #tpu.memory_space<vmem>>, vector<2x12xf32>
    %c21_90 = arith.constant 21 : index
    %c0_91 = arith.constant 0 : index
    %93 = tpu.strided_load %arg10[%c21_90, %c0_91] {strides = array<i32: 2, 1>} : memref<32x12xf32, #tpu.memory_space<vmem>>, vector<2x12xf32>
    %94 = arith.maximumf %92, %93 : vector<2x12xf32>
    %95 = vector.extract_strided_slice %94 {offsets = [0, 0], sizes = [1, 12], strides = [1, 1]} : vector<2x12xf32> to vector<1x12xf32>
    %96 = vector.extract_strided_slice %94 {offsets = [1, 0], sizes = [1, 12], strides = [1, 1]} : vector<2x12xf32> to vector<1x12xf32>
    %c0_92 = arith.constant 0 : index
    %c0_93 = arith.constant 0 : index
    %c0_94 = arith.constant 0 : index
    %97 = vector.load %arg2[%c0_92, %c0_93, %c0_94] : memref<1x1x12xf32, #tpu.memory_space<vmem>>, vector<1x1x12xf32>
    %98 = vector.shape_cast %97 : vector<1x1x12xf32> to vector<1x12xf32>
    %99 = tpu.concatenate %90, %91, %95, %96, %98 in 1 : vector<1x12xf32>, vector<1x12xf32>, vector<1x12xf32>, vector<1x12xf32>, vector<1x12xf32> -> vector<1x60xf32>
    %c90 = arith.constant 90 : index
    %c0_95 = arith.constant 0 : index
    %100 = vector.load %arg3[%c90, %c0_95] : memref<278x64xbf16, #tpu.memory_space<vmem>>, vector<60x64xbf16>
    %101 = vector.extract_strided_slice %100 {offsets = [0, 0], sizes = [60, 32], strides = [1, 1]} : vector<60x64xbf16> to vector<60x32xbf16>
    %102 = arith.truncf %99 : vector<1x60xf32> to vector<1x60xbf16>
    %cst_96 = arith.constant dense<0.000000e+00> : vector<1x32xf32>
    %103 = tpu.matmul %102, %101, %cst_96 {dimension_numbers = #tpu.dot_dimension_numbers<[1], [0], [0], [1], [0, 0, 1, 1], [], []>} : vector<1x60xbf16>, vector<60x32xbf16>, vector<1x32xf32> -> vector<1x32xf32>
    %c2_97 = arith.constant 2 : index
    %c0_98 = arith.constant 0 : index
    %104 = vector.load %arg4[%c2_97, %c0_98] : memref<6x64xf32, #tpu.memory_space<vmem>>, vector<1x64xf32>
    %105 = vector.extract_strided_slice %104 {offsets = [0, 0], sizes = [1, 32], strides = [1, 1]} : vector<1x64xf32> to vector<1x32xf32>
    %106 = arith.addf %103, %105 : vector<1x32xf32>
    %cst_99 = arith.constant 0.000000e+00 : f32
    %107 = vector.broadcast %cst_99 : f32 to vector<1x32xf32>
    %108 = arith.maximumf %106, %107 : vector<1x32xf32>
    %c150 = arith.constant 150 : index
    %c0_100 = arith.constant 0 : index
    %109 = vector.load %arg3[%c150, %c0_100] : memref<278x64xbf16, #tpu.memory_space<vmem>>, vector<32x64xbf16>
    %110 = arith.truncf %108 : vector<1x32xf32> to vector<1x32xbf16>
    %cst_101 = arith.constant dense<0.000000e+00> : vector<1x64xf32>
    %111 = tpu.matmul %110, %109, %cst_101 {dimension_numbers = #tpu.dot_dimension_numbers<[1], [0], [0], [1], [0, 0, 1, 1], [], []>} : vector<1x32xbf16>, vector<32x64xbf16>, vector<1x64xf32> -> vector<1x64xf32>
    %c3 = arith.constant 3 : index
    %c0_102 = arith.constant 0 : index
    %112 = vector.load %arg4[%c3, %c0_102] : memref<6x64xf32, #tpu.memory_space<vmem>>, vector<1x64xf32>
    %113 = arith.addf %111, %112 : vector<1x64xf32>
    %cst_103 = arith.constant 0.000000e+00 : f32
    %114 = vector.broadcast %cst_103 : f32 to vector<1x64xf32>
    %115 = arith.maximumf %113, %114 : vector<1x64xf32>
    %c182 = arith.constant 182 : index
    %c0_104 = arith.constant 0 : index
    %116 = vector.load %arg3[%c182, %c0_104] : memref<278x64xbf16, #tpu.memory_space<vmem>>, vector<64x64xbf16>
    %117 = vector.extract_strided_slice %116 {offsets = [0, 0], sizes = [64, 32], strides = [1, 1]} : vector<64x64xbf16> to vector<64x32xbf16>
    %118 = arith.truncf %115 : vector<1x64xf32> to vector<1x64xbf16>
    %cst_105 = arith.constant dense<0.000000e+00> : vector<1x32xf32>
    %119 = tpu.matmul %118, %117, %cst_105 {dimension_numbers = #tpu.dot_dimension_numbers<[1], [0], [0], [1], [0, 0, 1, 1], [], []>} : vector<1x64xbf16>, vector<64x32xbf16>, vector<1x32xf32> -> vector<1x32xf32>
    %c4 = arith.constant 4 : index
    %c0_106 = arith.constant 0 : index
    %120 = vector.load %arg4[%c4, %c0_106] : memref<6x64xf32, #tpu.memory_space<vmem>>, vector<1x64xf32>
    %121 = vector.extract_strided_slice %120 {offsets = [0, 0], sizes = [1, 32], strides = [1, 1]} : vector<1x64xf32> to vector<1x32xf32>
    %122 = arith.addf %119, %121 : vector<1x32xf32>
    %cst_107 = arith.constant 0.000000e+00 : f32
    %123 = vector.broadcast %cst_107 : f32 to vector<1x32xf32>
    %124 = arith.maximumf %122, %123 : vector<1x32xf32>
    %c246 = arith.constant 246 : index
    %c0_108 = arith.constant 0 : index
    %125 = vector.load %arg3[%c246, %c0_108] : memref<278x64xbf16, #tpu.memory_space<vmem>>, vector<32x64xbf16>
    %126 = vector.extract_strided_slice %125 {offsets = [0, 0], sizes = [32, 9], strides = [1, 1]} : vector<32x64xbf16> to vector<32x9xbf16>
    %127 = arith.truncf %124 : vector<1x32xf32> to vector<1x32xbf16>
    %cst_109 = arith.constant dense<0.000000e+00> : vector<1x9xf32>
    %128 = tpu.matmul %127, %126, %cst_109 {dimension_numbers = #tpu.dot_dimension_numbers<[1], [0], [0], [1], [0, 0, 1, 1], [], []>} : vector<1x32xbf16>, vector<32x9xbf16>, vector<1x9xf32> -> vector<1x9xf32>
    %c5 = arith.constant 5 : index
    %c0_110 = arith.constant 0 : index
    %129 = vector.load %arg4[%c5, %c0_110] : memref<6x64xf32, #tpu.memory_space<vmem>>, vector<1x64xf32>
    %130 = vector.extract_strided_slice %129 {offsets = [0, 0], sizes = [1, 9], strides = [1, 1]} : vector<1x64xf32> to vector<1x9xf32>
    %131 = arith.addf %128, %130 : vector<1x9xf32>
    %132 = vector.extract_strided_slice %131 {offsets = [0, 0], sizes = [1, 8], strides = [1, 1]} : vector<1x9xf32> to vector<1x8xf32>
    %cst_111 = arith.constant dense<0xFF800000> : vector<1xf32>
    %133 = vector.multi_reduction <maximumf>, %132, %cst_111 [1] : vector<1x8xf32> to vector<1xf32>
    %134 = vector.shape_cast %133 : vector<1xf32> to vector<1x1xf32>
    %135 = vector.broadcast %134 : vector<1x1xf32> to vector<1x8xf32>
    %136 = arith.subf %132, %135 : vector<1x8xf32>
    %137 = math.exp %136 : vector<1x8xf32>
    %cst_112 = arith.constant dense<0.000000e+00> : vector<1xf32>
    %138 = vector.multi_reduction <add>, %137, %cst_112 [1] : vector<1x8xf32> to vector<1xf32>
    %139 = vector.shape_cast %138 : vector<1xf32> to vector<1x1xf32>
    %140 = tpu.reciprocal %139 {approx = true} : vector<1x1xf32> -> vector<1x1xf32>
    %141 = vector.broadcast %140 : vector<1x1xf32> to vector<1x8xf32>
    %142 = arith.mulf %137, %141 : vector<1x8xf32>
    %143 = vector.extract_strided_slice %131 {offsets = [0, 8], sizes = [1, 1], strides = [1, 1]} : vector<1x9xf32> to vector<1x1xf32>
    %cst_113 = arith.constant 0.000000e+00 : f32
    %144 = vector.broadcast %cst_113 : f32 to vector<1x1xf32>
    %145 = arith.maximumf %143, %144 : vector<1x1xf32>
    %146 = tpu.concatenate %142, %145 in 1 : vector<1x8xf32>, vector<1x1xf32> -> vector<1x9xf32>
    %c0_114 = arith.constant 0 : index
    %c0_115 = arith.constant 0 : index
    %c0_116 = arith.constant 0 : index
    %147 = vector.load %arg5[%c0_114, %c0_115, %c0_116] : memref<1x1x9xf32, #tpu.memory_space<vmem>>, vector<1x1x9xf32>
    %148 = vector.shape_cast %147 : vector<1x1x9xf32> to vector<1x9xf32>
    %149 = vector.shape_cast %146 : vector<1x9xf32> to vector<1x1x9xf32>
    tpu.vector_store %arg5[%c0_114, %c0_115, %c0_116], %149 {strides = array<i32>} : memref<1x1x9xf32, #tpu.memory_space<vmem>>, vector<1x1x9xf32>,
    return
  }
  func.func @transform_0(%arg0: i32) -> (i32, i32, i32) {
    %c0_i32 = arith.constant 0 : i32
    %c0_i32_0 = arith.constant 0 : i32
    %c0_i32_1 = arith.constant 0 : i32
    return %arg0, %c0_i32, %c0_i32_0 : i32, i32, i32
  }
  func.func @transform_1(%arg0: i32) -> (i32, i32, i32) {
    %c0_i32 = arith.constant 0 : i32
    %c0_i32_0 = arith.constant 0 : i32
    %c0_i32_1 = arith.constant 0 : i32
    return %arg0, %c0_i32, %c0_i32_0 : i32, i32, i32
  }
  func.func @transform_2(%arg0: i32) -> (i32, i32) {
    %c0_i32 = arith.constant 0 : i32
    %c0_i32_0 = arith.constant 0 : i32
    %c0_i32_1 = arith.constant 0 : i32
    return %c0_i32, %c0_i32_0 : i32, i32
  }
  func.func @transform_3(%arg0: i32) -> (i32, i32) {
    %c0_i32 = arith.constant 0 : i32
    %c0_i32_0 = arith.constant 0 : i32
    %c0_i32_1 = arith.constant 0 : i32
    return %c0_i32, %c0_i32_0 : i32, i32
  }
  func.func @transform_4(%arg0: i32) -> (i32, i32, i32) {
    %c0_i32 = arith.constant 0 : i32
    %c0_i32_0 = arith.constant 0 : i32
    %c0_i32_1 = arith.constant 0 : i32
    return %arg0, %c0_i32, %c0_i32_0 : i32, i32, i32
  }
}

</mosaic_0001>

<bundles_post_ra>
// kernel: _forward_impl.1
= control target key start
LH: loop header
LB: loop body
LE: loop exit
PB: predicated region body
PF: predicated region fallthrough
CT: control target
= control target key end

     0   :  { %s3501_s15 = smov 0   ;;  %s4626_s0 = inlined_call_operand.vmem [shape: f32[2,256,4], index: 0, kind: input, shape index: {}]   ;;  %s4627_s1 = inlined_call_operand.vmem [shape: f32[2,1,12], index: 1, kind: input, shape index: {}]   ;;  %s4628_s2 = inlined_call_operand.vmem [shape: bf16[278,64], index: 2, kind: input, shape index: {}]   ;;  %s4629_s3 = inlined_call_operand.vmem [shape: f32[6,64], index: 3, kind: input, shape index: {}]   ;;  %s4630_s4 = inlined_call_operand.vmem [shape: f32[2,1,9], index: 4, kind: output, shape index: {}]  }
   0x1 LB: > { %s2561_s16 = sadd.s32 4294967295, %s3458_s15   ;;  %p2565_p0 = scmp.ge.s32.totalorder %s3458_s15, 1  ;;  %s3458_s15 = sphi %s3501_s15, %s14_s15  }
   0x2   : > { %p170_p1 = scmp.lt.s32.totalorder %s3458_s15, 3 }
   0x4   : > { %p171_p2 = pnand %p2565_p0, %p170_p1 }
   0x5   : > { %p197_p3 = scmp.lt.s32.totalorder (!%p171_p2), %s2561_s16, 1  ;;  %s3460_s21 = smov (!%p171_p2), 8  }
   0x6   : > { %174 = sbr.rel (%p171_p2) target bundleno = 2167 (0x877), region = 36  ;;  %s3461_s22 = smov (!%p171_p2), 4  }
   0x7   : > { %s3462_s23 = smov (!%p171_p2), 12   ;;  %s3463_s24 = smov (!%p171_p2), 16  }
   0x8   : > { %s3464_s25 = smov (!%p171_p2), 20   ;;  %s3465_s30 = smov (!%p171_p2), 24  }
   0x9   : > { %s3466_s7 = smov (!%p171_p2), 28   ;;  %s3467_s8 = smov (!%p171_p2), 32  }
   0xa   : > { %s3468_s11 = smov (!%p171_p2), 6   ;;  %s3470_s18 = smov (!%p171_p2), 18  }
   0xb   : > { %s4632_s16 = smov (!%p197_p3, %s2561_s16), 1  ;;  %vm1396_vm0 = vcmask 1041408   ;;  %v3416_v29 = vld [vmem:[%s4628_s2 + $0x10] ss:$0 sps:$4 sm:$0x33]   ;;  %v3417_v30 = vld [vmem:[%s4628_s2 + $0x8] sm:$0xff]  }
   0xc   : > { %s2616_s17 = sshll.u32 %s4632_s16, 8  ;;  %2751 = vmatprep.subr.msk.bf16.mxu0 %vm1396_vm0, %v3416_v29  ;;  %v1398_v31 = vsel %vm1396_vm0, %v3416_v29, 0  ;;  %v3418_v33 = vld [vmem:[%s4628_s2] sm:$0xff]   ;;  %vm1082_vm1 = vcmask 31744   ;;  %vm1111_vm2 = vcmask 64512   ;;  %vm1140_vm3 = vcmask 97280  }
   0xd   : > { %s3515_s20 = scalar_lea.vmem %s4626_s0, %s2616_s17  ;;  %2658 = vmatpush3.bf16.msra.mxu0 %v1398_v31  ;;  %vm1169_vm4 = vcmask 130048   ;;  %vm1198_vm5 = vcmask 162816   ;;  %vm1227_vm6 = vcmask 195584   ;;  %vm1256_vm7 = vcmask 228352   ;;  %s3471_s19 = smov 30  }
   0xe   : > { %v265_v0 = vld [vmem:[%s3515_s20 + $0x2] sm:$0xff]  ;;  %v266_v1 = vld [vmem:[%s3515_s20 + $0xa] sm:$0xff]  ;;  %v267_v5 = vld [vmem:[%s3515_s20 + $0x12] sm:$0xff]  ;;  %2659 = vmatprep.subr.bf16.mxu0 %v3417_v30  ;;  %vm1285_vm8 = vcmask 261120   ;;  %vm1353_vm9 = vcmask 293888   ;;  %vm1573_vm10 = vcmask 48128   ;;  %s204_s17 = scalar_lea.vmem %s4627_s1, %s4632_s16 }
   0xf   : > { %v237_v2 = vld [vmem:[%s3515_s20 + $0x1] sm:$0xff]  ;;  %v2786_v3 = vpack.i.bf16 %v266_v1, %v265_v0  ;;  %v238_v4 = vld [vmem:[%s3515_s20 + $0x9] sm:$0xff]  ;;  %v239_v8 = vld [vmem:[%s3515_s20 + $0x11] sm:$0xff]  ;;  %vm1720_vm11 = vcmask 47104   ;;  %vm2043_vm12 = vcmask 1042432   ;;  %vm2022_vm13 = vcmask 1045504  }
  0x10   : > { %v268_v6 = vld [vmem:[%s3515_s20 + $0x1a] sm:$0xff]  ;;  %v2776_v7 = vpack.i.bf16 %v238_v4, %v237_v2  ;;  %v3531_v13 = vld [vmem:[%s3515_s20 + $0x28] sm:$0xff]  ;;  %v3534_v14 = vld [vmem:[%s3515_s20 + $0x10] sm:$0xff]  ;;  %vm3472_vm14 = vmmov 0   ;;  %vm1601_vm15 = vcmask 46080   ;;  %s3474_s26 = smov 42  }
  0x11   : > { %v240_v9 = vld [vmem:[%s3515_s20 + $0x19] sm:$0xff]  ;;  %2787 = vrot.lane.b32.xlu1 %v2786_v3, %s3460_s21  ;;  %v2791_v10 = vpack.i.bf16 %v268_v6, %v267_v5  ;;  %v241_v18 = vld [vmem:[%s3515_s20 + $0x21] sm:$0xff]  ;;  %v242_v19 = vld [vmem:[%s3515_s20 + $0x29] sm:$0xff]  ;;  %2660 = vmatpush3.bf16.msra.mxu0 %v3417_v30  ;;  %s3475_s27 = smov 48   ;;  %vm1714_vm0 = vcmask 45056  }
  0x12   : > { %2777 = vrot.lane.b32.xlu0 %v2776_v7, %s3461_s22  ;;  %v2781_v11 = vpack.i.bf16 %v240_v9, %v239_v8  ;;  %v3528_v12 = vld [vmem:[%s3515_s20 + $0x20] sm:$0xff]  ;;  %v3537_v15 = vld [vmem:[%s3515_s20 + $0x18] sm:$0xff]  ;;  %v2811_v20 = vpack.i.bf16 %v242_v19, %v241_v18  ;;  %v270_v22 = vld [vmem:[%s3515_s20 + $0x2a] sm:$0xff]  ;;  %2661 = vmatprep.subr.bf16.mxu0 %v3418_v33 }
  0x13   : > { %v2801_v16 = vpack.i.bf16 %v3531_v13, %v3528_v12  ;;  %v2796_v17 = vpack.i.bf16 %v3537_v15, %v3534_v14  ;;  %v269_v21 = vld [vmem:[%s3515_s20 + $0x22] sm:$0xff]  ;;  %v3554_v24 = vld [vmem:[%s3515_s20 + $0x30] sm:$0xff]  ;;  %v3557_v25 = vld [vmem:[%s3515_s20 + $0x38] sm:$0xff] }
  0x14   : > { %v2821_v23 = vpack.i.bf16 %v270_v22, %v269_v21  ;;  %v2831_v26 = vpack.i.bf16 %v3557_v25, %v3554_v24  ;;  %v243_v27 = vld [vmem:[%s3515_s20 + $0x31] sm:$0xff]  ;;  %v244_v28 = vld [vmem:[%s3515_s20 + $0x39] sm:$0xff]  ;;  %v3588_v38 = vld [vmem:[%s3515_s20 + $0x48] sm:$0xff] }
  0x15   : > { %2792 = vrot.lane.b32.xlu1 %v2791_v10, %s3460_s21  ;;  %v2841_v32 = vpack.i.bf16 %v244_v28, %v243_v27  ;;  %v271_v34 = vld [vmem:[%s3515_s20 + $0x32] sm:$0xff]  ;;  %v272_v35 = vld [vmem:[%s3515_s20 + $0x3a] sm:$0xff]  ;;  %2662 = vmatpush3.bf16.msra.mxu0 %v3418_v33  ;;  %v246_v41 = vld [vmem:[%s3515_s20 + $0x49] sm:$0xff] }
  0x16   : > { %2782 = vrot.lane.b32.xlu0 %v2781_v11, %s3461_s22  ;;  %v2856_v36 = vpack.i.bf16 %v272_v35, %v271_v34  ;;  %v3585_v37 = vld [vmem:[%s3515_s20 + $0x40] sm:$0xff]  ;;  %v274_v44 = vld [vmem:[%s3515_s20 + $0x4a] sm:$0xff]  ;;  %v3606_v47 = vld [vmem:[%s3515_s20 + $0x58] sm:$0xff] }
  0x17   : > { %v2881_v39 = vpack.i.bf16 %v3588_v38, %v3585_v37  ;;  %v245_v40 = vld [vmem:[%s3515_s20 + $0x41] sm:$0xff]  ;;  %v3603_v46 = vld [vmem:[%s3515_s20 + $0x50] sm:$0xff]  ;;  %v248_v50 = vld [vmem:[%s3515_s20 + $0x59] sm:$0xff] }
  0x18   : > { %v2891_v42 = vpack.i.bf16 %v246_v41, %v245_v40  ;;  %v273_v43 = vld [vmem:[%s3515_s20 + $0x42] sm:$0xff]  ;;  %v2911_v48 = vpack.i.bf16 %v3606_v47, %v3603_v46  ;;  %v247_v49 = vld [vmem:[%s3515_s20 + $0x51] sm:$0xff]  ;;  %v276_v53 = vld [vmem:[%s3515_s20 + $0x5a] sm:$0xff] }
  0x19   : > { %2802 = vrot.lane.b32.xlu1 %v2801_v16, %s3462_s23  ;;  %v2901_v45 = vpack.i.bf16 %v274_v44, %v273_v43  ;;  %v2921_v51 = vpack.i.bf16 %v248_v50, %v247_v49  ;;  %v275_v52 = vld [vmem:[%s3515_s20 + $0x52] sm:$0xff]  ;;  %v3625_v55 = vld [vmem:[%s3515_s20 + $0x60] sm:$0xff]  ;;  %v3628_v56 = vld [vmem:[%s3515_s20 + $0x68] sm:$0xff] }
  0x1a   : > { %2797 = vrot.lane.b32.xlu0 %v2796_v17, %s3462_s23  ;;  %v2936_v54 = vpack.i.bf16 %v276_v53, %v275_v52  ;;  %v2961_v57 = vpack.i.bf16 %v3628_v56, %v3625_v55  ;;  %v249_v58 = vld [vmem:[%s3515_s20 + $0x61] sm:$0xff]  ;;  %v250_v59 = vld [vmem:[%s3515_s20 + $0x69] sm:$0xff]  ;;  %v3646_v1 = vld [vmem:[%s3515_s20 + $0x78] sm:$0xff] }
  0x1b   : > { %v2971_v60 = vpack.i.bf16 %v250_v59, %v249_v58  ;;  %v277_v61 = vld [vmem:[%s3515_s20 + $0x62] sm:$0xff]  ;;  %v278_v62 = vld [vmem:[%s3515_s20 + $0x6a] sm:$0xff]  ;;  %v252_v4 = vld [vmem:[%s3515_s20 + $0x79] sm:$0xff] }
  0x1c   : > { %v2981_v63 = vpack.i.bf16 %v278_v62, %v277_v61  ;;  %v3643_v0 = vld [vmem:[%s3515_s20 + $0x70] sm:$0xff]  ;;  %v280_v7 = vld [vmem:[%s3515_s20 + $0x7a] sm:$0xff]  ;;  %v281_v19 = vld [vmem:[%s3515_s20 + $0x82] sm:$0xff] }
  0x1d   : > { %2812 = vrot.lane.b32.xlu1 %v2811_v20, %s3463_s24  ;;  %v2991_v2 = vpack.i.bf16 %v3646_v1, %v3643_v0  ;;  %v251_v3 = vld [vmem:[%s3515_s20 + $0x71] sm:$0xff]  ;;  %v225_v9 = vld [vmem:[%s3515_s20 + $0x80] sm:$0xff]  ;;  %v254_v17 = vld [vmem:[%s3515_s20 + $0x89] sm:$0xff] }
  0x1e   : > { %2807 = vrot.lane.b32.xlu0 %v2781_v11, %s3463_s24  ;;  %v3001_v5 = vpack.i.bf16 %v252_v4, %v251_v3  ;;  %v279_v6 = vld [vmem:[%s3515_s20 + $0x72] sm:$0xff]  ;;  %v229_v43 = vld [vmem:[%s3515_s20 + $0xa0] sm:$0xff]  ;;  %v230_v44 = vld [vmem:[%s3515_s20 + $0xa8] sm:$0xff] }
  0x1f   : > { %v3016_v8 = vpack.i.bf16 %v280_v7, %v279_v6  ;;  %v227_v22 = vld [vmem:[%s3515_s20 + $0x90] sm:$0xff]  ;;  %v256_v28 = vld [vmem:[%s3515_s20 + $0x99] sm:$0xff]  ;;  %v285_v62 = vld [vmem:[%s3515_s20 + $0xa2] sm:$0xff] }
  0x20   : > { %v255_v27 = vld [vmem:[%s3515_s20 + $0x91] sm:$0xff]  ;;  %v209_v50 = vld [vmem:[%s3515_s20] sm:$0xff]  ;;  %v258_v61 = vld [vmem:[%s3515_s20 + $0xa9] sm:$0xff] }
  0x21   : > { %2822 = vrot.lane.b32.xlu1 %v2821_v23, %s3464_s25  ;;  %v3688_v31 = vpack.i.bf16 %v256_v28, %v255_v27  ;;  %v283_v35 = vld [vmem:[%s3515_s20 + $0x92] sm:$0xff]  ;;  %v286_v6 = vld [vmem:[%s3515_s20 + $0xaa] sm:$0xff] }
  0x22   : > { %2817 = vrot.lane.b32.xlu0 %v2791_v10, %s3464_s25  ;;  %v226_v10 = vld [vmem:[%s3515_s20 + $0x88] sm:$0xff]  ;;  %v231_v7 = vld [vmem:[%s3515_s20 + $0xb0] sm:$0xff] }
  0x23   : > { %v3041_v11 = vpack.i.bf16 %v226_v10, %v225_v9 }
  0x25   : > { %2832 = vrot.lane.b32.xlu1 %v2831_v26, %s3465_s30 }
  0x26   : > { %2827 = vrot.lane.b32.xlu0 %v2801_v16, %s3465_s30  ;;  %v253_v16 = vld [vmem:[%s3515_s20 + $0x81] sm:$0xff] }
  0x27   : > { %v3051_v18 = vpack.i.bf16 %v254_v17, %v253_v16 }
  0x29   : > { %2842 = vrot.lane.b32.xlu1 %v2841_v32, %s3466_s7 }
  0x2a   : > { %2837 = vrot.lane.b32.xlu0 %v2811_v20, %s3466_s7 }
  0x2d   : > { %2852 = vrot.lane.b32.xlu1 %v2811_v20, %s3461_s22  ;;  %v282_v20 = vld [vmem:[%s3515_s20 + $0x8a] sm:$0xff] }
  0x2e   : > { %2847 = vrot.lane.b32.xlu0 %v2821_v23, %s3467_s8  ;;  %v3061_v21 = vpack.i.bf16 %v282_v20, %v281_v19 }
  0x31   : > { %2862 = vrot.lane.b32.xlu1 %v2841_v32, %s3461_s22 }
  0x32   : > { %2857 = vrot.lane.b32.xlu0 %v2856_v36, %s3467_s8 }
  0x35   : > { %2872 = vrot.lane.b32.xlu1 %v2856_v36, %s3460_s21 }
  0x36   : > { %2867 = vrot.lane.b32.xlu0 %v2821_v23, %s3460_s21  ;;  %v228_v23 = vld [vmem:[%s3515_s20 + $0x98] sm:$0xff] }
  0x39   : > { %2882 = vrot.lane.b32.xlu1 %v2881_v39, %s3462_s23 }
  0x3a   : > { %2877 = vrot.lane.b32.xlu0 %v2831_v26, %s3462_s23  ;;  %v3679_v26 = vpack.i.bf16 %v228_v23, %v227_v22 }
  0x3d   : > { %2892 = vrot.lane.b32.xlu1 %v2891_v42, %s3463_s24 }
  0x3e   : > { %2887 = vrot.lane.b32.xlu0 %v2841_v32, %s3463_s24 }
  0x41   : > { %2902 = vrot.lane.b32.xlu1 %v2901_v45, %s3464_s25 }
  0x42   : > { %2897 = vrot.lane.b32.xlu0 %v2856_v36, %s3464_s25  ;;  %v284_v36 = vld [vmem:[%s3515_s20 + $0x9a] sm:$0xff] }
  0x43   : > { %v3704_v40 = vpack.i.bf16 %v284_v36, %v283_v35 }
  0x45   : > { %2912 = vrot.lane.b32.xlu1 %v2911_v48, %s3465_s30 }
  0x46   : > { %2907 = vrot.lane.b32.xlu0 %v2881_v39, %s3465_s30 }
  0x49   : > { %2922 = vrot.lane.b32.xlu1 %v2921_v51, %s3466_s7 }
  0x4a   : > { %2917 = vrot.lane.b32.xlu0 %v2891_v42, %s3466_s7 }
  0x4d   : > { %2932 = vrot.lane.b32.xlu1 %v2891_v42, %s3461_s22 }
  0x4e   : > { %2927 = vrot.lane.b32.xlu0 %v2901_v45, %s3467_s8 }
  0x51   : > { %2942 = vrot.lane.b32.xlu1 %v2921_v51, %s3461_s22 }
  0x52   : > { %2937 = vrot.lane.b32.xlu0 %v2936_v54, %s3467_s8 }
  0x55   : > { %2952 = vrot.lane.b32.xlu1 %v2936_v54, %s3460_s21 }
  0x56   : > { %2947 = vrot.lane.b32.xlu0 %v2901_v45, %s3460_s21 }
  0x59   : > { %2962 = vrot.lane.b32.xlu1 %v2961_v57, %s3462_s23 }
  0x5a   : > { %2957 = vrot.lane.b32.xlu0 %v2911_v48, %s3462_s23 }
  0x5d   : > { %2972 = vrot.lane.b32.xlu1 %v2971_v60, %s3463_s24 }
  0x5e   : > { %2967 = vrot.lane.b32.xlu0 %v2921_v51, %s3463_s24  ;;  %v210_v51 = vld [vmem:[%s3515_s20 + $0x8] sm:$0xff] }
  0x61   : > { %2982 = vrot.lane.b32.xlu1 %v2981_v63, %s3464_s25 }
  0x62   : > { %2977 = vrot.lane.b32.xlu0 %v2936_v54, %s3464_s25 }
  0x65   : > { %2992 = vrot.lane.b32.xlu1 %v2991_v2, %s3465_s30 }
  0x66   : > { %2987 = vrot.lane.b32.xlu0 %v2961_v57, %s3465_s30  ;;  %v3724_v57 = vpack.i.bf16 %v230_v44, %v229_v43 }
  0x69   : > { %3002 = vrot.lane.b32.xlu1 %v3001_v5, %s3466_s7 }
  0x6a   : > { %2997 = vrot.lane.b32.xlu0 %v2971_v60, %s3466_s7 }
  0x6d   : > { %3012 = vrot.lane.b32.xlu1 %v2971_v60, %s3461_s22  ;;  %v257_v60 = vld [vmem:[%s3515_s20 + $0xa1] sm:$0xff] }
  0x6e   : > { %3007 = vrot.lane.b32.xlu0 %v2981_v63, %s3467_s8  ;;  %v3751_v20 = vpack.i.bf16 %v258_v61, %v257_v60 }
  0x71   : > { %3022 = vrot.lane.b32.xlu1 %v3001_v5, %s3461_s22 }
  0x72   : > { %3017 = vrot.lane.b32.xlu0 %v3016_v8, %s3467_s8 }
  0x75   : > { %3032 = vrot.lane.b32.xlu1 %v3016_v8, %s3460_s21 }
  0x76   : > { %3027 = vrot.lane.b32.xlu0 %v2981_v63, %s3460_s21 }
  0x79   : > { %3042 = vrot.lane.b32.xlu1 %v3041_v11, %s3462_s23 }
  0x7a   : > { %3037 = vrot.lane.b32.xlu0 %v2991_v2, %s3462_s23 }
  0x7d   : > { %3052 = vrot.lane.b32.xlu1 %v3051_v18, %s3463_s24 }
  0x7e   : > { %3047 = vrot.lane.b32.xlu0 %v3001_v5, %s3463_s24 }
  0x81   : > { %3062 = vrot.lane.b32.xlu1 %v3061_v21, %s3464_s25 }
  0x82   : > { %3057 = vrot.lane.b32.xlu0 %v3016_v8, %s3464_s25  ;;  %v232_v8 = vld [vmem:[%s3515_s20 + $0xb8] sm:$0xff] }
  0x83   : > { %v3684_v29 = vpop.permute.xlu1 %2787  ;;  %v3759_v22 = vpack.i.bf16 %v232_v8, %v231_v7 }
  0x84   : > { %v2778_v30 = vpop.permute.xlu0 %2777  ;;  %v2790_v58 = vunpack.i.h.bf16 %v3684_v29  ;;  %v2789_v59 = vunpack.i.l.bf16 %v3684_v29 }
  0x85   : > { %3072 = vrot.lane.b32.xlu1 %v3679_v26, %s3465_s30  ;;  %v2780_v45 = vunpack.i.h.bf16 %v2778_v30  ;;  %v2779_v48 = vunpack.i.l.bf16 %v2778_v30 }
  0x86   : > { %3067 = vrot.lane.b32.xlu0 %v3041_v11, %s3465_s30 }
  0x87   : > { %v3691_v32 = vpop.permute.xlu1 %2792  ;;  %v1083_v63 = vsel %vm1082_vm1, %v209_v50, %v2779_v48  ;;  %v1084_v2 = vsel %vm1082_vm1, %v210_v51, %v2780_v45 }
  0x88   : > { %v2783_v33 = vpop.permute.xlu0 %2782  ;;  %v2795_v3 = vunpack.i.h.bf16 %v3691_v32  ;;  %v2794_v4 = vunpack.i.l.bf16 %v3691_v32 }
  0x89   : > { %3082 = vrot.lane.b32.xlu1 %v3688_v31, %s3466_s7  ;;  %v2785_v52 = vunpack.i.h.bf16 %v2783_v33  ;;  %v2784_v53 = vunpack.i.l.bf16 %v2783_v33 }
  0x8a   : > { %3077 = vrot.lane.b32.xlu0 %v3051_v18, %s3466_s7 }
  0x8b   : > { %v3696_v34 = vpop.permute.xlu1 %2802  ;;  %v1085_v9 = vsel %vm1082_vm1, %v3534_v14, %v2784_v53  ;;  %v1086_v10 = vsel %vm1082_vm1, %v3537_v15, %v2785_v52  ;;  %v1112_v14 = vsel %vm1111_vm2, %v1083_v63, %v2789_v59  ;;  %v3757_v15 = vpack.i.bf16 %v286_v6, %v285_v62 }
  0x8c   : > { %v3700_v39 = vpop.permute.xlu0 %2797  ;;  %v2805_v11 = vunpack.i.h.bf16 %v3696_v34  ;;  %v2804_v16 = vunpack.i.l.bf16 %v3696_v34  ;;  %v1114_v23 = vsel %vm1111_vm2, %v1085_v9, %v2794_v4  ;;  %v1115_v27 = vsel %vm1111_vm2, %v1086_v10, %v2795_v3  ;;  %v259_v3 = vld [vmem:[%s3515_s20 + $0xb1] sm:$0xff]  ;;  %v260_v4 = vld [vmem:[%s3515_s20 + $0xb9] sm:$0xff] }
  0x8d   : > { %3092 = vrot.lane.b32.xlu1 %v3051_v18, %s3461_s22  ;;  %v2800_v18 = vunpack.i.h.bf16 %v3700_v39  ;;  %v2799_v19 = vunpack.i.l.bf16 %v3700_v39 }
  0x8e   : > { %3087 = vrot.lane.b32.xlu0 %v3061_v21, %s3467_s8  ;;  %v1143_v32 = vsel %vm1140_vm3, %v1114_v23, %v2804_v16  ;;  %v1144_v33 = vsel %vm1140_vm3, %v1115_v27, %v2805_v11 }
  0x8f   : > { %v3706_v41 = vpop.permute.xlu1 %2812  ;;  %v1141_v36 = vsel %vm1140_vm3, %v1112_v14, %v2799_v19 }
  0x90   : > { %v3708_v42 = vpop.permute.xlu0 %2807  ;;  %v2814_v45 = vunpack.i.l.bf16 %v3706_v41 }
  0x91   : > { %3102 = vrot.lane.b32.xlu1 %v3688_v31, %s3461_s22  ;;  %v2810_v28 = vunpack.i.h.bf16 %v3708_v42  ;;  %v2809_v29 = vunpack.i.l.bf16 %v3708_v42  ;;  %v2815_v42 = vunpack.i.h.bf16 %v3706_v41 }
  0x92   : > { %3097 = vrot.lane.b32.xlu0 %v3704_v40, %s3467_s8  ;;  %v1172_v9 = vsel %vm1169_vm4, %v1143_v32, %v2814_v45 }
  0x93   : > { %v3716_v49 = vpop.permute.xlu1 %2822  ;;  %v1170_v51 = vsel %vm1169_vm4, %v1141_v36, %v2809_v29  ;;  %v1173_v10 = vsel %vm1169_vm4, %v1144_v33, %v2815_v42 }
  0x94   : > { %v3720_v54 = vpop.permute.xlu0 %2817  ;;  %v2825_v53 = vunpack.i.h.bf16 %v3716_v49 }
  0x95   : > { %3112 = vrot.lane.b32.xlu1 %v3704_v40, %s3460_s21  ;;  %v2819_v34 = vunpack.i.l.bf16 %v3720_v54 }
  0x96   : > { %3107 = vrot.lane.b32.xlu0 %v3061_v21, %s3460_s21  ;;  %v1113_v21 = vsel %vm1111_vm2, %v1084_v2, %v2790_v58  ;;  %v1202_v19 = vsel %vm1198_vm5, %v1173_v10, %v2825_v53 }
  0x97   : > { %v3736_v5 = vpop.permute.xlu1 %2832  ;;  %v1142_v39 = vsel %vm1140_vm3, %v1113_v21, %v2800_v18  ;;  %v1199_v59 = vsel %vm1198_vm5, %v1170_v51, %v2819_v34  ;;  %v3805_v21 = vpack.i.bf16 %v260_v4, %v259_v3  ;;  %v234_v51 = vld [vmem:[%s3515_s20 + $0xc8] sm:$0xff] }
  0x98   : > { %v2828_v17 = vpop.permute.xlu0 %2827  ;;  %v1171_v52 = vsel %vm1169_vm4, %v1142_v39, %v2810_v28  ;;  %v2835_v60 = vunpack.i.h.bf16 %v3736_v5  ;;  %v287_v39 = vld [vmem:[%s3515_s20 + $0xb2] sm:$0xff] }
  0x99   : > { %3122 = vrot.lane.b32.xlu1 %v3724_v57, %s3462_s23  ;;  %v2830_v43 = vunpack.i.h.bf16 %v2828_v17  ;;  %v2829_v44 = vunpack.i.l.bf16 %v2828_v17 }
  0x9a   : > { %3117 = vrot.lane.b32.xlu0 %v3679_v26, %s3462_s23  ;;  %v2820_v26 = vunpack.i.h.bf16 %v3720_v54  ;;  %v2824_v54 = vunpack.i.l.bf16 %v3716_v49  ;;  %v1231_v27 = vsel %vm1227_vm6, %v1202_v19, %v2835_v60  ;;  %v290_v60 = vld [vmem:[%s3515_s20 + $0xca] sm:$0xff] }
  0x9b   : > { %v2843_v30 = vpop.permute.xlu1 %2842  ;;  %v1228_v2 = vsel %vm1227_vm6, %v1199_v59, %v2829_v44 }
  0x9c   : > { %v2838_v35 = vpop.permute.xlu0 %2837  ;;  %v1200_v41 = vsel %vm1198_vm5, %v1171_v52, %v2820_v26  ;;  %v2845_v6 = vunpack.i.h.bf16 %v2843_v30  ;;  %v2844_v7 = vunpack.i.l.bf16 %v2843_v30  ;;  %v1201_v18 = vsel %vm1198_vm5, %v1172_v9, %v2824_v54  ;;  %v262_v52 = vld [vmem:[%s3515_s20 + $0xc9] sm:$0xff] }
  0x9d   : > { %3132 = vrot.lane.b32.xlu1 %v3751_v20, %s3463_s24  ;;  %v2840_v48 = vunpack.i.h.bf16 %v2838_v35  ;;  %v2839_v50 = vunpack.i.l.bf16 %v2838_v35  ;;  %v1229_v49 = vsel %vm1227_vm6, %v1200_v41, %v2830_v43  ;;  %v288_v43 = vld [vmem:[%s3515_s20 + $0xba] sm:$0xff]  ;;  %v289_v41 = vld [vmem:[%s3515_s20 + $0xc2] sm:$0xff] }
  0x9e   : > { %3127 = vrot.lane.b32.xlu0 %v3688_v31, %s3463_s24  ;;  %v2834_v31 = vunpack.i.l.bf16 %v3736_v5  ;;  %v1260_v32 = vsel %vm1256_vm7, %v1231_v27, %v2845_v6  ;;  %v3829_v42 = vpack.i.bf16 %v288_v43, %v287_v39  ;;  %v3865_v9 = vpack.i.bf16 %v290_v60, %v289_v41 }
  0x9f   : > { %v3781_v58 = vpop.permute.xlu1 %2852  ;;  %v1257_v8 = vsel %vm1256_vm7, %v1228_v2, %v2839_v50  ;;  %v1258_v5 = vsel %vm1256_vm7, %v1229_v49, %v2840_v48  ;;  %v233_v50 = vld [vmem:[%s3515_s20 + $0xc0] sm:$0xff]  ;;  %v293_v2 = vld [vmem:[%s3515_s20 + $0xd8] sm:$0xff] }
  0xa0   : > { %v2848_v61 = vpop.permute.xlu0 %2847  ;;  %v1230_v23 = vsel %vm1227_vm6, %v1201_v18, %v2834_v31  ;;  %v3845_v59 = vpack.i.bf16 %v234_v51, %v233_v50  ;;  %v2855_v49 = vunpack.i.h.bf16 %v3781_v58  ;;  %v2854_v3 = vunpack.i.l.bf16 %v3781_v58 }
  0xa1   : > { %v2850_v62 = vunpack.i.h.bf16 %v2848_v61  ;;  %v2849_v63 = vunpack.i.l.bf16 %v2848_v61  ;;  %3142 = vrot.lane.b32.xlu1 %v3757_v15, %s3464_s25  ;;  %v1259_v30 = vsel %vm1256_vm7, %v1230_v23, %v2844_v7 }
  0xa2   : > { %3137 = vrot.lane.b32.xlu0 %v3704_v40, %s3464_s25 }
  0xa3   : > { %v3799_v11 = vpop.permute.xlu1 %2862  ;;  %v1286_v16 = vsel %vm1285_vm8, %v1257_v8, %v2849_v63  ;;  %v1287_v17 = vsel %vm1285_vm8, %v1258_v5, %v2850_v62  ;;  %v3856_v63 = vld [vmem:[%s3515_s20 + $0xd0] sm:$0xff] }
  0xa4   : > { %v2858_v14 = vpop.permute.xlu0 %2857  ;;  %v1319_v40 = vpack.c.bf16 %v1287_v17, %v1286_v16  ;;  %v2865_v31 = vunpack.i.h.bf16 %v3799_v11  ;;  %v2864_v61 = vunpack.i.l.bf16 %v3799_v11  ;;  %v3868_v17 = vpack.i.bf16 %v293_v2, %v3856_v63 }
  0xa5   : > { %v2860_v28 = vunpack.i.h.bf16 %v2858_v14  ;;  %v2859_v29 = vunpack.i.l.bf16 %v2858_v14  ;;  %3152 = vrot.lane.b32.xlu1 %v3759_v22, %s3465_s30  ;;  %v1088_v14 = vsel %vm1082_vm1, %v3531_v13, %v2855_v49 }
  0xa6   : > { %3147 = vrot.lane.b32.xlu0 %v3724_v57, %s3465_s30  ;;  %2663 = vmatprep.mubr.msk.bf16.mxu0 %vm1353_vm9, %v1319_v40  ;;  %v1090_v58 = vsel %vm1082_vm1, %v3557_v25, %v2865_v31  ;;  %v1089_v18 = vsel %vm1082_vm1, %v3554_v24, %v2864_v61  ;;  %v1087_v40 = vsel %vm1082_vm1, %v3528_v12, %v2854_v3  ;;  %v296_v3 = vld [vmem:[%s3515_s20 + $0xd9] sm:$0xff] }
  0xa7   : > { %v1289_v33 = vsel %vm1285_vm8, %v1260_v32, %v2860_v28  ;;  %v1288_v26 = vsel %vm1285_vm8, %v1259_v30, %v2859_v29  ;;  %v2873_v34 = vpop.permute.xlu1 %2872 }
  0xa8   : > { %v2868_v35 = vpop.permute.xlu0 %2867  ;;  %v1320_v36 = vpack.c.bf16 %v1289_v33, %v1288_v26  ;;  %v2875_v4 = vunpack.i.h.bf16 %v2873_v34  ;;  %v2874_v6 = vunpack.i.l.bf16 %v2873_v34 }
  0xa9   : > { %3162 = vrot.lane.b32.xlu1 %v3805_v21, %s3466_s7  ;;  %v2870_v7 = vunpack.i.h.bf16 %v2868_v35  ;;  %v2869_v8 = vunpack.i.l.bf16 %v2868_v35 }
  0xaa   : > { %3157 = vrot.lane.b32.xlu0 %v3751_v20, %s3466_s7  ;;  %2664 = vmatmul.mubr.msk.bf16.vlgmr.msra.gmra.mxu0 %vm1353_vm9, %v1320_v36  ;;  %v1118_v23 = vsel %vm1111_vm2, %v1089_v18, %v2874_v6  ;;  %v1119_v27 = vsel %vm1111_vm2, %v1090_v58, %v2875_v4 }
  0xab   : > { %v2883_v57 = vpop.permute.xlu1 %2882  ;;  %v1117_v24 = vsel %vm1111_vm2, %v1088_v14, %v2870_v7  ;;  %v1116_v25 = vsel %vm1111_vm2, %v1087_v40, %v2869_v8 }
  0xac   : > { %v2878_v44 = vpop.permute.xlu0 %2877  ;;  %v2885_v10 = vunpack.i.h.bf16 %v2883_v57  ;;  %v2884_v11 = vunpack.i.l.bf16 %v2883_v57 }
  0xad   : > { %3172 = vrot.lane.b32.xlu1 %v3751_v20, %s3461_s22  ;;  %v261_v20 = vld [vmem:[%s3515_s20 + $0xc1] sm:$0xff]  ;;  %v2880_v19 = vunpack.i.h.bf16 %v2878_v44 }
  0xae   : > { %3167 = vrot.lane.b32.xlu0 %v3757_v15, %s3467_s8  ;;  %v3853_v62 = vpack.i.bf16 %v262_v52, %v261_v20  ;;  %v1147_v13 = vsel %vm1140_vm3, %v1118_v23, %v2884_v11  ;;  %v1148_v12 = vsel %vm1140_vm3, %v1119_v27, %v2885_v10 }
  0xaf   : > { %v3831_v45 = vpop.permute.xlu1 %2892 }
  0xb0   : > { %v3833_v48 = vpop.permute.xlu0 %2887  ;;  %v2895_v57 = vunpack.i.h.bf16 %v3831_v45  ;;  %v2894_v39 = vunpack.i.l.bf16 %v3831_v45 }
  0xb1   : > { %3182 = vrot.lane.b32.xlu1 %v3805_v21, %s3461_s22  ;;  %v2890_v28 = vunpack.i.h.bf16 %v3833_v48  ;;  %v2889_v29 = vunpack.i.l.bf16 %v3833_v48 }
  0xb2   : > { %3177 = vrot.lane.b32.xlu0 %v3829_v42, %s3467_s8  ;;  %v1177_v10 = vsel %vm1169_vm4, %v1148_v12, %v2895_v57  ;;  %v292_v57 = vld [vmem:[%s3515_s20 + $0xda] sm:$0x3f] }
  0xb3   : > { %v3843_v53 = vpop.permute.xlu1 %2902 }
  0xb4   : > { %v2898_v54 = vpop.permute.xlu0 %2897  ;;  %v2905_v51 = vunpack.i.h.bf16 %v3843_v53  ;;  %v2904_v20 = vunpack.i.l.bf16 %v3843_v53  ;;  %v263_v53 = vld [vmem:[%s3515_s20 + $0xd1] sm:$0xff] }
  0xb5   : > { %3192 = vrot.lane.b32.xlu1 %v3829_v42, %s3460_s21  ;;  %v2900_v32 = vunpack.i.h.bf16 %v2898_v54  ;;  %v2899_v33 = vunpack.i.l.bf16 %v2898_v54  ;;  %v3926_v40 = vpack.i.bf16 %v296_v3, %v263_v53 }
  0xb6   : > { %3187 = vrot.lane.b32.xlu0 %v3757_v15, %s3460_s21  ;;  %v2879_v15 = vunpack.i.l.bf16 %v2878_v44 }
  0xb7   : > { %v3863_v5 = vpop.permute.xlu1 %2912 }
  0xb8   : > { %v2908_v16 = vpop.permute.xlu0 %2907  ;;  %v1145_v34 = vsel %vm1140_vm3, %v1116_v25, %v2879_v15  ;;  %v2915_v41 = vunpack.i.h.bf16 %v3863_v5 }
  0xb9   : > { %3202 = vrot.lane.b32.xlu1 %v3845_v59, %s3462_s23  ;;  %v2910_v35 = vunpack.i.h.bf16 %v2908_v16  ;;  %v2909_v36 = vunpack.i.l.bf16 %v2908_v16  ;;  %v1174_v48 = vsel %vm1169_vm4, %v1145_v34, %v2889_v29  ;;  %v299_v34 = vld [vmem:[%s3515_s20 + $0xda] sm:$0xff] }
  0xba   : > { %3197 = vrot.lane.b32.xlu0 %v3759_v22, %s3462_s23  ;;  %v1146_v22 = vsel %vm1140_vm3, %v1117_v24, %v2880_v19  ;;  %v1203_v54 = vsel %vm1198_vm5, %v1174_v48, %v2899_v33  ;;  %v1206_v19 = vsel %vm1198_vm5, %v1177_v10, %v2905_v51  ;;  %v295_v48 = vld [vmem:[%s3515_s20 + $0xe8] sm:$0x3f] }
  0xbb   : > { %v2923_v30 = vpop.permute.xlu1 %2922  ;;  %v1175_v50 = vsel %vm1169_vm4, %v1146_v22, %v2890_v28  ;;  %v1232_v31 = vsel %vm1227_vm6, %v1203_v54, %v2909_v36  ;;  %v1235_v23 = vsel %vm1227_vm6, %v1206_v19, %v2915_v41  ;;  %v3972_v51 = vld [vmem:[%s3515_s20 + $0xe1] sm:$0xff]  ;;  %v298_v54 = vld [vmem:[%s3515_s20 + $0xe9] sm:$0x3f] }
  0xbc   : > { %v2918_v26 = vpop.permute.xlu0 %2917  ;;  %v1204_v45 = vsel %vm1198_vm5, %v1175_v50, %v2900_v32  ;;  %v2925_v4 = vunpack.i.h.bf16 %v2923_v30  ;;  %v2924_v6 = vunpack.i.l.bf16 %v2923_v30  ;;  %v3981_v41 = vld [vmem:[%s3515_s20 + $0xea] sm:$0x3f]  ;;  %v3291_v10 = vpack.i.bf16 %v298_v54, %v3972_v51 }
  0xbd   : > { %3212 = vrot.lane.b32.xlu1 %v3853_v62, %s3463_s24  ;;  %v2920_v43 = vunpack.i.h.bf16 %v2918_v26  ;;  %v2919_v44 = vunpack.i.l.bf16 %v2918_v26  ;;  %v1233_v61 = vsel %vm1227_vm6, %v1204_v45, %v2910_v35  ;;  %v291_v26 = vld [vmem:[%s3515_s20 + $0xd2] sm:$0xff]  ;;  %v3978_v45 = vld [vmem:[%s3515_s20 + $0xe2] sm:$0xff] }
  0xbe   : > { %3207 = vrot.lane.b32.xlu0 %v3805_v21, %s3463_s24  ;;  %v2914_v21 = vunpack.i.l.bf16 %v3863_v5  ;;  %v1176_v5 = vsel %vm1169_vm4, %v1147_v13, %v2894_v39  ;;  %v1264_v28 = vsel %vm1256_vm7, %v1235_v23, %v2925_v4  ;;  %v3955_v36 = vpack.i.bf16 %v299_v34, %v291_v26 }
  0xbf   : > { %v3902_v52 = vpop.permute.xlu1 %2932  ;;  %v1261_v7 = vsel %vm1256_vm7, %v1232_v31, %v2919_v44  ;;  %v1262_v8 = vsel %vm1256_vm7, %v1233_v61, %v2920_v43  ;;  %v1205_v18 = vsel %vm1198_vm5, %v1176_v5, %v2904_v20  ;;  %v3271_v44 = vpack.i.bf16 %v292_v57, %v291_v26  ;;  %v3988_v61 = vld [vmem:[%s3515_s20 + $0xf0] sm:$0xff] }
  0xc0   : > { %v2928_v60 = vpop.permute.xlu0 %2927  ;;  %v2934_v3 = vunpack.i.l.bf16 %v3902_v52 }
  0xc1   : > { %v2930_v2 = vunpack.i.h.bf16 %v2928_v60  ;;  %v2929_v49 = vunpack.i.l.bf16 %v2928_v60  ;;  %3222 = vrot.lane.b32.xlu1 %v3865_v9, %s3464_s25 }
  0xc2   : > { %3217 = vrot.lane.b32.xlu0 %v3829_v42, %s3464_s25  ;;  %v1234_v42 = vsel %vm1227_vm6, %v1205_v18, %v2914_v21 }
  0xc3   : > { %v1290_v11 = vsel %vm1285_vm8, %v1261_v7, %v2929_v49  ;;  %v1291_v16 = vsel %vm1285_vm8, %v1262_v8, %v2930_v2  ;;  %v3922_v58 = vpop.permute.xlu1 %2942  ;;  %v1263_v25 = vsel %vm1256_vm7, %v1234_v42, %v2924_v6  ;;  %v3991_v2 = vld [vmem:[%s3515_s20 + $0xf8] sm:$0x3f]  ;;  %v3994_v49 = vld [vmem:[%s3515_s20 + $0xe8] sm:$0xff] }
  0xc4   : > { %v2938_v15 = vpop.permute.xlu0 %2937  ;;  %v1321_v14 = vpack.c.bf16 %v1291_v16, %v1290_v11  ;;  %v2945_v21 = vunpack.i.h.bf16 %v3922_v58  ;;  %v2944_v60 = vunpack.i.l.bf16 %v3922_v58  ;;  %v3301_v11 = vpack.i.bf16 %v3981_v41, %v3978_v45 }
  0xc5   : > { %v2940_v27 = vunpack.i.h.bf16 %v2938_v15  ;;  %v2939_v24 = vunpack.i.l.bf16 %v2938_v15  ;;  %3232 = vrot.lane.b32.xlu1 %v3868_v17, %s3465_s30 }
  0xc6   : > { %3227 = vrot.lane.b32.xlu0 %v3845_v59, %s3465_s30  ;;  %2667 = vmatprep.mubr.msk.bf16.mxu0 %vm1353_vm9, %v1321_v14  ;;  %v264_v59 = vld [vmem:[%s3515_s20 + $0xd9] sm:$0x3f]  ;;  %v1094_v19 = vsel %vm1082_vm1, %v3606_v47, %v2945_v21  ;;  %v1093_v15 = vsel %vm1082_vm1, %v3603_v46, %v2944_v60 }
  0xc7   : > { %v1293_v29 = vsel %vm1285_vm8, %v1264_v28, %v2940_v27  ;;  %v1292_v30 = vsel %vm1285_vm8, %v1263_v25, %v2939_v24  ;;  %v2953_v13 = vpop.permute.xlu1 %2952  ;;  %v3261_v35 = vpack.i.bf16 %v264_v59, %v263_v53  ;;  %v2935_v53 = vunpack.i.h.bf16 %v3902_v52 }
  0xc8   : > { %v3939_v12 = vpop.permute.xlu0 %2947  ;;  %v1322_v32 = vpack.c.bf16 %v1293_v29, %v1292_v30  ;;  %v2955_v4 = vunpack.i.h.bf16 %v2953_v13  ;;  %v2954_v6 = vunpack.i.l.bf16 %v2953_v13  ;;  %v3311_v52 = vpack.i.bf16 %v3991_v2, %v3988_v61 }
  0xc9   : > { %3242 = vrot.lane.b32.xlu1 %v3926_v40, %s3466_s7  ;;  %v2950_v7 = vunpack.i.h.bf16 %v3939_v12  ;;  %v2949_v8 = vunpack.i.l.bf16 %v3939_v12  ;;  %v1092_v23 = vsel %vm1082_vm1, %v3588_v38, %v2935_v53  ;;  %v1091_v27 = vsel %vm1082_vm1, %v3585_v37, %v2934_v3 }
  0xca   : > { %3237 = vrot.lane.b32.xlu0 %v3853_v62, %s3466_s7  ;;  %2668 = vmatmul.mubr.msk.bf16.gmra.mxu0 %vm1353_vm9, %v1322_v32  ;;  %v1122_v24 = vsel %vm1111_vm2, %v1093_v15, %v2954_v6  ;;  %v1123_v25 = vsel %vm1111_vm2, %v1094_v19, %v2955_v4  ;;  %v307_v6 = vld [vmem:[%s3515_s20 + $0xf9] sm:$0x3f]  ;;  %v305_v15 = vld [vmem:[%s3515_s20 + $0xe9] sm:$0xff] }
  0xcb   : > { %v2963_v33 = vpop.permute.xlu1 %2962  ;;  %v1121_v46 = vsel %vm1111_vm2, %v1092_v23, %v2950_v7  ;;  %v1120_v47 = vsel %vm1111_vm2, %v1091_v27, %v2949_v8 }
  0xcc   : > { %v3949_v22 = vpop.permute.xlu0 %2957  ;;  %v2965_v16 = vunpack.i.h.bf16 %v2963_v33  ;;  %v2964_v58 = vunpack.i.l.bf16 %v2963_v33 }
  0xcd   : > { %3252 = vrot.lane.b32.xlu1 %v3853_v62, %s3461_s22  ;;  %v3966_v62 = vld [vmem:[%s3515_s20 + $0xe0] sm:$0xff]  ;;  %v2960_v14 = vunpack.i.h.bf16 %v3949_v22  ;;  %v2959_v42 = vunpack.i.l.bf16 %v3949_v22 }
  0xce   : > { %3247 = vrot.lane.b32.xlu0 %v3865_v9, %s3467_s8  ;;  %v3281_v31 = vpack.i.bf16 %v295_v48, %v3966_v62  ;;  %v1151_v38 = vsel %vm1140_vm3, %v1122_v24, %v2964_v58  ;;  %v1152_v37 = vsel %vm1140_vm3, %v1123_v25, %v2965_v16 }
  0xcf   : > { %v3958_v39 = vpop.permute.xlu1 %2972  ;;  %v1150_v59 = vsel %vm1140_vm3, %v1121_v46, %v2960_v14 }
  0xd0   : > { %v3960_v43 = vpop.permute.xlu0 %2967  ;;  %v2975_v34 = vunpack.i.h.bf16 %v3958_v39  ;;  %v2974_v22 = vunpack.i.l.bf16 %v3958_v39 }
  0xd1   : > { %3262 = vrot.lane.b32.xlu1 %v3261_v35, %s3461_s22  ;;  %v2970_v28 = vunpack.i.h.bf16 %v3960_v43  ;;  %v2969_v29 = vunpack.i.l.bf16 %v3960_v43 }
  0xd2   : > { %3257 = vrot.lane.b32.xlu0 %v3955_v36, %s3467_s8  ;;  %v1181_v58 = vsel %vm1169_vm4, %v1152_v37, %v2975_v34  ;;  %v310_v37 = vld [vmem:[%s3515_s20 + $0xfa] sm:$0x3f] }
  0xd3   : > { %v3969_v50 = vpop.permute.xlu1 %2982 }
  0xd4   : > { %v3974_v20 = vpop.permute.xlu0 %2977  ;;  %v2985_v48 = vunpack.i.h.bf16 %v3969_v50 }
  0xd5   : > { %3272 = vrot.lane.b32.xlu1 %v3271_v44, %s3460_s21  ;;  %v2980_v13 = vunpack.i.h.bf16 %v3974_v20  ;;  %v2979_v12 = vunpack.i.l.bf16 %v3974_v20  ;;  %v1179_v44 = vsel %vm1169_vm4, %v1150_v59, %v2970_v28  ;;  %v2984_v20 = vunpack.i.l.bf16 %v3969_v50  ;;  %v306_v50 = vld [vmem:[%s3515_s20 + $0xf1] sm:$0xff] }
  0xd6   : > { %3267 = vrot.lane.b32.xlu0 %v3865_v9, %s3460_s21  ;;  %v3306_v9 = vpack.i.bf16 %v3994_v49, %v3966_v62  ;;  %v3321_v24 = vpack.i.bf16 %v307_v6, %v306_v50 }
  0xd7   : > { %v4002_v5 = vpop.permute.xlu1 %2992  ;;  %v1208_v39 = vsel %vm1198_vm5, %v1179_v44, %v2980_v13 }
  0xd8   : > { %v2988_v18 = vpop.permute.xlu0 %2987  ;;  %v2995_v21 = vunpack.i.h.bf16 %v4002_v5 }
  0xd9   : > { %3282 = vrot.lane.b32.xlu1 %v3281_v31, %s3462_s23  ;;  %v2990_v33 = vunpack.i.h.bf16 %v2988_v18  ;;  %v2989_v26 = vunpack.i.l.bf16 %v2988_v18 }
  0xda   : > { %3277 = vrot.lane.b32.xlu0 %v3868_v17, %s3462_s23  ;;  %v1149_v17 = vsel %vm1140_vm3, %v1120_v47, %v2959_v42  ;;  %v1210_v42 = vsel %vm1198_vm5, %v1181_v58, %v2985_v48 }
  0xdb   : > { %v3003_v30 = vpop.permute.xlu1 %3002  ;;  %v1178_v43 = vsel %vm1169_vm4, %v1149_v17, %v2969_v29  ;;  %v1237_v53 = vsel %vm1227_vm6, %v1208_v39, %v2990_v33  ;;  %v1239_v25 = vsel %vm1227_vm6, %v1210_v42, %v2995_v21 }
  0xdc   : > { %v2998_v32 = vpop.permute.xlu0 %2997  ;;  %v1207_v41 = vsel %vm1198_vm5, %v1178_v43, %v2979_v12  ;;  %v3005_v7 = vunpack.i.h.bf16 %v3003_v30  ;;  %v3004_v8 = vunpack.i.l.bf16 %v3003_v30  ;;  %v3316_v30 = vpack.i.bf16 %v305_v15, %v3972_v51 }
  0xdd   : > { %3292 = vrot.lane.b32.xlu1 %v3291_v10, %s3463_s24  ;;  %v3000_v35 = vunpack.i.h.bf16 %v2998_v32  ;;  %v2999_v57 = vunpack.i.l.bf16 %v2998_v32  ;;  %v1236_v31 = vsel %vm1227_vm6, %v1207_v41, %v2989_v26 }
  0xde   : > { %3287 = vrot.lane.b32.xlu0 %v3926_v40, %s3463_s24  ;;  %v2994_v40 = vunpack.i.l.bf16 %v4002_v5  ;;  %v1180_v5 = vsel %vm1169_vm4, %v1151_v38, %v2974_v22  ;;  %v1268_v29 = vsel %vm1256_vm7, %v1239_v25, %v3005_v7  ;;  %v309_v38 = vld [vmem:[%s3515_s20 + $0xf2] sm:$0xff] }
  0xdf   : > { %v4045_v54 = vpop.permute.xlu1 %3012  ;;  %v1265_v10 = vsel %vm1256_vm7, %v1236_v31, %v2999_v57  ;;  %v1266_v16 = vsel %vm1256_vm7, %v1237_v53, %v3000_v35  ;;  %v1209_v14 = vsel %vm1198_vm5, %v1180_v5, %v2984_v20  ;;  %v3331_v17 = vpack.i.bf16 %v310_v37, %v309_v38 }
  0xe0   : > { %v3008_v60 = vpop.permute.xlu0 %3007  ;;  %v3015_v35 = vunpack.i.h.bf16 %v4045_v54  ;;  %v3014_v57 = vunpack.i.l.bf16 %v4045_v54 }
  0xe1   : > { %v3010_v3 = vunpack.i.h.bf16 %v3008_v60  ;;  %v3009_v4 = vunpack.i.l.bf16 %v3008_v60  ;;  %3302 = vrot.lane.b32.xlu1 %v3301_v11, %s3464_s25 }
  0xe2   : > { %3297 = vrot.lane.b32.xlu0 %v3955_v36, %s3464_s25  ;;  %v1238_v36 = vsel %vm1227_vm6, %v1209_v14, %v2994_v40  ;;  %v1095_v54 = vsel %vm1082_vm1, %v3625_v55, %v3014_v57  ;;  %s3473_s25 = smov 36  }
  0xe3   : > { %v1294_v18 = vsel %vm1285_vm8, %v1265_v10, %v3009_v4  ;;  %v1295_v19 = vsel %vm1285_vm8, %v1266_v16, %v3010_v3  ;;  %v3023_v11 = vpop.permute.xlu1 %3022  ;;  %v1267_v28 = vsel %vm1256_vm7, %v1238_v36, %v3004_v8  ;;  %v1096_v3 = vsel %vm1082_vm1, %v3628_v56, %v3015_v35 }
  0xe4   : > { %v1323_v23 = vpack.c.bf16 %v1295_v19, %v1294_v18  ;;  %v3018_v27 = vpop.permute.xlu0 %3017  ;;  %v3025_v34 = vunpack.i.h.bf16 %v3023_v11  ;;  %v3024_v22 = vunpack.i.l.bf16 %v3023_v11 }
  0xe5   : > { %v3020_v46 = vunpack.i.h.bf16 %v3018_v27  ;;  %v3019_v47 = vunpack.i.l.bf16 %v3018_v27  ;;  %3312 = vrot.lane.b32.xlu1 %v3311_v52, %s3465_s30  ;;  %v308_v52 = vld [vmem:[%s3515_s20 + $0xea] sm:$0xff] }
  0xe6   : > { %3307 = vrot.lane.b32.xlu0 %v3306_v9, %s3465_s30  ;;  %2671 = vmatprep.mubr.msk.bf16.mxu0 %vm1353_vm9, %v1323_v23  ;;  %v3326_v62 = vpack.i.bf16 %v308_v52, %v3978_v45  ;;  %v1098_v40 = vsel %vm1082_vm1, %v3646_v1, %v3025_v34  ;;  %v1097_v60 = vsel %vm1082_vm1, %v3643_v0, %v3024_v22 }
  0xe7   : > { %v1297_v13 = vsel %vm1285_vm8, %v1268_v29, %v3020_v46  ;;  %v1296_v61 = vsel %vm1285_vm8, %v1267_v28, %v3019_v47  ;;  %v3033_v2 = vpop.permute.xlu1 %3032 }
  0xe8   : > { %v1324_v12 = vpack.c.bf16 %v1297_v13, %v1296_v61  ;;  %v3028_v32 = vpop.permute.xlu0 %3027  ;;  %v3035_v43 = vunpack.i.h.bf16 %v3033_v2  ;;  %v3034_v45 = vunpack.i.l.bf16 %v3033_v2 }
  0xe9   : > { %3322 = vrot.lane.b32.xlu1 %v3321_v24, %s3466_s7  ;;  %v3030_v44 = vunpack.i.h.bf16 %v3028_v32  ;;  %v3029_v48 = vunpack.i.l.bf16 %v3028_v32 }
  0xea   : > { %3317 = vrot.lane.b32.xlu0 %v3316_v30, %s3466_s7  ;;  %2672 = vmatmul.mubr.msk.bf16.gmra.mxu0 %vm1353_vm9, %v1324_v12  ;;  %v1126_v4 = vsel %vm1111_vm2, %v1097_v60, %v3034_v45  ;;  %v1127_v50 = vsel %vm1111_vm2, %v1098_v40, %v3035_v43 }
  0xeb   : > { %v3043_v51 = vpop.permute.xlu1 %3042  ;;  %v1125_v6 = vsel %vm1111_vm2, %v1096_v3, %v3030_v44  ;;  %v1124_v7 = vsel %vm1111_vm2, %v1095_v54, %v3029_v48 }
  0xec   : > { %v3038_v49 = vpop.permute.xlu0 %3037  ;;  %v3045_v41 = vunpack.i.h.bf16 %v3043_v51  ;;  %v3044_v39 = vunpack.i.l.bf16 %v3043_v51 }
  0xed   : > { %3332 = vrot.lane.b32.xlu1 %v3331_v17, %s3467_s8  ;;  %v3040_v31 = vunpack.i.h.bf16 %v3038_v49  ;;  %v3039_v53 = vunpack.i.l.bf16 %v3038_v49 }
  0xee   : > { %3327 = vrot.lane.b32.xlu0 %v3326_v62, %s3467_s8  ;;  %v1155_v0 = vsel %vm1140_vm3, %v1126_v4, %v3044_v39  ;;  %v1156_v16 = vsel %vm1140_vm3, %v1127_v50, %v3045_v41 }
  0xef   : > { %v4092_v9 = vpop.permute.xlu1 %3052  ;;  %v1153_v55 = vsel %vm1140_vm3, %v1124_v7, %v3039_v53  ;;  %v1154_v18 = vsel %vm1140_vm3, %v1125_v6, %v3040_v31 }
  0xf0   : > { %v3048_v59 = vpop.permute.xlu0 %3047  ;;  %v3055_v15 = vunpack.i.h.bf16 %v4092_v9  ;;  %v3054_v14 = vunpack.i.l.bf16 %v4092_v9 }
  0xf1   : > { %v3050_v1 = vunpack.i.h.bf16 %v3048_v59  ;;  %v3049_v8 = vunpack.i.l.bf16 %v3048_v59 }
  0xf2   : > { %v1184_v62 = vsel %vm1169_vm4, %v1155_v0, %v3054_v14  ;;  %v1185_v51 = vsel %vm1169_vm4, %v1156_v16, %v3055_v15 }
  0xf3   : > { %v4094_v33 = vpop.permute.xlu1 %3062  ;;  %v1182_v27 = vsel %vm1169_vm4, %v1153_v55, %v3049_v8  ;;  %v1183_v24 = vsel %vm1169_vm4, %v1154_v18, %v3050_v1  ;;  %v3442_v18 = vld [vmem:[%s3515_s20 + $0x98] sm:$0xff] }
  0xf4   : > { %v3058_v26 = vpop.permute.xlu0 %3057  ;;  %v3065_v36 = vunpack.i.h.bf16 %v4094_v33  ;;  %v3064_v25 = vunpack.i.l.bf16 %v4094_v33 }
  0xf5   : > { %v3060_v5 = vunpack.i.h.bf16 %v3058_v26  ;;  %v3059_v56 = vunpack.i.l.bf16 %v3058_v26 }
  0xf6   : > { %v1213_v33 = vsel %vm1198_vm5, %v1184_v62, %v3064_v25  ;;  %v1214_v26 = vsel %vm1198_vm5, %v1185_v51, %v3065_v36 }
  0xf7   : > { %v3073_v20 = vpop.permute.xlu1 %3072  ;;  %v1211_v47 = vsel %vm1198_vm5, %v1182_v27, %v3059_v56  ;;  %v1212_v28 = vsel %vm1198_vm5, %v1183_v24, %v3060_v5  ;;  %v3445_v24 = vld [vmem:[%s3515_s20 + $0x80] sm:$0xff] }
  0xf8   : > { %v3068_v21 = vpop.permute.xlu0 %3067  ;;  %v3075_v29 = vunpack.i.h.bf16 %v3073_v20  ;;  %v3074_v30 = vunpack.i.l.bf16 %v3073_v20 }
  0xf9   : > { %v3070_v19 = vunpack.i.h.bf16 %v3068_v21  ;;  %v3069_v11 = vunpack.i.l.bf16 %v3068_v21 }
  0xfa   : > { %v1242_v35 = vsel %vm1227_vm6, %v1213_v33, %v3074_v30  ;;  %v1243_v57 = vsel %vm1227_vm6, %v1214_v26, %v3075_v29 }
  0xfb   : > { %v3083_v10 = vpop.permute.xlu1 %3082  ;;  %v1240_v37 = vsel %vm1227_vm6, %v1211_v47, %v3069_v11  ;;  %v1241_v13 = vsel %vm1227_vm6, %v1212_v28, %v3070_v19  ;;  %v3443_v11 = vld [vmem:[%s3515_s20 + $0x90] sm:$0xff] }
  0xfc   : > { %v3078_v58 = vpop.permute.xlu0 %3077  ;;  %v3085_v52 = vunpack.i.h.bf16 %v3083_v10  ;;  %v3084_v12 = vunpack.i.l.bf16 %v3083_v10 }
  0xfd   : > { %v3080_v42 = vunpack.i.h.bf16 %v3078_v58  ;;  %v3079_v23 = vunpack.i.l.bf16 %v3078_v58 }
  0xfe   : > { %v1271_v44 = vsel %vm1256_vm7, %v1242_v35, %v3084_v12  ;;  %v1272_v48 = vsel %vm1256_vm7, %v1243_v57, %v3085_v52 }
  0xff   : > { %v4120_v46 = vpop.permute.xlu1 %3092  ;;  %v1269_v32 = vsel %vm1256_vm7, %v1240_v37, %v3079_v23  ;;  %v1270_v17 = vsel %vm1256_vm7, %v1241_v13, %v3080_v42  ;;  %v3444_v23 = vld [vmem:[%s3515_s20 + $0x88] sm:$0xff] }
 0x100   : > { %v3088_v38 = vpop.permute.xlu0 %3087  ;;  %v3095_v7 = vunpack.i.h.bf16 %v4120_v46  ;;  %v3094_v1 = vunpack.i.l.bf16 %v4120_v46 }
 0x101   : > { %v3090_v61 = vunpack.i.h.bf16 %v3088_v38  ;;  %v3089_v2 = vunpack.i.l.bf16 %v3088_v38 }
 0x102   : > { %v1100_v27 = vsel %vm1082_vm1, %v3444_v23, %v3095_v7  ;;  %v1099_v36 = vsel %vm1082_vm1, %v3445_v24, %v3094_v1 }
 0x103   : > { %v1298_v49 = vsel %vm1285_vm8, %v1269_v32, %v3089_v2  ;;  %v1299_v9 = vsel %vm1285_vm8, %v1270_v17, %v3090_v61  ;;  %v3103_v59 = vpop.permute.xlu1 %3102 }
 0x104   : > { %v1325_v34 = vpack.c.bf16 %v1299_v9, %v1298_v49  ;;  %v3098_v22 = vpop.permute.xlu0 %3097  ;;  %v3105_v50 = vunpack.i.h.bf16 %v3103_v59  ;;  %v3104_v6 = vunpack.i.l.bf16 %v3103_v59 }
 0x105   : > { %v3100_v43 = vunpack.i.h.bf16 %v3098_v22  ;;  %v3099_v45 = vunpack.i.l.bf16 %v3098_v22 }
 0x106   : > { %2675 = vmatprep.mubr.msk.bf16.mxu0 %vm1353_vm9, %v1325_v34  ;;  %v1102_v19 = vsel %vm1082_vm1, %v3442_v18, %v3105_v50  ;;  %v1101_v15 = vsel %vm1082_vm1, %v3443_v11, %v3104_v6 }
 0x107   : > { %v1301_v20 = vsel %vm1285_vm8, %v1272_v48, %v3100_v43  ;;  %v1300_v41 = vsel %vm1285_vm8, %v1271_v44, %v3099_v45  ;;  %v3113_v39 = vpop.permute.xlu1 %3112 }
 0x108   : > { %v1326_v21 = vpack.c.bf16 %v1301_v20, %v1300_v41  ;;  %v3108_v40 = vpop.permute.xlu0 %3107  ;;  %v3115_v8 = vunpack.i.h.bf16 %v3113_v39  ;;  %v3114_v10 = vunpack.i.l.bf16 %v3113_v39 }
 0x109   : > { %v3110_v0 = vunpack.i.h.bf16 %v3108_v40  ;;  %v3109_v16 = vunpack.i.l.bf16 %v3108_v40 }
 0x10a   : > { %2676 = vmatmul.mubr.msk.bf16.gmra.mxu0 %vm1353_vm9, %v1326_v21  ;;  %v1130_v25 = vsel %vm1111_vm2, %v1101_v15, %v3114_v10  ;;  %v1131_v46 = vsel %vm1111_vm2, %v1102_v19, %v3115_v8 }
 0x10b   : > { %v3123_v60 = vpop.permute.xlu1 %3122  ;;  %v1129_v47 = vsel %vm1111_vm2, %v1100_v27, %v3110_v0  ;;  %v1128_v28 = vsel %vm1111_vm2, %v1099_v36, %v3109_v16 }
 0x10c   : > { %v3118_v31 = vpop.permute.xlu0 %3117  ;;  %v3125_v56 = vunpack.i.h.bf16 %v3123_v60  ;;  %v3124_v58 = vunpack.i.l.bf16 %v3123_v60 }
 0x10d   : > { %v3120_v14 = vunpack.i.h.bf16 %v3118_v31  ;;  %v3119_v42 = vunpack.i.l.bf16 %v3118_v31 }
 0x10e   : > { %v1159_v37 = vsel %vm1140_vm3, %v1130_v25, %v3124_v58  ;;  %v1160_v13 = vsel %vm1140_vm3, %v1131_v46, %v3125_v56 }
 0x10f   : > { %v4142_v53 = vpop.permute.xlu1 %3132  ;;  %v1157_v12 = vsel %vm1140_vm3, %v1128_v28, %v3119_v42  ;;  %v1158_v32 = vsel %vm1140_vm3, %v1129_v47, %v3120_v14 }
 0x110   : > { %v3128_v3 = vpop.permute.xlu0 %3127  ;;  %v3135_v51 = vunpack.i.h.bf16 %v4142_v53  ;;  %v3134_v49 = vunpack.i.l.bf16 %v4142_v53 }
 0x111   : > { %v3130_v29 = vunpack.i.h.bf16 %v3128_v3  ;;  %v3129_v30 = vunpack.i.l.bf16 %v3128_v3 }
 0x112   : > { %v1188_v3 = vsel %vm1169_vm4, %v1159_v37, %v3134_v49 }
 0x113   : > { %v4144_v54 = vpop.permute.xlu1 %3142  ;;  %v1186_v33 = vsel %vm1169_vm4, %v1157_v12, %v3129_v30  ;;  %v1187_v26 = vsel %vm1169_vm4, %v1158_v32, %v3130_v29  ;;  %v3446_v32 = vld [vmem:[%s3515_s20 + $0xb8] sm:$0xff] }
 0x114   : > { %v3138_v4 = vpop.permute.xlu0 %3137  ;;  %v3145_v34 = vunpack.i.h.bf16 %v4144_v54  ;;  %v3144_v22 = vunpack.i.l.bf16 %v4144_v54  ;;  %v1189_v54 = vsel %vm1169_vm4, %v1160_v13, %v3135_v51 }
 0x115   : > { %v3140_v61 = vunpack.i.h.bf16 %v3138_v4  ;;  %v3139_v2 = vunpack.i.l.bf16 %v3138_v4 }
 0x116   : > { %v1217_v7 = vsel %vm1198_vm5, %v1188_v3, %v3144_v22  ;;  %v1218_v1 = vsel %vm1198_vm5, %v1189_v54, %v3145_v34 }
 0x117   : > { %v4148_v5 = vpop.permute.xlu1 %3152  ;;  %v1215_v57 = vsel %vm1198_vm5, %v1186_v33, %v3139_v2  ;;  %v1216_v43 = vsel %vm1198_vm5, %v1187_v26, %v3140_v61  ;;  %v3449_v26 = vld [vmem:[%s3515_s20 + $0xa0] sm:$0xff] }
 0x118   : > { %v3148_v55 = vpop.permute.xlu0 %3147  ;;  %v3155_v45 = vunpack.i.h.bf16 %v4148_v5  ;;  %v3154_v44 = vunpack.i.l.bf16 %v4148_v5 }
 0x119   : > { %v3150_v17 = vunpack.i.h.bf16 %v3148_v55  ;;  %v3149_v62 = vunpack.i.l.bf16 %v3148_v55 }
 0x11a   : > { %v1246_v0 = vsel %vm1227_vm6, %v1217_v7, %v3154_v44  ;;  %v1247_v16 = vsel %vm1227_vm6, %v1218_v1, %v3155_v45 }
 0x11b   : > { %v3163_v38 = vpop.permute.xlu1 %3162  ;;  %v1244_v20 = vsel %vm1227_vm6, %v1215_v57, %v3149_v62  ;;  %v1245_v41 = vsel %vm1227_vm6, %v1216_v43, %v3150_v17  ;;  %v3447_v62 = vld [vmem:[%s3515_s20 + $0xb0] sm:$0xff] }
 0x11c   : > { %v3158_v52 = vpop.permute.xlu0 %3157  ;;  %v3165_v40 = vunpack.i.h.bf16 %v3163_v38  ;;  %v3164_v60 = vunpack.i.l.bf16 %v3163_v38 }
 0x11d   : > { %v3160_v9 = vunpack.i.h.bf16 %v3158_v52  ;;  %v3159_v59 = vunpack.i.l.bf16 %v3158_v52 }
 0x11e   : > { %v1275_v58 = vsel %vm1256_vm7, %v1246_v0, %v3164_v60  ;;  %v1276_v55 = vsel %vm1256_vm7, %v1247_v16, %v3165_v40 }
 0x11f   : > { %v4172_v35 = vpop.permute.xlu1 %3172  ;;  %v1273_v31 = vsel %vm1256_vm7, %v1244_v20, %v3159_v59  ;;  %v1274_v53 = vsel %vm1256_vm7, %v1245_v41, %v3160_v9  ;;  %v3448_v59 = vld [vmem:[%s3515_s20 + $0xa8] sm:$0xff] }
 0x120   : > { %v3168_v48 = vpop.permute.xlu0 %3167  ;;  %v3175_v28 = vunpack.i.h.bf16 %v4172_v35  ;;  %v3174_v29 = vunpack.i.l.bf16 %v4172_v35 }
 0x121   : > { %v3170_v39 = vunpack.i.h.bf16 %v3168_v48  ;;  %v3169_v21 = vunpack.i.l.bf16 %v3168_v48 }
 0x122   : > { %v1104_v33 = vsel %vm1082_vm1, %v3448_v59, %v3175_v28  ;;  %v1103_v34 = vsel %vm1082_vm1, %v3449_v26, %v3174_v29 }
 0x123   : > { %v1302_v4 = vsel %vm1285_vm8, %v1273_v31, %v3169_v21  ;;  %v1303_v50 = vsel %vm1285_vm8, %v1274_v53, %v3170_v39  ;;  %v3183_v6 = vpop.permute.xlu1 %3182 }
 0x124   : > { %v1327_v8 = vpack.c.bf16 %v1303_v50, %v1302_v4  ;;  %v3178_v10 = vpop.permute.xlu0 %3177  ;;  %v3185_v46 = vunpack.i.h.bf16 %v3183_v6  ;;  %v3184_v47 = vunpack.i.l.bf16 %v3183_v6 }
 0x125   : > { %v3180_v5 = vunpack.i.h.bf16 %v3178_v10  ;;  %v3179_v56 = vunpack.i.l.bf16 %v3178_v10 }
 0x126   : > { %2679 = vmatprep.mubr.msk.bf16.mxu0 %vm1353_vm9, %v1327_v8  ;;  %v1106_v17 = vsel %vm1082_vm1, %v3446_v32, %v3185_v46  ;;  %v1105_v51 = vsel %vm1082_vm1, %v3447_v62, %v3184_v47 }
 0x127   : > { %v1305_v18 = vsel %vm1285_vm8, %v1276_v55, %v3180_v5  ;;  %v1304_v19 = vsel %vm1285_vm8, %v1275_v58, %v3179_v56  ;;  %v3193_v11 = vpop.permute.xlu1 %3192 }
 0x128   : > { %v1328_v15 = vpack.c.bf16 %v1305_v18, %v1304_v19  ;;  %v3188_v14 = vpop.permute.xlu0 %3187  ;;  %v3195_v30 = vunpack.i.h.bf16 %v3193_v11  ;;  %v3194_v38 = vunpack.i.l.bf16 %v3193_v11 }
 0x129   : > { %v3190_v37 = vunpack.i.h.bf16 %v3188_v14  ;;  %v3189_v13 = vunpack.i.l.bf16 %v3188_v14 }
 0x12a   : > { %2680 = vmatmul.mubr.msk.bf16.gmra.mxu0 %vm1353_vm9, %v1328_v15  ;;  %v1134_v22 = vsel %vm1111_vm2, %v1105_v51, %v3194_v38  ;;  %v1135_v35 = vsel %vm1111_vm2, %v1106_v17, %v3195_v30 }
 0x12b   : > { %v3203_v42 = vpop.permute.xlu1 %3202  ;;  %v1133_v57 = vsel %vm1111_vm2, %v1104_v33, %v3190_v37  ;;  %v1132_v43 = vsel %vm1111_vm2, %v1103_v34, %v3189_v13 }
 0x12c   : > { %v3198_v23 = vpop.permute.xlu0 %3197  ;;  %v3205_v2 = vunpack.i.h.bf16 %v3203_v42  ;;  %v3204_v52 = vunpack.i.l.bf16 %v3203_v42 }
 0x12d   : > { %v3200_v49 = vunpack.i.h.bf16 %v3198_v23  ;;  %v3199_v9 = vunpack.i.l.bf16 %v3198_v23 }
 0x12e   : > { %v1163_v20 = vsel %vm1140_vm3, %v1134_v22, %v3204_v52  ;;  %v1164_v41 = vsel %vm1140_vm3, %v1135_v35, %v3205_v2 }
 0x12f   : > { %v4196_v27 = vpop.permute.xlu1 %3212  ;;  %v1161_v60 = vsel %vm1140_vm3, %v1132_v43, %v3199_v9  ;;  %v1162_v31 = vsel %vm1140_vm3, %v1133_v57, %v3200_v49  ;;  %v236_v43 = vld [vmem:[%s3515_s20 + $0xd8] sm:$0x3f] }
 0x130   : > { %v3208_v24 = vpop.permute.xlu0 %3207  ;;  %v3215_v54 = vunpack.i.h.bf16 %v4196_v27  ;;  %v3214_v4 = vunpack.i.l.bf16 %v4196_v27 }
 0x131   : > { %v3210_v45 = vunpack.i.h.bf16 %v3208_v24  ;;  %v3209_v44 = vunpack.i.l.bf16 %v3208_v24 }
 0x132   : > { %v1192_v24 = vsel %vm1169_vm4, %v1163_v20, %v3214_v4 }
 0x133   : > { %v4198_v36 = vpop.permute.xlu1 %3222  ;;  %v1190_v7 = vsel %vm1169_vm4, %v1161_v60, %v3209_v44  ;;  %v1191_v1 = vsel %vm1169_vm4, %v1162_v31, %v3210_v45 }
 0x134   : > { %v3218_v25 = vpop.permute.xlu0 %3217  ;;  %v3225_v8 = vunpack.i.h.bf16 %v4198_v36  ;;  %v3224_v10 = vunpack.i.l.bf16 %v4198_v36  ;;  %v1193_v36 = vsel %vm1169_vm4, %v1164_v41, %v3215_v54  ;;  %v3450_v54 = vld [vmem:[%s3515_s20 + $0xc8] sm:$0xff] }
 0x135   : > { %v3220_v39 = vunpack.i.h.bf16 %v3218_v25  ;;  %v3219_v21 = vunpack.i.l.bf16 %v3218_v25 }
 0x136   : > { %v1221_v28 = vsel %vm1198_vm5, %v1192_v24, %v3224_v10  ;;  %v1222_v29 = vsel %vm1198_vm5, %v1193_v36, %v3225_v8 }
 0x137   : > { %v4202_v61 = vpop.permute.xlu1 %3232  ;;  %v1219_v16 = vsel %vm1198_vm5, %v1190_v7, %v3219_v21  ;;  %v1220_v5 = vsel %vm1198_vm5, %v1191_v1, %v3220_v39 }
 0x138   : > { %v3228_v12 = vpop.permute.xlu0 %3227  ;;  %v3235_v56 = vunpack.i.h.bf16 %v4202_v61  ;;  %v3234_v58 = vunpack.i.l.bf16 %v4202_v61 }
 0x139   : > { %v3230_v53 = vunpack.i.h.bf16 %v3228_v12  ;;  %v3229_v3 = vunpack.i.l.bf16 %v3228_v12 }
 0x13a   : > { %v1250_v37 = vsel %vm1227_vm6, %v1221_v28, %v3234_v58  ;;  %v1251_v13 = vsel %vm1227_vm6, %v1222_v29, %v3235_v56 }
 0x13b   : > { %v3243_v48 = vpop.permute.xlu1 %3242  ;;  %v1248_v18 = vsel %vm1227_vm6, %v1219_v16, %v3229_v3  ;;  %v1249_v19 = vsel %vm1227_vm6, %v1220_v5, %v3230_v53 }
 0x13c   : > { %v3238_v40 = vpop.permute.xlu0 %3237  ;;  %v3245_v14 = vunpack.i.h.bf16 %v3243_v48  ;;  %v3244_v42 = vunpack.i.l.bf16 %v3243_v48 }
 0x13d   : > { %v3240_v50 = vunpack.i.h.bf16 %v3238_v40  ;;  %v3239_v6 = vunpack.i.l.bf16 %v3238_v40 }
 0x13e   : > { %v1279_v52 = vsel %vm1256_vm7, %v1250_v37, %v3244_v42  ;;  %v1280_v12 = vsel %vm1256_vm7, %v1251_v13, %v3245_v14 }
 0x13f   : > { %v3253_v0 = vpop.permute.xlu1 %3252  ;;  %v1277_v23 = vsel %vm1256_vm7, %v1248_v18, %v3239_v6  ;;  %v1278_v27 = vsel %vm1256_vm7, %v1249_v19, %v3240_v50  ;;  %v3451_v50 = vld [vmem:[%s3515_s20 + $0xc0] sm:$0xff] }
 0x140   : > { %v3248_v55 = vpop.permute.xlu0 %3247  ;;  %v3255_v35 = vunpack.i.h.bf16 %v3253_v0  ;;  %v3254_v57 = vunpack.i.l.bf16 %v3253_v0 }
 0x141   : > { %v3250_v11 = vunpack.i.h.bf16 %v3248_v55  ;;  %v3249_v15 = vunpack.i.l.bf16 %v3248_v55 }
 0x142   : > { %v1108_v4 = vsel %vm1082_vm1, %v3450_v54, %v3255_v35  ;;  %v1107_v6 = vsel %vm1082_vm1, %v3451_v50, %v3254_v57 }
 0x143   : > { %v1306_v25 = vsel %vm1285_vm8, %v1277_v23, %v3249_v15  ;;  %v1307_v46 = vsel %vm1285_vm8, %v1278_v27, %v3250_v11  ;;  %v3263_v47 = vpop.permute.xlu1 %3262 }
 0x144   : > { %v1329_v30 = vpack.c.bf16 %v1307_v46, %v1306_v25  ;;  %v3258_v38 = vpop.permute.xlu0 %3257  ;;  %v3265_v34 = vunpack.i.h.bf16 %v3263_v47  ;;  %v3264_v22 = vunpack.i.l.bf16 %v3263_v47 }
 0x145   : > { %v3260_v61 = vunpack.i.h.bf16 %v3258_v38  ;;  %v3259_v2 = vunpack.i.l.bf16 %v3258_v38 }
 0x146   : > { %2683 = vmatprep.mubr.msk.bf16.mxu0 %vm1353_vm9, %v1329_v30  ;;  %v1110_v60 = vsel %vm1082_vm1, %v236_v43, %v3265_v34  ;;  %v1109_v31 = vsel %vm1082_vm1, %v3856_v63, %v3264_v22  ;;  %vm1952_vm1 = vcmask 146432  }
 0x147   : > { %v1309_v32 = vsel %vm1285_vm8, %v1280_v12, %v3260_v61  ;;  %v1308_v17 = vsel %vm1285_vm8, %v1279_v52, %v3259_v2  ;;  %v3273_v62 = vpop.permute.xlu1 %3272 }
 0x148   : > { %v1330_v51 = vpack.c.bf16 %v1309_v32, %v1308_v17  ;;  %v3268_v49 = vpop.permute.xlu0 %3267  ;;  %v3275_v45 = vunpack.i.h.bf16 %v3273_v62  ;;  %v3274_v44 = vunpack.i.l.bf16 %v3273_v62 }
 0x149   : > { %v3270_v20 = vunpack.i.h.bf16 %v3268_v49  ;;  %v3269_v41 = vunpack.i.l.bf16 %v3268_v49 }
 0x14a   : > { %2684 = vmatmul.mubr.msk.bf16.gmra.mxu0 %vm1353_vm9, %v1330_v51  ;;  %v1138_v7 = vsel %vm1111_vm2, %v1109_v31, %v3274_v44  ;;  %v1139_v1 = vsel %vm1111_vm2, %v1110_v60, %v3275_v45  ;;  %v4289_v60 = vld [vmem:[%s4629_s3] ss:$0 sm:$0xff] }
 0x14b   : > { %v3283_v9 = vpop.permute.xlu1 %3282  ;;  %v1137_v10 = vsel %vm1111_vm2, %v1108_v4, %v3270_v20  ;;  %v1136_v0 = vsel %vm1111_vm2, %v1107_v6, %v3269_v41 }
 0x14c   : > { %v3278_v59 = vpop.permute.xlu0 %3277  ;;  %v3285_v21 = vunpack.i.h.bf16 %v3283_v9  ;;  %v3284_v40 = vunpack.i.l.bf16 %v3283_v9 }
 0x14d   : > { %v3280_v53 = vunpack.i.h.bf16 %v3278_v59  ;;  %v3279_v3 = vunpack.i.l.bf16 %v3278_v59 }
 0x14e   : > { %v1167_v56 = vsel %vm1140_vm3, %v1138_v7, %v3284_v40  ;;  %v1168_v58 = vsel %vm1140_vm3, %v1139_v1, %v3285_v21 }
 0x14f   : > { %v3293_v33 = vpop.permute.xlu1 %3292  ;;  %v1165_v19 = vsel %vm1140_vm3, %v1136_v0, %v3279_v3  ;;  %v1166_v11 = vsel %vm1140_vm3, %v1137_v10, %v3280_v53 }
 0x150   : > { %v3288_v26 = vpop.permute.xlu0 %3287  ;;  %v3295_v16 = vunpack.i.h.bf16 %v3293_v33  ;;  %v3294_v5 = vunpack.i.l.bf16 %v3293_v33 }
 0x151   : > { %v3290_v55 = vunpack.i.h.bf16 %v3288_v26  ;;  %v3289_v18 = vunpack.i.l.bf16 %v3288_v26 }
 0x152   : > { %v1196_v25 = vsel %vm1169_vm4, %v1167_v56, %v3294_v5  ;;  %v1197_v46 = vsel %vm1169_vm4, %v1168_v58, %v3295_v16 }
 0x153   : > { %v3303_v48 = vpop.permute.xlu1 %3302  ;;  %v1194_v30 = vsel %vm1169_vm4, %v1165_v19, %v3289_v18  ;;  %v1195_v38 = vsel %vm1169_vm4, %v1166_v11, %v3290_v55  ;;  %vm1963_vm4 = vcmask 244736  }
 0x154   : > { %v3298_v39 = vpop.permute.xlu0 %3297  ;;  %v3305_v15 = vunpack.i.h.bf16 %v3303_v48  ;;  %v3304_v14 = vunpack.i.l.bf16 %v3303_v48 }
 0x155   : > { %v3300_v42 = vunpack.i.h.bf16 %v3298_v39  ;;  %v3299_v23 = vunpack.i.l.bf16 %v3298_v39 }
 0x156   : > { %v1225_v61 = vsel %vm1198_vm5, %v1196_v25, %v3304_v14  ;;  %v1226_v2 = vsel %vm1198_vm5, %v1197_v46, %v3305_v15 }
 0x157   : > { %v3313_v8 = vpop.permute.xlu1 %3312  ;;  %v1223_v32 = vsel %vm1198_vm5, %v1194_v30, %v3299_v23  ;;  %v1224_v17 = vsel %vm1198_vm5, %v1195_v38, %v3300_v42  ;;  %vm1974_vm5 = vcmask 343040  }
 0x158   : > { %v3308_v63 = vpop.permute.xlu0 %3307  ;;  %v3315_v27 = vunpack.i.h.bf16 %v3313_v8  ;;  %v3314_v24 = vunpack.i.l.bf16 %v3313_v8 }
 0x159   : > { %v3310_v47 = vunpack.i.h.bf16 %v3308_v63  ;;  %v3309_v28 = vunpack.i.l.bf16 %v3308_v63 }
 0x15a   : > { %v1254_v62 = vsel %vm1227_vm6, %v1225_v61, %v3314_v24  ;;  %v1255_v51 = vsel %vm1227_vm6, %v1226_v2, %v3315_v27 }
 0x15b   : > { %v3323_v36 = vpop.permute.xlu1 %3322  ;;  %v1252_v9 = vsel %vm1227_vm6, %v1223_v32, %v3309_v28  ;;  %v1253_v59 = vsel %vm1227_vm6, %v1224_v17, %v3310_v47 }
 0x15c   : > { %v3318_v29 = vpop.permute.xlu0 %3317  ;;  %v3325_v37 = vunpack.i.h.bf16 %v3323_v36  ;;  %v3324_v13 = vunpack.i.l.bf16 %v3323_v36 }
 0x15d   : > { %v3320_v52 = vunpack.i.h.bf16 %v3318_v29  ;;  %v3319_v12 = vunpack.i.l.bf16 %v3318_v29 }
 0x15e   : > { %v1283_v22 = vsel %vm1256_vm7, %v1254_v62, %v3324_v13  ;;  %v1284_v35 = vsel %vm1256_vm7, %v1255_v51, %v3325_v37 }
 0x15f   : > { %v3333_v49 = vpop.permute.xlu1 %3332  ;;  %v1281_v45 = vsel %vm1256_vm7, %v1252_v9, %v3319_v12  ;;  %v1282_v44 = vsel %vm1256_vm7, %v1253_v59, %v3320_v52  ;;  %vm1980_vm7 = vcmask 392192  }
 0x160   : > { %v3335_v33 = vunpack.i.h.bf16 %v3333_v49  ;;  %v3334_v26 = vunpack.i.l.bf16 %v3333_v49  ;;  %v3328_v34 = vpop.permute.xlu0 %3327 }
 0x161   : > { %v3330_v57 = vunpack.i.h.bf16 %v3328_v34  ;;  %v3329_v43 = vunpack.i.l.bf16 %v3328_v34 }
 0x162   : > { %v1312_v48 = vsel %vm1285_vm8, %v1283_v22, %v3334_v26  ;;  %v1313_v20 = vsel %vm1285_vm8, %v1284_v35, %v3335_v33 }
 0x163   : > { %v1332_v41 = vpack.c.bf16 %v1313_v20, %v1312_v48  ;;  %v1310_v39 = vsel %vm1285_vm8, %v1281_v45, %v3329_v43  ;;  %v1311_v21 = vsel %vm1285_vm8, %v1282_v44, %v3330_v57 }
 0x164   : > { %v1331_v40 = vpack.c.bf16 %v1311_v21, %v1310_v39 }
 0x166   : > { %2687 = vmatprep.mubr.msk.bf16.mxu0 %vm1353_vm9, %v1331_v40 }
 0x167   : > { %2688 = vmatmul.mubr.msk.bf16.gmra.mxu0 %vm1353_vm9, %v1332_v41 }
 0x16a   : > { %v2665_v31 = vpop.f32.mrf.mxu0 }
 0x16b   : > { %v1443_v53 = vadd.f32 %v2665_v31, %v4289_v60 }
 0x16c   : > { %v1434_v3 = vpop.f32.mrf.mxu0 }
 0x16d   : > { %v1547_v54 = vmax.f32 %v1443_v53, 0.0  ;;  %v1435_v4 = vadd.f32 %v4289_v60, %v1434_v3 }
 0x16e   : > { %v2666_v50 = vpop.f32.mrf.mxu0 }
 0x16f   : > { %1576 = vst.msk [vmem:[#allocation2 + $0x10] sm:$0xff] %vm1573_vm10, %v1547_v54  ;;  %v1545_v6 = vmax.f32 %v1435_v4, 0.0  ;;  %v1446_v7 = vadd.f32 %v2666_v50, %v4289_v60 }
 0x170   : > { %v1437_v1 = vpop.f32.mrf.mxu0 }
 0x171   : > { %1574 = vst.msk [vmem:[#allocation2] sm:$0xff] %vm1573_vm10, %v1545_v6  ;;  %v1548_v8 = vmax.f32 %v1446_v7, 0.0  ;;  %v1438_v10 = vadd.f32 %v4289_v60, %v1437_v1 }
 0x173   : > { %1577 = vst.msk [vmem:[#allocation2 + $0x18] sm:$0xff] %vm1573_vm10, %v1548_v8  ;;  %v1546_v0 = vmax.f32 %v1438_v10, 0.0 }
 0x175   : > { %1575 = vst.msk [vmem:[#allocation2 + $0x8] sm:$0xff] %vm1573_vm10, %v1546_v0 }
 0x176   : > { %v1605_v16 = vld [vmem:[#allocation2 + $0x10] sm:$0xff] }
 0x178   : > { %v1603_v63 = vld [vmem:[#allocation2] sm:$0xff] }
 0x17a   : > { %v1633_v5 = vld [vmem:[#allocation2 + $0x11] sm:$0xff] }
 0x17b   : > { %v1661_v56 = vmax.f32 %v1605_v16, %v1633_v5  ;;  %v1606_v30 = vld [vmem:[#allocation2 + $0x18] sm:$0xff] }
 0x17c   : > { %v1604_v58 = vld [vmem:[#allocation2 + $0x8] sm:$0xff] }
 0x17d   : > { %v1631_v55 = vld [vmem:[#allocation2 + $0x1] sm:$0xff]  ;;  %v1632_v18 = vld [vmem:[#allocation2 + $0x9] sm:$0xff]  ;;  %1689 = vst.msk [vmem:[#allocation3 + $0x10] sm:$0xff] %vm1573_vm10, %v1661_v56 }
 0x17e   : > { %v1659_v19 = vmax.f32 %v1603_v63, %v1631_v55  ;;  %v1660_v11 = vmax.f32 %v1604_v58, %v1632_v18 }
 0x180   : > { %1687 = vst.msk [vmem:[#allocation3] sm:$0xff] %vm1573_vm10, %v1659_v19  ;;  %1688 = vst.msk [vmem:[#allocation3 + $0x8] sm:$0xff] %vm1573_vm10, %v1660_v11 }
 0x187   : > { %v1716_v49 = vld [vmem:[#allocation3] ss:$2 sm:$0x7f] }
 0x18a   : > { %v2669_v15 = vpop.f32.mrf.mxu0 }
 0x18b   : > { %v1459_v14 = vadd.f32 %v2669_v15, %v4289_v60 }
 0x18c   : > { %v1450_v42 = vpop.f32.mrf.mxu0 }
 0x18d   : > { %v1551_v23 = vmax.f32 %v1459_v14, 0.0  ;;  %v1451_v27 = vadd.f32 %v4289_v60, %v1450_v42 }
 0x18e   : > { %v2670_v24 = vpop.f32.mrf.mxu0 }
 0x18f   : > { %1580 = vst.msk [vmem:[#allocation2 + $0x30] sm:$0xff] %vm1573_vm10, %v1551_v23  ;;  %v1549_v36 = vmax.f32 %v1451_v27, 0.0  ;;  %v1462_v25 = vadd.f32 %v2670_v24, %v4289_v60 }
 0x190   : > { %v1453_v46 = vpop.f32.mrf.mxu0 }
 0x191   : > { %1578 = vst.msk [vmem:[#allocation2 + $0x20] sm:$0xff] %vm1573_vm10, %v1549_v36  ;;  %v1552_v47 = vmax.f32 %v1462_v25, 0.0  ;;  %v1454_v28 = vadd.f32 %v4289_v60, %v1453_v46 }
 0x193   : > { %1581 = vst.msk [vmem:[#allocation2 + $0x38] sm:$0xff] %vm1573_vm10, %v1552_v47  ;;  %v1550_v29 = vmax.f32 %v1454_v28, 0.0 }
 0x195   : > { %1579 = vst.msk [vmem:[#allocation2 + $0x28] sm:$0xff] %vm1573_vm10, %v1550_v29 }
 0x196   : > { %v1609_v13 = vld [vmem:[#allocation2 + $0x30] sm:$0xff] }
 0x198   : > { %v1634_v38 = vld [vmem:[#allocation2 + $0x19] sm:$0xff] }
 0x199   : > { %v1662_v37 = vmax.f32 %v1606_v30, %v1634_v38  ;;  %v1607_v2 = vld [vmem:[#allocation2 + $0x20] sm:$0xff] }
 0x19a   : > { %v1637_v61 = vld [vmem:[#allocation2 + $0x31] sm:$0xff] }
 0x19b   : > { %1690 = vst.msk [vmem:[#allocation3 + $0x18] sm:$0xff] %vm1573_vm10, %v1662_v37  ;;  %v1665_v52 = vmax.f32 %v1609_v13, %v1637_v61  ;;  %v1610_v39 = vld [vmem:[#allocation2 + $0x38] sm:$0xff] }
 0x19c   : > { %v1608_v12 = vld [vmem:[#allocation2 + $0x28] sm:$0xff] }
 0x19d   : > { %v1635_v32 = vld [vmem:[#allocation2 + $0x21] sm:$0xff]  ;;  %v1636_v17 = vld [vmem:[#allocation2 + $0x29] sm:$0xff]  ;;  %1693 = vst.msk [vmem:[#allocation3 + $0x30] sm:$0xff] %vm1573_vm10, %v1665_v52 }
 0x19e   : > { %v1663_v62 = vmax.f32 %v1607_v2, %v1635_v32  ;;  %v1664_v51 = vmax.f32 %v1608_v12, %v1636_v17 }
 0x1a0   : > { %1691 = vst.msk [vmem:[#allocation3 + $0x20] sm:$0xff] %vm1573_vm10, %v1663_v62  ;;  %1692 = vst.msk [vmem:[#allocation3 + $0x28] sm:$0xff] %vm1573_vm10, %v1664_v51 }
 0x1a2   : > { %v1718_v9 = vld [vmem:[#allocation3 + $0x10] ss:$2 sm:$0x7f] }
 0x1a3   : > { %v1719_v59 = vmax.f32 %v1716_v49, %v1718_v9 }
 0x1a5   : > { %1721 = vst.msk [vmem:[#allocation4] sm:$0x7f] %vm1720_vm11, %v1719_v59 }
 0x1a7   : > { %v1723_v8 = vld [vmem:[#allocation3 + $0x20] ss:$2 sm:$0x7f] }
 0x1aa   : > { %v2673_v33 = vpop.f32.mrf.mxu0 }
 0x1ab   : > { %v1475_v26 = vadd.f32 %v2673_v33, %v4289_v60 }
 0x1ac   : > { %v1466_v34 = vpop.f32.mrf.mxu0 }
 0x1ad   : > { %v1555_v22 = vmax.f32 %v1475_v26, 0.0  ;;  %v1467_v35 = vadd.f32 %v4289_v60, %v1466_v34 }
 0x1ae   : > { %v2674_v57 = vpop.f32.mrf.mxu0 }
 0x1af   : > { %1584 = vst.msk [vmem:[#allocation2 + $0x50] sm:$0xff] %vm1573_vm10, %v1555_v22  ;;  %v1553_v43 = vmax.f32 %v1467_v35, 0.0  ;;  %v1478_v45 = vadd.f32 %v2674_v57, %v4289_v60 }
 0x1b0   : > { %v1469_v44 = vpop.f32.mrf.mxu0 }
 0x1b1   : > { %1582 = vst.msk [vmem:[#allocation2 + $0x40] sm:$0xff] %vm1573_vm10, %v1553_v43  ;;  %v1556_v48 = vmax.f32 %v1478_v45, 0.0  ;;  %v1470_v20 = vadd.f32 %v4289_v60, %v1469_v44 }
 0x1b3   : > { %1585 = vst.msk [vmem:[#allocation2 + $0x58] sm:$0xff] %vm1573_vm10, %v1556_v48  ;;  %v1554_v41 = vmax.f32 %v1470_v20, 0.0 }
 0x1b5   : > { %1583 = vst.msk [vmem:[#allocation2 + $0x48] sm:$0xff] %vm1573_vm10, %v1554_v41 }
 0x1b6   : > { %v1613_v31 = vld [vmem:[#allocation2 + $0x50] sm:$0xff] }
 0x1b8   : > { %v1638_v21 = vld [vmem:[#allocation2 + $0x39] sm:$0xff] }
 0x1b9   : > { %v1666_v40 = vmax.f32 %v1610_v39, %v1638_v21  ;;  %v1611_v3 = vld [vmem:[#allocation2 + $0x40] sm:$0xff] }
 0x1ba   : > { %v1641_v53 = vld [vmem:[#allocation2 + $0x51] sm:$0xff] }
 0x1bb   : > { %1694 = vst.msk [vmem:[#allocation3 + $0x38] sm:$0xff] %vm1573_vm10, %v1666_v40  ;;  %v1669_v54 = vmax.f32 %v1613_v31, %v1641_v53  ;;  %v1614_v23 = vld [vmem:[#allocation2 + $0x58] sm:$0xff] }
 0x1bc   : > { %v1612_v4 = vld [vmem:[#allocation2 + $0x48] sm:$0xff] }
 0x1bd   : > { %v1639_v50 = vld [vmem:[#allocation2 + $0x41] sm:$0xff]  ;;  %v1640_v6 = vld [vmem:[#allocation2 + $0x49] sm:$0xff]  ;;  %1697 = vst.msk [vmem:[#allocation3 + $0x50] sm:$0xff] %vm1573_vm10, %v1669_v54 }
 0x1be   : > { %v1667_v7 = vmax.f32 %v1611_v3, %v1639_v50  ;;  %v1668_v1 = vmax.f32 %v1612_v4, %v1640_v6 }
 0x1c0   : > { %1695 = vst.msk [vmem:[#allocation3 + $0x40] sm:$0xff] %vm1573_vm10, %v1667_v7  ;;  %1696 = vst.msk [vmem:[#allocation3 + $0x48] sm:$0xff] %vm1573_vm10, %v1668_v1 }
 0x1c2   : > { %v1725_v10 = vld [vmem:[#allocation3 + $0x30] ss:$2 sm:$0x7f] }
 0x1c3   : > { %v1726_v0 = vmax.f32 %v1723_v8, %v1725_v10  ;;  %v3419_v8 = vld [vmem:[%s4628_s2 + $0x28] sm:$0x1f]   ;;  %v4365_v10 = vld [vmem:[%s4628_s2 + $0x20] sm:$0xff]  }
 0x1c5   : > { %1727 = vst.msk [vmem:[#allocation4 + $0x7] sm:$0x7f] %vm1720_vm11, %v1726_v0  ;;  %v3469_v0 = vmov 0.0  }
 0x1c6   : > { %2691 = vmatprep.subr.bf16.mxu1 %v3469_v0  ;;  %2743 = vmatprep.subr.bf16.mxu0 %v3469_v0 }
 0x1c7   : > { %v1729_v13 = vld [vmem:[#allocation3 + $0x40] ss:$2 sm:$0x7f]  ;;  %2699 = vmatprep.mubr.msk.bf16.mxu1 %vm3472_vm14, %v3469_v0  ;;  %2747 = vmatprep.mubr.msk.bf16.mxu0 %vm3472_vm14, %v3469_v0 }
 0x1ca   : > { %v2677_v16 = vpop.f32.mrf.mxu0 }
 0x1cb   : > { %v1491_v5 = vadd.f32 %v2677_v16, %v4289_v60 }
 0x1cc   : > { %v1482_v63 = vpop.f32.mrf.mxu0  ;;  %v1768_v32 = vld [vmem:[#allocation4 + $0x2] sm:$0xff] }
 0x1cd   : > { %v1559_v56 = vmax.f32 %v1491_v5, 0.0  ;;  %v1483_v58 = vadd.f32 %v4289_v60, %v1482_v63  ;;  %v1763_v51 = vld [vmem:[#allocation4 + $0x1] sm:$0xff]  ;;  %v2028_v5 = vrot.slane %v3419_v8, 2  ;;  %v2026_v63 = vrot.slane %v4365_v10, 2 }
 0x1ce   : > { %v2678_v55 = vpop.f32.mrf.mxu0 }
 0x1cf   : > { %1588 = vst.msk [vmem:[#allocation2 + $0x70] sm:$0xff] %vm1573_vm10, %v1559_v56  ;;  %v1557_v18 = vmax.f32 %v1483_v58, 0.0  ;;  %v1494_v19 = vadd.f32 %v2678_v55, %v4289_v60 }
 0x1d0   : > { %v1485_v11 = vpop.f32.mrf.mxu0 }
 0x1d1   : > { %1586 = vst.msk [vmem:[#allocation2 + $0x60] sm:$0xff] %vm1573_vm10, %v1557_v18  ;;  %v1560_v15 = vmax.f32 %v1494_v19, 0.0  ;;  %v1486_v14 = vadd.f32 %v4289_v60, %v1485_v11 }
 0x1d3   : > { %1589 = vst.msk [vmem:[#allocation2 + $0x78] sm:$0xff] %vm1573_vm10, %v1560_v15  ;;  %v1558_v42 = vmax.f32 %v1486_v14, 0.0  ;;  %v2045_v15 = vsel %vm2043_vm12, %v2028_v5, 0  ;;  %vm2112_vm12 = vcmask 90112  }
 0x1d4   : > { %2692 = vmatpush3.bf16.msra.mxu1 %v2045_v15 }
 0x1d5   : > { %1587 = vst.msk [vmem:[#allocation2 + $0x68] sm:$0xff] %vm1573_vm10, %v1558_v42  ;;  %2693 = vmatprep.subr.bf16.mxu1 %v3469_v0 }
 0x1d6   : > { %v1617_v36 = vld [vmem:[#allocation2 + $0x70] sm:$0xff] }
 0x1d8   : > { %v1642_v27 = vld [vmem:[#allocation2 + $0x59] sm:$0xff] }
 0x1d9   : > { %v1670_v24 = vmax.f32 %v1614_v23, %v1642_v27  ;;  %v1615_v46 = vld [vmem:[#allocation2 + $0x60] sm:$0xff] }
 0x1da   : > { %v1645_v25 = vld [vmem:[#allocation2 + $0x71] sm:$0xff] }
 0x1db   : > { %1698 = vst.msk [vmem:[#allocation3 + $0x58] sm:$0xff] %vm1573_vm10, %v1670_v24  ;;  %v1673_v47 = vmax.f32 %v1617_v36, %v1645_v25  ;;  %v1618_v48 = vld [vmem:[#allocation2 + $0x78] sm:$0xff]  ;;  %v2029_v25 = vsel %vm2022_vm13, %v2026_v63, %v2028_v5 }
 0x1dc   : > { %v1616_v28 = vld [vmem:[#allocation2 + $0x68] sm:$0xff]  ;;  %2694 = vmatpush3.bf16.msra.mxu1 %v2029_v25 }
 0x1dd   : > { %v1643_v29 = vld [vmem:[#allocation2 + $0x61] sm:$0xff]  ;;  %v1644_v30 = vld [vmem:[#allocation2 + $0x69] sm:$0xff]  ;;  %1701 = vst.msk [vmem:[#allocation3 + $0x70] sm:$0xff] %vm1573_vm10, %v1673_v47  ;;  %2695 = vmatprep.subr.bf16.mxu1 %v3469_v0 }
 0x1de   : > { %v1671_v38 = vmax.f32 %v1615_v46, %v1643_v29  ;;  %v1672_v37 = vmax.f32 %v1616_v28, %v1644_v30 }
 0x1e0   : > { %1699 = vst.msk [vmem:[#allocation3 + $0x60] sm:$0xff] %vm1573_vm10, %v1671_v38  ;;  %1700 = vst.msk [vmem:[#allocation3 + $0x68] sm:$0xff] %vm1573_vm10, %v1672_v37 }
 0x1e2   : > { %v1731_v61 = vld [vmem:[#allocation3 + $0x50] ss:$2 sm:$0x7f] }
 0x1e3   : > { %v1732_v2 = vmax.f32 %v1729_v13, %v1731_v61 }
 0x1e5   : > { %1733 = vst.msk [vmem:[#allocation4 + $0xe] sm:$0x7f] %vm1720_vm11, %v1732_v2 }
 0x1e7   : > { %v1735_v6 = vld [vmem:[#allocation3 + $0x60] ss:$2 sm:$0x7f] }
 0x1ea   : > { %v2681_v52 = vpop.f32.mrf.mxu0 }
 0x1eb   : > { %v1507_v12 = vadd.f32 %v2681_v52, %v4289_v60 }
 0x1ec   : > { %v1498_v17 = vpop.f32.mrf.mxu0  ;;  %v1769_v62 = vld [vmem:[#allocation4 + $0xa] sm:$0xff] }
 0x1ed   : > { %v4342_v49 = vld [vmem:[#allocation4 + $0x9] sm:$0xff]  ;;  %v1563_v9 = vmax.f32 %v1507_v12, 0.0  ;;  %v1499_v59 = vadd.f32 %v4289_v60, %v1498_v17  ;;  %v3341_v33 = vpack.i.bf16 %v1769_v62, %v1768_v32 }
 0x1ee   : > { %v3336_v26 = vpack.i.bf16 %v4342_v49, %v1763_v51  ;;  %v2682_v34 = vpop.f32.mrf.mxu0  ;;  %v4371_v58 = vld [vmem:[#allocation4 + $0x8] sm:$0xff] }
 0x1ef   : > { %1592 = vst.msk [vmem:[#allocation2 + $0x90] sm:$0xff] %vm1573_vm10, %v1563_v9  ;;  %v1561_v22 = vmax.f32 %v1499_v59, 0.0  ;;  %v1510_v35 = vadd.f32 %v2682_v34, %v4289_v60  ;;  %3342 = vrot.lane.b32.xlu1 %v3341_v33, %s3462_s23  ;;  %v1773_v19 = vld [vmem:[#allocation4 + $0x7] sm:$0xff]  ;;  %v3421_v33 = vld [vmem:[%s4628_s2 + $0x18] sm:$0xff]  }
 0x1f0   : > { %3337 = vrot.lane.b32.xlu0 %v3336_v26, %s3468_s11  ;;  %v1501_v57 = vpop.f32.mrf.mxu0 }
 0x1f1   : > { %1590 = vst.msk [vmem:[#allocation2 + $0x80] sm:$0xff] %vm1573_vm10, %v1561_v22  ;;  %v1564_v43 = vmax.f32 %v1510_v35, 0.0  ;;  %v1502_v45 = vadd.f32 %v4289_v60, %v1501_v57  ;;  %v2024_v35 = vrot.slane %v3421_v33, 2 }
 0x1f3   : > { %1593 = vst.msk [vmem:[#allocation2 + $0x98] sm:$0xff] %vm1573_vm10, %v1564_v43  ;;  %v1562_v44 = vmax.f32 %v1502_v45, 0.0  ;;  %v2027_v57 = vsel %vm2022_vm13, %v2024_v35, %v2026_v63  ;;  %v3422_v43 = vld [vmem:[%s4628_s2 + $0x10] sm:$0xfc]  }
 0x1f4   : > { %2696 = vmatpush3.bf16.msra.mxu1 %v2027_v57 }
 0x1f5   : > { %1591 = vst.msk [vmem:[#allocation2 + $0x88] sm:$0xff] %vm1573_vm10, %v1562_v44  ;;  %2697 = vmatprep.subr.bf16.mxu1 %v3469_v0  ;;  %v2023_v44 = vrot.slane %v3422_v43, 2 }
 0x1f6   : > { %v1621_v39 = vld [vmem:[#allocation2 + $0x90] sm:$0xff] }
 0x1f8   : > { %v1646_v20 = vld [vmem:[#allocation2 + $0x79] sm:$0xff] }
 0x1f9   : > { %v1674_v41 = vmax.f32 %v1618_v48, %v1646_v20  ;;  %v1619_v40 = vld [vmem:[#allocation2 + $0x80] sm:$0xff] }
 0x1fa   : > { %v1649_v21 = vld [vmem:[#allocation2 + $0x91] sm:$0xff] }
 0x1fb   : > { %1702 = vst.msk [vmem:[#allocation3 + $0x78] sm:$0xff] %vm1573_vm10, %v1674_v41  ;;  %v1677_v31 = vmax.f32 %v1621_v39, %v1649_v21  ;;  %v1622_v13 = vld [vmem:[#allocation2 + $0x98] sm:$0xff]  ;;  %v2025_v41 = vsel %vm2022_vm13, %v2023_v44, %v2024_v35 }
 0x1fc   : > { %v1620_v53 = vld [vmem:[#allocation2 + $0x88] sm:$0xff]  ;;  %2698 = vmatpush3.bf16.msra.mxu1 %v2025_v41 }
 0x1fd   : > { %v1647_v3 = vld [vmem:[#allocation2 + $0x81] sm:$0xff]  ;;  %v1648_v54 = vld [vmem:[#allocation2 + $0x89] sm:$0xff]  ;;  %1705 = vst.msk [vmem:[#allocation3 + $0x90] sm:$0xff] %vm1573_vm10, %v1677_v31  ;;  %2711 = vmatprep.subr.bf16.mxu1 %v3469_v0 }
 0x1fe   : > { %v1675_v4 = vmax.f32 %v1619_v40, %v1647_v3  ;;  %v1676_v50 = vmax.f32 %v1620_v53, %v1648_v54 }
 0x200   : > { %1703 = vst.msk [vmem:[#allocation3 + $0x80] sm:$0xff] %vm1573_vm10, %v1675_v4  ;;  %1704 = vst.msk [vmem:[#allocation3 + $0x88] sm:$0xff] %vm1573_vm10, %v1676_v50 }
 0x202   : > { %v1737_v7 = vld [vmem:[#allocation3 + $0x70] ss:$2 sm:$0x7f] }
 0x203   : > { %v1738_v1 = vmax.f32 %v1735_v6, %v1737_v7 }
 0x205   : > { %1739 = vst.msk [vmem:[#allocation4 + $0x15] sm:$0x7f] %vm1720_vm11, %v1738_v1 }
 0x207   : > { %v1741_v26 = vld [vmem:[#allocation3 + $0x80] ss:$2 sm:$0x7f] }
 0x20a   : > { %v2685_v16 = vpop.f32.mrf.mxu0 }
 0x20b   : > { %v1523_v56 = vadd.f32 %v2685_v16, %v4289_v60 }
 0x20c   : > { %v1514_v55 = vpop.f32.mrf.mxu0  ;;  %v4373_v18 = vld [vmem:[#allocation4 + $0x10] sm:$0xff] }
 0x20d   : > { %v4375_v11 = vld [vmem:[#allocation4 + $0xf] sm:$0xff]  ;;  %v1567_v14 = vmax.f32 %v1523_v56, 0.0  ;;  %v1515_v42 = vadd.f32 %v4289_v60, %v1514_v55  ;;  %v3351_v23 = vpack.i.bf16 %v4373_v18, %v4371_v58 }
 0x20e   : > { %v3346_v27 = vpack.i.bf16 %v4375_v11, %v1773_v19  ;;  %v2686_v24 = vpop.f32.mrf.mxu0  ;;  %v4381_v36 = vld [vmem:[#allocation4 + $0x11] sm:$0xff] }
 0x20f   : > { %1596 = vst.msk [vmem:[#allocation2 + $0xb0] sm:$0xff] %vm1573_vm10, %v1567_v14  ;;  %v1565_v46 = vmax.f32 %v1515_v42, 0.0  ;;  %v1526_v47 = vadd.f32 %v2686_v24, %v4289_v60  ;;  %3352 = vrot.lane.b32.xlu1 %v3351_v23, %s3465_s30  ;;  %v3356_v38 = vpack.i.bf16 %v4381_v36, %v4342_v49  ;;  %v1782_v3 = vld [vmem:[#allocation4 + $0xe] sm:$0xff] }
 0x210   : > { %3347 = vrot.lane.b32.xlu0 %v3346_v27, %s3470_s18  ;;  %v1517_v28 = vpop.f32.mrf.mxu0 }
 0x211   : > { %1594 = vst.msk [vmem:[#allocation2 + $0xa0] sm:$0xff] %vm1573_vm10, %v1565_v46  ;;  %v1568_v29 = vmax.f32 %v1526_v47, 0.0  ;;  %v1518_v30 = vadd.f32 %v4289_v60, %v1517_v28 }
 0x213   : > { %1597 = vst.msk [vmem:[#allocation2 + $0xb8] sm:$0xff] %vm1573_vm10, %v1568_v29  ;;  %v1566_v37 = vmax.f32 %v1518_v30, 0.0 }
 0x214   : > { %3357 = vrot.lane.b32.xlu0 %v3356_v38, %s3471_s19 }
 0x215   : > { %1595 = vst.msk [vmem:[#allocation2 + $0xa8] sm:$0xff] %vm1573_vm10, %v1566_v37 }
 0x216   : > { %v1625_v52 = vld [vmem:[#allocation2 + $0xb0] sm:$0xff] }
 0x218   : > { %v1650_v61 = vld [vmem:[#allocation2 + $0x99] sm:$0xff] }
 0x219   : > { %v1678_v2 = vmax.f32 %v1622_v13, %v1650_v61  ;;  %v1623_v32 = vld [vmem:[#allocation2 + $0xa0] sm:$0xff] }
 0x21a   : > { %v1653_v12 = vld [vmem:[#allocation2 + $0xb1] sm:$0xff] }
 0x21b   : > { %1706 = vst.msk [vmem:[#allocation3 + $0x98] sm:$0xff] %vm1573_vm10, %v1678_v2  ;;  %v1681_v17 = vmax.f32 %v1625_v52, %v1653_v12  ;;  %v1626_v19 = vld [vmem:[#allocation2 + $0xb8] sm:$0xff] }
 0x21c   : > { %v1624_v62 = vld [vmem:[#allocation2 + $0xa8] sm:$0xff] }
 0x21d   : > { %v1651_v51 = vld [vmem:[#allocation2 + $0xa1] sm:$0xff]  ;;  %v1652_v49 = vld [vmem:[#allocation2 + $0xa9] sm:$0xff]  ;;  %1709 = vst.msk [vmem:[#allocation3 + $0xb0] sm:$0xff] %vm1573_vm10, %v1681_v17 }
 0x21e   : > { %v1679_v9 = vmax.f32 %v1623_v32, %v1651_v51  ;;  %v1680_v59 = vmax.f32 %v1624_v62, %v1652_v49 }
 0x220   : > { %1707 = vst.msk [vmem:[#allocation3 + $0xa0] sm:$0xff] %vm1573_vm10, %v1679_v9  ;;  %1708 = vst.msk [vmem:[#allocation3 + $0xa8] sm:$0xff] %vm1573_vm10, %v1680_v59 }
 0x222   : > { %v1743_v34 = vld [vmem:[#allocation3 + $0x90] ss:$2 sm:$0x7f] }
 0x223   : > { %v1744_v22 = vmax.f32 %v1741_v26, %v1743_v34 }
 0x225   : > { %1745 = vst.msk [vmem:[#allocation4 + $0x1c] sm:$0x7f] %vm1720_vm11, %v1744_v22 }
 0x227   : > { %v2689_v45 = vpop.f32.mrf.mxu0  ;;  %v1747_v37 = vld [vmem:[#allocation3 + $0xa0] ss:$2 sm:$0x7f] }
 0x228   : > { %v1539_v48 = vadd.f32 %v2689_v45, %v4289_v60 }
 0x229   : > { %v1530_v20 = vpop.f32.mrf.mxu0 }
 0x22a   : > { %v1571_v39 = vmax.f32 %v1539_v48, 0.0  ;;  %v1531_v21 = vadd.f32 %v4289_v60, %v1530_v20 }
 0x22b   : > { %v2690_v40 = vpop.f32.mrf.mxu0 }
 0x22c   : > { %1600 = vst.msk [vmem:[#allocation2 + $0xd0] sm:$0xff] %vm1573_vm10, %v1571_v39  ;;  %v1569_v31 = vmax.f32 %v1531_v21, 0.0  ;;  %v1542_v53 = vadd.f32 %v2690_v40, %v4289_v60  ;;  %v1783_v54 = vld [vmem:[#allocation4 + $0x16] sm:$0xff]  ;;  %v1772_v43 = vld [vmem:[#allocation4 + $0x22] sm:$0x1] }
 0x22d   : > { %v4416_v4 = vld [vmem:[#allocation4 + $0x17] sm:$0xff]  ;;  %v1533_v50 = vpop.f32.mrf.mxu0  ;;  %v3361_v6 = vpack.i.bf16 %v1783_v54, %v1782_v3  ;;  %v1767_v45 = vld [vmem:[#allocation4 + $0x21] sm:$0x1] }
 0x22e   : > { %v3366_v7 = vpack.i.bf16 %v4416_v4, %v4375_v11  ;;  %1598 = vst.msk [vmem:[#allocation2 + $0xc0] sm:$0xff] %vm1573_vm10, %v1569_v31  ;;  %v1572_v1 = vmax.f32 %v1542_v53, 0.0  ;;  %v1534_v8 = vadd.f32 %v4289_v60, %v1533_v50  ;;  %v4426_v10 = vld [vmem:[#allocation4 + $0x18] sm:$0xff] }
 0x22f   : > { %v1766_v16 = vld [vmem:[#allocation4 + $0x19] sm:$0xff]  ;;  %3362 = vrot.lane.b32.xlu1 %v3361_v6, %s3473_s25  ;;  %v3371_v63 = vpack.i.bf16 %v4426_v10, %v4373_v18 }
 0x230   : > { %3367 = vrot.lane.b32.xlu0 %v3366_v7, %s3474_s26  ;;  %1602 = vst.msk [vmem:[#allocation2 + $0xd8] sm:$0x3f] %vm1601_vm15, %v1572_v1  ;;  %v1570_v5 = vmax.f32 %v1534_v8, 0.0  ;;  %v3376_v56 = vpack.i.bf16 %v1766_v16, %v4381_v36  ;;  %v1771_v55 = vld [vmem:[#allocation4 + $0x1a] sm:$0xff]  ;;  %v1770_v60 = vld [vmem:[#allocation4 + $0x12] sm:$0xff] }
 0x231   : > { %v3381_v15 = vpack.i.bf16 %v1771_v55, %v1770_v60  ;;  %v1758_v6 = vld [vmem:[#allocation4] sm:$0xff] }
 0x232   : > { %1599 = vst.msk [vmem:[#allocation2 + $0xc8] sm:$0xff] %vm1573_vm10, %v1570_v5 }
 0x233   : > { %3372 = vrot.lane.b32.xlu1 %v3371_v63, %s3475_s27  ;;  %v1629_v14 = vld [vmem:[#allocation2 + $0xd0] sm:$0xff] }
 0x234   : > { %3377 = vrot.lane.b32.xlu0 %v3376_v56, %s3468_s11 }
 0x235   : > { %v1654_v11 = vld [vmem:[#allocation2 + $0xb9] sm:$0xff] }
 0x236   : > { %v1682_v42 = vmax.f32 %v1626_v19, %v1654_v11  ;;  %v1627_v36 = vld [vmem:[#allocation2 + $0xc0] sm:$0xff] }
 0x237   : > { %v1630_v23 = vld [vmem:[#allocation2 + $0xd8] sm:$0x1f]  ;;  %3382 = vrot.lane.b32.xlu1 %v3381_v15, %s3462_s23 }
 0x238   : > { %v1657_v27 = vld [vmem:[#allocation2 + $0xd1] sm:$0xff]  ;;  %v1658_v24 = vld [vmem:[#allocation2 + $0xd9] sm:$0x1f]  ;;  %1710 = vst.msk [vmem:[#allocation3 + $0xb8] sm:$0xff] %vm1573_vm10, %v1682_v42 }
 0x239   : > { %v1685_v25 = vmax.f32 %v1629_v14, %v1657_v27  ;;  %v1686_v46 = vmax.f32 %v1630_v23, %v1658_v24  ;;  %v1628_v47 = vld [vmem:[#allocation2 + $0xc8] sm:$0xff] }
 0x23a   : > { %v1655_v28 = vld [vmem:[#allocation2 + $0xc1] sm:$0xff]  ;;  %v1656_v29 = vld [vmem:[#allocation2 + $0xc9] sm:$0xff] }
 0x23b   : > { %1713 = vst.msk [vmem:[#allocation3 + $0xd0] sm:$0xff] %vm1573_vm10, %v1685_v25  ;;  %v1683_v30 = vmax.f32 %v1627_v36, %v1655_v28  ;;  %v1684_v38 = vmax.f32 %v1628_v47, %v1656_v29 }
 0x23c   : > { %1715 = vst.msk [vmem:[#allocation3 + $0xd8] sm:$0x1f] %vm1714_vm0, %v1686_v46 }
 0x23d   : > { %1711 = vst.msk [vmem:[#allocation3 + $0xc0] sm:$0xff] %vm1573_vm10, %v1683_v30  ;;  %1712 = vst.msk [vmem:[#allocation3 + $0xc8] sm:$0xff] %vm1573_vm10, %v1684_v38 }
 0x23f   : > { %v1749_v13 = vld [vmem:[#allocation3 + $0xb0] ss:$2 sm:$0x7f] }
 0x240   : > { %v1750_v61 = vmax.f32 %v1747_v37, %v1749_v13 }
 0x242   : > { %1751 = vst.msk [vmem:[#allocation4 + $0x23] sm:$0x7f] %vm1720_vm11, %v1750_v61 }
 0x243   : > { %v1755_v52 = vld [vmem:[#allocation3 + $0xd0] ss:$2 sm:$0x7f] }
 0x244   : > { %v1753_v2 = vld [vmem:[#allocation3 + $0xc0] ss:$2 sm:$0x7f] }
 0x245   : > { %v1756_v12 = vmax.f32 %v1753_v2, %v1755_v52 }
 0x247   : > { %1757 = vst.msk [vmem:[#allocation4 + $0x2a] sm:$0x7f] %vm1720_vm11, %v1756_v12  ;;  %vm2033_vm11 = vcmask 441344  }
 0x249   : > { %v1778_v32 = vld [vmem:[#allocation4 + $0x20] sm:$0xff]  ;;  %v1779_v44 = vld [vmem:[#allocation4 + $0x28] sm:$0x1]  ;;  %v1781_v41 = vld [vmem:[#allocation4 + $0x29] sm:$0x1] }
 0x24a   : > { %v1776_v17 = vld [vmem:[#allocation4 + $0x1f] sm:$0xff]  ;;  %v3391_v62 = vpack.i.bf16 %v1778_v32, %v4426_v10  ;;  %v1777_v48 = vld [vmem:[#allocation4 + $0x27] sm:$0x1] }
 0x24b   : > { %v3386_v51 = vpack.i.bf16 %v1776_v17, %v4416_v4  ;;  %v1780_v49 = vld [vmem:[#allocation4 + $0x21] sm:$0xff] }
 0x24c   : > { %3392 = vrot.lane.b32.xlu1 %v3391_v62, %s3465_s30  ;;  %v1784_v9 = vld [vmem:[#allocation4 + $0x1e] sm:$0xff]  ;;  %v3396_v26 = vpack.i.bf16 %v1780_v49, %v1766_v16 }
 0x24d   : > { %3387 = vrot.lane.b32.xlu0 %v3386_v51, %s3470_s18 }
 0x24e   : > { %v1785_v59 = vld [vmem:[#allocation4 + $0x26] sm:$0xff]  ;;  %v1786_v20 = vld [vmem:[#allocation4 + $0x2e] sm:$0x1]  ;;  %v1790_v39 = vld [vmem:[#allocation4 + $0x30] sm:$0x1] }
 0x24f   : > { %v3401_v33 = vpack.i.bf16 %v1785_v59, %v1784_v9  ;;  %v1789_v34 = vld [vmem:[#allocation4 + $0x28] sm:$0xff] }
 0x250   : > { %v1787_v22 = vld [vmem:[#allocation4 + $0x27] sm:$0xff]  ;;  %v3411_v35 = vpack.i.bf16 %v1789_v34, %v1778_v32  ;;  %v1788_v21 = vld [vmem:[#allocation4 + $0x2f] sm:$0x1] }
 0x251   : > { %3402 = vrot.lane.b32.xlu1 %v3401_v33, %s3473_s25  ;;  %3397 = vrot.lane.b32.xlu0 %v3396_v26, %s3471_s19  ;;  %v3406_v57 = vpack.i.bf16 %v1787_v22, %v1776_v17 }
 0x255   : > { %3412 = vrot.lane.b32.xlu1 %v3411_v35, %s3475_s27  ;;  %3407 = vrot.lane.b32.xlu0 %v3406_v57, %s3474_s26 }
 0x259   : > { %1824 = vrot.lane.b32.xlu1 %v1772_v43, %s3462_s23  ;;  %1804 = vrot.lane.b32.xlu0 %v1767_v45, %s3468_s11 }
 0x25d   : > { %1864 = vrot.lane.b32.xlu1 %v1779_v44, %s3465_s30  ;;  %1844 = vrot.lane.b32.xlu0 %v1777_v48, %s3470_s18 }
 0x261   : > { %1901 = vrot.lane.b32.xlu1 %v1786_v20, %s3473_s25  ;;  %1881 = vrot.lane.b32.xlu0 %v1781_v41, %s3471_s19  ;;  %v3343_v53 = vpop.permute.xlu1 %3342 }
 0x262   : > { %v3338_v40 = vpop.permute.xlu0 %3337  ;;  %v3345_v4 = vunpack.i.h.bf16 %v3343_v53  ;;  %v3344_v50 = vunpack.i.l.bf16 %v3343_v53 }
 0x263   : > { %v3340_v3 = vunpack.i.h.bf16 %v3338_v40  ;;  %v3339_v54 = vunpack.i.l.bf16 %v3338_v40 }
 0x265   : > { %1935 = vrot.lane.b32.xlu1 %v1790_v39, %s3475_s27  ;;  %1918 = vrot.lane.b32.xlu0 %v1788_v21, %s3474_s26  ;;  %v1943_v7 = vsel %vm1573_vm10, %v4371_v58, %v3340_v3  ;;  %v1942_v1 = vsel %vm1573_vm10, %v1758_v6, %v3339_v54 }
 0x266   : > { %v1947_v60 = vsel %vm1140_vm3, %v1942_v1, %v3344_v50  ;;  %v1948_v19 = vsel %vm1140_vm3, %v1943_v7, %v3345_v4 }
 0x281   : > { %v3353_v8 = vpop.permute.xlu1 %3352 }
 0x282   : > { %v3348_v31 = vpop.permute.xlu0 %3347  ;;  %v3355_v56 = vunpack.i.h.bf16 %v3353_v8  ;;  %v3354_v55 = vunpack.i.l.bf16 %v3353_v8 }
 0x283   : > { %v3350_v16 = vunpack.i.h.bf16 %v3348_v31  ;;  %v3349_v5 = vunpack.i.l.bf16 %v3348_v31 }
 0x285   : > { %v1953_v11 = vsel %vm1952_vm1, %v1947_v60, %v3349_v5  ;;  %v1954_v15 = vsel %vm1952_vm1, %v1948_v19, %v3350_v16 }
 0x286   : > { %v3358_v63 = vpop.permute.xlu0 %3357  ;;  %v1958_v27 = vsel %vm1227_vm6, %v1953_v11, %v3354_v55  ;;  %v1959_v24 = vsel %vm1227_vm6, %v1954_v15, %v3355_v56  ;;  %v1762_v11 = vld [vmem:[#allocation4 + $0x20] sm:$0x1] }
 0x287   : > { %v3360_v14 = vunpack.i.h.bf16 %v3358_v63  ;;  %v3359_v42 = vunpack.i.l.bf16 %v3358_v63 }
 0x289   : > { %v1964_v46 = vsel %vm1963_vm4, %v1958_v27, %v3359_v42  ;;  %v1965_v47 = vsel %vm1963_vm4, %v1959_v24, %v3360_v14 }
 0x2a1   : > { %v3363_v58 = vpop.permute.xlu1 %3362 }
 0x2a2   : > { %v3368_v23 = vpop.permute.xlu0 %3367  ;;  %v3365_v36 = vunpack.i.h.bf16 %v3363_v58  ;;  %v3364_v25 = vunpack.i.l.bf16 %v3363_v58 }
 0x2a3   : > { %v3370_v28 = vunpack.i.h.bf16 %v3368_v23  ;;  %v3369_v29 = vunpack.i.l.bf16 %v3368_v23 }
 0x2a4   : > { %v1969_v30 = vsel %vm1353_vm9, %v1964_v46, %v3364_v25  ;;  %v1970_v38 = vsel %vm1353_vm9, %v1965_v47, %v3365_v36 }
 0x2a5   : > { %v3373_v37 = vpop.permute.xlu1 %3372  ;;  %v1975_v2 = vsel %vm1974_vm5, %v1969_v30, %v3369_v29  ;;  %v1976_v52 = vsel %vm1974_vm5, %v1970_v38, %v3370_v28 }
 0x2a6   : > { %v3375_v13 = vunpack.i.h.bf16 %v3373_v37  ;;  %v3374_v61 = vunpack.i.l.bf16 %v3373_v37  ;;  %v3378_v62 = vpop.permute.xlu0 %3377 }
 0x2a7   : > { %v3380_v49 = vunpack.i.h.bf16 %v3378_v62  ;;  %v3379_v9 = vunpack.i.l.bf16 %v3378_v62  ;;  %v3425_v62 = vld [vmem:[%s4628_s2 + $0x34] sm:$0xff]  }
 0x2a8   : > { %v1981_v12 = vsel %vm1980_vm7, %v1975_v2, %v3374_v61  ;;  %v1982_v32 = vsel %vm1980_vm7, %v1976_v52, %v3375_v13  ;;  %v3423_v52 = vld [vmem:[%s4628_s2 + $0x44] sm:$0x7f]  }
 0x2a9   : > { %v1994_v17 = vpack.c.bf16 %v1982_v32, %v1981_v12  ;;  %v3383_v51 = vpop.permute.xlu1 %3382  ;;  %v1945_v22 = vsel %vm1573_vm10, %v4426_v10, %v3380_v49  ;;  %v1944_v35 = vsel %vm1573_vm10, %v4373_v18, %v3379_v9  ;;  %v3424_v12 = vld [vmem:[%s4628_s2 + $0x3c] sm:$0xff]   ;;  %v2201_v32 = vrot.slane %v3423_v52, 1 }
 0x2aa   : > { %v3385_v59 = vunpack.i.h.bf16 %v3383_v51  ;;  %v3384_v33 = vunpack.i.l.bf16 %v3383_v51  ;;  %v2197_v9 = vrot.slane %v3425_v62, 1  ;;  %v3429_v62 = vld [vmem:[%s4628_s2 + $0x48] sm:$0xf8]  }
 0x2ab   : > { %2700 = vmatmul.mubr.msk.bf16.vlgmr.msra.gmra.mxu1 %vm2033_vm11, %v1994_v17  ;;  %v2199_v17 = vrot.slane %v3424_v12, 1  ;;  %v2212_v51 = vsel %vm2022_vm13, %v2201_v32, 0  ;;  %vm2275_vm13 = vcmask 1044480  }
 0x2ac   : > { %2703 = vmatprep.mubr.msk.bf16.mxu1 %vm3472_vm14, %v3469_v0  ;;  %v1949_v45 = vsel %vm1140_vm3, %v1944_v35, %v3384_v33  ;;  %v1950_v44 = vsel %vm1140_vm3, %v1945_v22, %v3385_v59  ;;  %2712 = vmatpush3.bf16.msra.mxu1 %v2212_v51  ;;  %v2586_v33 = vld [vmem:[%s4629_s3 + $0x1] ss:$0 sm:$0xff]  ;;  %v2276_v51 = vrot.slane %v3429_v62, 3 }
 0x2ad   : > { %2713 = vmatprep.subr.bf16.mxu1 %v3469_v0 }
 0x2be   : > { %v3393_v26 = vpop.permute.xlu1 %3392 }
 0x2bf   : > { %v3388_v34 = vpop.permute.xlu0 %3387  ;;  %v3395_v48 = vunpack.i.h.bf16 %v3393_v26  ;;  %v3394_v20 = vunpack.i.l.bf16 %v3393_v26 }
 0x2c0   : > { %v3390_v57 = vunpack.i.h.bf16 %v3388_v34  ;;  %v3389_v43 = vunpack.i.l.bf16 %v3388_v34 }
 0x2c2   : > { %v1955_v41 = vsel %vm1952_vm1, %v1949_v45, %v3389_v43  ;;  %v1956_v39 = vsel %vm1952_vm1, %v1950_v44, %v3390_v57 }
 0x2c3   : > { %v3403_v21 = vpop.permute.xlu1 %3402  ;;  %v3398_v40 = vpop.permute.xlu0 %3397  ;;  %v1960_v18 = vsel %vm1227_vm6, %v1955_v41, %v3394_v20  ;;  %v1961_v54 = vsel %vm1227_vm6, %v1956_v39, %v3395_v48 }
 0x2c4   : > { %v3400_v31 = vunpack.i.h.bf16 %v3398_v40  ;;  %v3399_v53 = vunpack.i.l.bf16 %v3398_v40  ;;  %v3405_v10 = vunpack.i.h.bf16 %v3403_v21  ;;  %v3404_v3 = vunpack.i.l.bf16 %v3403_v21 }
 0x2c6   : > { %v1966_v4 = vsel %vm1963_vm4, %v1960_v18, %v3399_v53  ;;  %v1967_v50 = vsel %vm1963_vm4, %v1961_v54, %v3400_v31 }
 0x2c7   : > { %v3413_v6 = vpop.permute.xlu1 %3412  ;;  %v3408_v7 = vpop.permute.xlu0 %3407  ;;  %v1971_v63 = vsel %vm1353_vm9, %v1966_v4, %v3404_v3  ;;  %v1972_v56 = vsel %vm1353_vm9, %v1967_v50, %v3405_v10 }
 0x2c8   : > { %v3415_v1 = vunpack.i.h.bf16 %v3413_v6  ;;  %v3414_v8 = vunpack.i.l.bf16 %v3413_v6  ;;  %v3410_v16 = vunpack.i.h.bf16 %v3408_v7  ;;  %v3409_v5 = vunpack.i.l.bf16 %v3408_v7 }
 0x2ca   : > { %v1977_v55 = vsel %vm1974_vm5, %v1971_v63, %v3409_v5  ;;  %v1978_v60 = vsel %vm1974_vm5, %v1972_v56, %v3410_v16  ;;  %v3426_v56 = vld [vmem:[%s4628_s2 + $0x2c] sm:$0xfe]  }
 0x2cb   : > { %v1825_v19 = vpop.permute.xlu1 %1824  ;;  %v1805_v15 = vpop.permute.xlu0 %1804  ;;  %v1983_v14 = vsel %vm1980_vm7, %v1977_v55, %v3414_v8  ;;  %v1984_v42 = vsel %vm1980_vm7, %v1978_v60, %v3415_v1  ;;  %v2196_v60 = vrot.slane %v3426_v56, 1 }
 0x2cc   : > { %v1946_v58 = vsel %vm1573_vm10, %v1762_v11, %v1805_v15  ;;  %v1995_v23 = vpack.c.bf16 %v1984_v42, %v1983_v14  ;;  %vm2195_vm10 = vcmask 1046528  }
 0x2cd   : > { %v1951_v24 = vsel %vm1140_vm3, %v1946_v58, %v1825_v19  ;;  %v2202_v49 = vsel %vm2195_vm10, %v2199_v17, %v2201_v32  ;;  %v2200_v59 = vsel %vm2195_vm10, %v2197_v9, %v2199_v17  ;;  %v2198_v11 = vsel %vm2195_vm10, %v2196_v60, %v2197_v9  ;;  %v3430_v9 = vld [vmem:[%s4628_s2 + $0x70] sm:$0xff]  }
 0x2ce   : > { %2704 = vmatmul.mubr.msk.bf16.gmra.mxu1 %vm2033_vm11, %v1995_v23 }
 0x2cf   : > { %v1865_v27 = vpop.permute.xlu1 %1864  ;;  %v1845_v36 = vpop.permute.xlu0 %1844  ;;  %2707 = vmatprep.mubr.msk.bf16.mxu1 %vm3472_vm14, %v3469_v0  ;;  %2714 = vmatpush3.bf16.msra.mxu1 %v2202_v49 }
 0x2d0   : > { %v1957_v25 = vsel %vm1952_vm1, %v1951_v24, %v1845_v36  ;;  %2715 = vmatprep.subr.bf16.mxu1 %v3469_v0 }
 0x2d1   : > { %v1962_v47 = vsel %vm1227_vm6, %v1957_v25, %v1865_v27  ;;  %v2594_v25 = vld [vmem:[%s204_s17] ss:$0 sm:$0xff] }
 0x2d3   : > { %v1902_v46 = vpop.permute.xlu1 %1901  ;;  %v1882_v28 = vpop.permute.xlu0 %1881  ;;  %2716 = vmatpush3.bf16.msra.mxu1 %v2200_v59  ;;  %v3431_v59 = vld [vmem:[%s4628_s2 + $0x78] ss:$0 sps:$4 sm:$0x77]  }
 0x2d4   : > { %v1968_v29 = vsel %vm1963_vm4, %v1962_v47, %v1882_v28  ;;  %2717 = vmatprep.subr.bf16.mxu1 %v3469_v0  ;;  %v3427_v28 = vld [vmem:[%s4628_s2 + $0x50] sm:$0xff]  }
 0x2d5   : > { %v1973_v38 = vsel %vm1353_vm9, %v1968_v29, %v1902_v46  ;;  %v3428_v29 = vld [vmem:[%s4628_s2 + $0x58] ss:$0 sps:$4 sm:$0x77]  }
 0x2d7   : > { %v1936_v30 = vpop.permute.xlu1 %1935  ;;  %v1919_v37 = vpop.permute.xlu0 %1918  ;;  %2718 = vmatpush3.bf16.msra.mxu1 %v2198_v11 }
 0x2d8   : > { %v1979_v13 = vsel %vm1974_vm5, %v1973_v38, %v1919_v37  ;;  %2723 = vmatprep.subr.bf16.mxu1 %v3469_v0 }
 0x2d9   : > { %v1985_v61 = vsel %vm1980_vm7, %v1979_v13, %v1936_v30  ;;  %v2277_v13 = vrot.slane %v3427_v28, 3 }
 0x2da   : > { %v1996_v2 = vpack.c.bf16 %v1985_v61, %v1985_v61  ;;  %v2279_v61 = vrot.slane %v3428_v29, 3 }
 0x2db   : > { %v2278_v49 = vsel %vm2275_vm13, %v2276_v51, %v2277_v13 }
 0x2dc   : > { %2708 = vmatmul.mubr.msk.bf16.gmra.mxu1 %vm2033_vm11, %v1996_v2  ;;  %v2280_v17 = vsel %vm2275_vm13, %v2277_v13, %v2279_v61 }
 0x2dd   : > { %2719 = vmatprep.mubr.msk.bf16.mxu1 %vm3472_vm14, %v3469_v0 }
 0x36b   : > { %v2081_v26 = vpop.f32.mrf.mxu1 }
 0x36c   : > { %v2082_v34 = vadd.f32 %v2586_v33, %v2081_v26 }
 0x36d   : > { %v2701_v22 = vpop.f32.mrf.mxu1 }
 0x36e   : > { %v2103_v35 = vmax.f32 %v2082_v34, 0.0  ;;  %v2366_v22 = vrot.slane %v3430_v9, 3 }
 0x36f   : > { %v2084_v57 = vpop.f32.mrf.mxu1 }
 0x370   : > { %2108 = vst.msk [vmem:[#allocation5] sm:$0xff] %vm1140_vm3, %v2103_v35  ;;  %v2085_v43 = vadd.f32 %v2586_v33, %v2084_v57  ;;  %v2368_v35 = vrot.slane %v3431_v59, 3  ;;  %v3432_v57 = vld [vmem:[%s4628_s2 + $0x68] sm:$0xff]  }
 0x371   : > { %v2702_v45 = vpop.f32.mrf.mxu1 }
 0x372   : > { %v2104_v44 = vmax.f32 %v2085_v43, 0.0 }
 0x374   : > { %2109 = vst.msk [vmem:[#allocation5 + $0x8] sm:$0xff] %vm1140_vm3, %v2104_v44 }
 0x377   : > { %v2114_v48 = vld [vmem:[#allocation5] sm:$0xff] }
 0x37b   : > { %v2118_v20 = vld [vmem:[#allocation5 + $0x1] sm:$0xff] }
 0x37c   : > { %v2122_v41 = vmax.f32 %v2114_v48, %v2118_v20  ;;  %v2115_v54 = vld [vmem:[#allocation5 + $0x8] sm:$0xff]  ;;  %v2369_v20 = vsel %vm2275_vm13, %v2366_v22, %v2368_v35 }
 0x37e   : > { %2126 = vst.msk [vmem:[#allocation6] sm:$0xff] %vm1140_vm3, %v2122_v41  ;;  %v2364_v41 = vrot.slane %v3432_v57, 3 }
 0x385   : > { %v2130_v15 = vld [vmem:[#allocation6] ss:$2 sm:$0x3] }
 0x38e   : > { %v2089_v39 = vpop.f32.mrf.mxu1 }
 0x38f   : > { %v2090_v21 = vadd.f32 %v2586_v33, %v2089_v39 }
 0x390   : > { %v2705_v40 = vpop.f32.mrf.mxu1 }
 0x391   : > { %v2105_v31 = vmax.f32 %v2090_v21, 0.0  ;;  %v2367_v21 = vsel %vm2275_vm13, %v2364_v41, %v2366_v22  ;;  %v3433_v40 = vld [vmem:[%s4628_s2 + $0x60] sm:$0xff]  }
 0x392   : > { %v2092_v53 = vpop.f32.mrf.mxu1 }
 0x393   : > { %2110 = vst.msk [vmem:[#allocation5 + $0x10] sm:$0xff] %vm1140_vm3, %v2105_v31  ;;  %v2093_v10 = vadd.f32 %v2586_v33, %v2092_v53  ;;  %v2362_v31 = vrot.slane %v3433_v40, 3 }
 0x394   : > { %v2706_v3 = vpop.f32.mrf.mxu1 }
 0x395   : > { %v2106_v18 = vmax.f32 %v2093_v10, 0.0  ;;  %v2365_v53 = vsel %vm2275_vm13, %v2362_v31, %v2364_v41  ;;  %v3434_v10 = vld [vmem:[%s4628_s2 + $0x58] sm:$0xf8]  }
 0x396   : > { %v2361_v3 = vrot.slane %v3434_v10, 3 }
 0x397   : > { %2111 = vst.msk [vmem:[#allocation5 + $0x18] sm:$0xff] %vm1140_vm3, %v2106_v18 }
 0x398   : > { %v2363_v18 = vsel %vm2275_vm13, %v2361_v3, %v2362_v31 }
 0x39a   : > { %v2119_v4 = vld [vmem:[#allocation5 + $0x9] sm:$0xff] }
 0x39b   : > { %v2123_v50 = vmax.f32 %v2115_v54, %v2119_v4  ;;  %v2116_v1 = vld [vmem:[#allocation5 + $0x10] sm:$0xff]  ;;  %v3435_v54 = vld [vmem:[%s4628_s2 + $0x80] sm:$0xff]  }
 0x39c   : > { %v2097_v6 = vpop.f32.mrf.mxu1  ;;  %v3436_v4 = vld [vmem:[%s4628_s2 + $0x88] ss:$0 sps:$4 sm:$0x77]  }
 0x39d   : > { %2127 = vst.msk [vmem:[#allocation6 + $0x8] sm:$0xff] %vm1140_vm3, %v2123_v50  ;;  %v2098_v7 = vadd.f32 %v2586_v33, %v2097_v6  ;;  %v2174_v33 = vld [vmem:[%s4629_s3 + $0x2] sm:$0x1]  ;;  %v3437_v50 = vld [vmem:[%s4628_s2 + $0x78] sm:$0xf8]   ;;  %v2440_v6 = vrot.slane %v3435_v54, 3 }
 0x39e   : > { %v2120_v8 = vld [vmem:[#allocation5 + $0x11] sm:$0xff]  ;;  %v2709_v16 = vpop.f32.mrf.mxu1 }
 0x39f   : > { %v2124_v5 = vmax.f32 %v2116_v1, %v2120_v8  ;;  %v2107_v63 = vmax.f32 %v2098_v7, 0.0  ;;  %v2442_v7 = vrot.slane %v3436_v4, 3  ;;  %v2439_v1 = vrot.slane %v3437_v50, 3 }
 0x3a0   : > { %v2100_v55 = vpop.f32.mrf.mxu1 }
 0x3a1   : > { %2128 = vst.msk [vmem:[#allocation6 + $0x10] sm:$0xff] %vm1140_vm3, %v2124_v5  ;;  %v2443_v8 = vsel %vm2275_vm13, %v2440_v6, %v2442_v7  ;;  %v2441_v16 = vsel %vm2275_vm13, %v2439_v1, %v2440_v6  ;;  %v2261_v5 = vld [vmem:[%s4629_s3 + $0x3] sm:$0x1] }
 0x3a2   : > { %2113 = vst.msk [vmem:[#allocation5 + $0x20] sm:$0x1] %vm2112_vm12, %v2107_v63  ;;  %v2710_v19 = vpop.f32.mrf.mxu1  ;;  %2744 = vmatpush3.bf16.msra.mxu0 %v2443_v8 }
 0x3a3   : > { %2745 = vmatprep.subr.bf16.mxu0 %v3469_v0 }
 0x3a4   : > { %v2132_v14 = vld [vmem:[#allocation6 + $0x7] ss:$2 sm:$0x3] }
 0x3a5   : > { %v2133_v42 = vmax.f32 %v2130_v15, %v2132_v14 }
 0x3a6   : > { %2746 = vmatpush3.bf16.msra.mxu0 %v2441_v16 }
 0x3a7   : > { %v2141_v58 = vrot.slane %v2133_v42, 1 }
 0x3a8   : > { %v2135_v23 = vld [vmem:[#allocation6 + $0xe] ss:$2 sm:$0x3]  ;;  %v2137_v27 = vld [vmem:[#allocation6 + $0x15] ss:$2 sm:$0x3] }
 0x3a9   : > { %2142 = vrot.lane.b32.xlu0 %v2141_v58, %s3462_s23  ;;  %v2138_v24 = vmax.f32 %v2135_v23, %v2137_v27 }
 0x3ab   : > { %2146 = vrot.lane.b32.xlu1 %v2138_v24, %s3465_s30  ;;  %v2149_v36 = vrot.slane %v2138_v24, 1 }
 0x3ad   : > { %2150 = vrot.lane.b32.xlu0 %v2149_v36, %s3473_s25  ;;  %s207_s25 = scalar_lea.vmem %s4630_s4, %s4632_s16 }
 0x3af   : > { %2158 = vrot.lane.b32.xlu1 %v2594_v25, %s3475_s27  ;;  %v2425_v25 = vld [vmem:[%s4629_s3 + $0x5] sm:$0x1] }
 0x41b   : > { %v2143_v46 = vpop.permute.xlu0 %2142 }
 0x41c   : > { %v2161_v47 = vsel %vm1140_vm3, %v2133_v42, %v2143_v46  ;;  %vm2206_vm3 = vcmask 490496  }
 0x41d   : > { %v2147_v30 = vpop.permute.xlu1 %2146 }
 0x41e   : > { %v2162_v38 = vsel %vm1227_vm6, %v2161_v47, %v2147_v30  ;;  %vm2374_vm6 = vcmask 523264  }
 0x41f   : > { %v2151_v37 = vpop.permute.xlu0 %2150 }
 0x420   : > { %v2163_v2 = vsel %vm1353_vm9, %v2162_v38, %v2151_v37  ;;  %vm2489_vm9 = vcmask 57344  }
 0x421   : > { %v2159_v52 = vpop.permute.xlu1 %2158 }
 0x422   : > { %v2164_v12 = vsel %vm1980_vm7, %v2163_v2, %v2159_v52 }
 0x423   : > { %v2173_v32 = vpack.c.bf16 %v2164_v12, %v2164_v12 }
 0x425   : > { %2720 = vmatmul.mubr.msk.bf16.vlgmr.msra.gmra.mxu1 %vm2206_vm3, %v2173_v32 }
 0x426   : > { %2724 = vmatpush3.bf16.msra.mxu1 %v2280_v17  ;;  %2727 = vmatprep.mubr.msk.bf16.mxu1 %vm3472_vm14, %v3469_v0 }
 0x427   : > { %2725 = vmatprep.subr.bf16.mxu1 %v3469_v0 }
 0x42a   : > { %2726 = vmatpush3.bf16.msra.mxu1 %v2278_v49 }
 0x42b   : > { %2731 = vmatprep.subr.bf16.mxu1 %v3469_v0 }
 0x4e5   : > { %v2248_v26 = vpop.f32.mrf.mxu1 }
 0x4e6   : > { %v2249_v34 = vadd.f32 %v2248_v26, %v2174_v33 }
 0x4e7   : > { %v2721_v43 = vpop.f32.mrf.mxu1 }
 0x4e8   : > { %v2254_v45 = vmax.f32 %v2249_v34, 0.0 }
 0x4e9   : > { %v2251_v44 = vpop.f32.mrf.mxu1 }
 0x4ea   : > { %v2260_v48 = vpack.c.bf16 %v2254_v45, %v2254_v45 }
 0x4eb   : > { %v2722_v39 = vpop.f32.mrf.mxu1 }
 0x4ec   : > { %2728 = vmatmul.mubr.msk.bf16.vlgmr.msra.gmra.mxu1 %vm1285_vm8, %v2260_v48 }
 0x4ed   : > { %2732 = vmatpush3.bf16.msra.mxu1 %v2369_v20  ;;  %2739 = vmatprep.mubr.msk.bf16.mxu1 %vm3472_vm14, %v3469_v0 }
 0x4ee   : > { %2733 = vmatprep.subr.bf16.mxu1 %v3469_v0 }
 0x4f1   : > { %2734 = vmatpush3.bf16.msra.mxu1 %v2367_v21 }
 0x4f2   : > { %2735 = vmatprep.subr.bf16.mxu1 %v3469_v0 }
 0x4f5   : > { %2736 = vmatpush3.bf16.msra.mxu1 %v2365_v53 }
 0x4f6   : > { %2737 = vmatprep.subr.bf16.mxu1 %v3469_v0  ;;  %v2337_v0 = vld [vmem:[%s4629_s3 + $0x4] sm:$0x1] }
 0x4f9   : > { %2738 = vmatpush3.bf16.msra.mxu1 %v2363_v18 }
 0x5ac   : > { %v2320_v63 = vpop.f32.mrf.mxu1 }
 0x5ad   : > { %v2321_v56 = vadd.f32 %v2320_v63, %v2261_v5 }
 0x5ae   : > { %v2729_v55 = vpop.f32.mrf.mxu1 }
 0x5af   : > { %v2326_v60 = vmax.f32 %v2321_v56, 0.0 }
 0x5b0   : > { %v2323_v19 = vpop.f32.mrf.mxu1 }
 0x5b1   : > { %v2336_v11 = vpack.c.bf16 %v2326_v60, %v2326_v60 }
 0x5b2   : > { %v2730_v15 = vpop.f32.mrf.mxu1 }
 0x5b3   : > { %2740 = vmatmul.mubr.msk.bf16.vlgmr.msra.gmra.mxu1 %vm2374_vm6, %v2336_v11 }
 0x673   : > { %v2412_v14 = vpop.f32.mrf.mxu1 }
 0x674   : > { %v2413_v42 = vadd.f32 %v2412_v14, %v2337_v0 }
 0x675   : > { %v2741_v58 = vpop.f32.mrf.mxu1 }
 0x676   : > { %v2418_v23 = vmax.f32 %v2413_v42, 0.0 }
 0x677   : > { %v2415_v27 = vpop.f32.mrf.mxu1 }
 0x678   : > { %v2424_v24 = vpack.c.bf16 %v2418_v23, %v2418_v23 }
 0x679   : > { %v2742_v36 = vpop.f32.mrf.mxu1 }
 0x67a   : > { %2748 = vmatmul.mubr.msk.bf16.vlgmr.msra.gmra.mxu0 %vm1285_vm8, %v2424_v24  ;;  %vm2503_vm8 = vcmask 65536  }
 0x73a   : > { %v2483_v46 = vpop.f32.mrf.mxu0 }
 0x73b   : > { %v2484_v47 = vadd.f32 %v2483_v46, %v2425_v25 }
 0x73c   : > { %v2749_v28 = vpop.f32.mrf.mxu0 }
 0x73d   : > { %v2490_v29 = vsel %vm2489_vm9, %v2484_v47, -inf  ;;  %v2501_v17 = vmax.f32 %v2484_v47, 0.0 }
 0x73e   : > { %2491 = vmax.xlane.f32.xlu0 %v2490_v29  ;;  %v2486_v30 = vpop.f32.mrf.mxu0 }
 0x740   : > { %v2750_v38 = vpop.f32.mrf.mxu0 }
 0x7c7   : > { %v2492_v37 = vpop.xlane.xlu0 %2491 }
 0x7c8   : > { %v2493_v13 = vsub.f32 %v2484_v47, %v2492_v37 }
 0x7ca   : > { %v2494_v61 = vmul.f32 1.442695, %v2493_v13 }
 0x7cc   : > { %3438 = vpow2.f32 %v2494_v61 }
 0x7d9   : > { %v3439_v2 = vpop.eup %3438 }
 0x7da   : > { %v2496_v52 = vsel %vm2489_vm9, %v3439_v2, 0.0 }
 0x7db   : > { %2497 = vadd.xlane.f32.xlu1 %v2496_v52 }
 0x864   : > { %v2498_v12 = vpop.xlane.xlu1 %2497 }
 0x865   : > { %3440 = vrcp.f32 %v2498_v12 }
 0x872   : > { %v3441_v32 = vpop.eup %3440 }
 0x873   : > { %v2500_v62 = vmul.f32 %v3441_v32, %v3439_v2 }
 0x875   : > { %v2502_v51 = vsel %vm1111_vm2, %v2500_v62, %v2501_v17 }
 0x876   : > { %2504 = vst.msk [vmem:[%s207_s25] sm:$0x1] %vm2503_vm8, %v2502_v51 }
 0x877 PF: > { %s14_s15 = sadd.s32 1, %s3458_s15  }
 0x878   : > { %p11_p4 = scmp.ge.s32.totalorder %s14_s15, 4  }
 0x87a   :  { %13 = sbr.rel (!%p11_p4) target bundleno = 1 (0x1), region = 85 }

</bundles_post_ra>
